<compile_context>
chip_gen: v6e
topology: v6e:2x2x1
jax: 0.10.0
libtpu: 0.0.40
codegen_flags: <defaults>
</compile_context>

<pallas_src>
import functools
import numpy as np
import jax
import jax.numpy as jnp
from jax.experimental import pallas as pl
from jax.experimental.pallas import tpu as pltpu


def blender_tiles_kernel(x_ref,
                         w03_ref, b0_ref, w1_ref, b1_ref, w2_ref, b2_ref,
                         w3h_ref, b3_ref, wl_ref, bl_ref,
                         part_ref,
                         *, tm, input_ch, hidden_w, batch_groups, g_pad, num_valid):
    """Point MLP (D=4, skip after layer 2) + last_w_layer + per-group partial sums."""
    step = pl.program_id(0)

    # Zero padded / truncated rows so garbage in the padded last tile can never
    # reach the pooling matmul (0 * NaN hazard).
    row = jax.lax.broadcasted_iota(jnp.int32, (tm, 1), 0) + step * tm
    valid = row < num_valid
    x = jnp.where(valid, x_ref[...], 0.0)                       # (tm, in_dim) f32
    pts = x[:, :input_ch].astype(jnp.bfloat16)                  # views unused (use_viewdirs=False)

    # Fused K=3 projection: pts @ [w0 | w3p] in one MXU pass; reuse at the skip layer.
    pw = jnp.dot(pts, w03_ref[...], preferred_element_type=jnp.float32)   # (tm, 2W)
    h = jnp.maximum(pw[:, :hidden_w] + b0_ref[...], 0.0).astype(jnp.bfloat16)

    def dense_relu(v, w_ref, b_ref):
        y = jnp.dot(v, w_ref[...], preferred_element_type=jnp.float32) + b_ref[...]
        return jnp.maximum(y, 0.0).astype(jnp.bfloat16)

    h = dense_relu(h, w1_ref, b1_ref)
    h = dense_relu(h, w2_ref, b2_ref)
    # skip: relu(cat([pts, h]) @ w3 + b3) == relu(pts @ w3p + h @ w3h + b3)
    h = jnp.maximum(pw[:, hidden_w:]
                    + jnp.dot(h, w3h_ref[...], preferred_element_type=jnp.float32)
                    + b3_ref[...], 0.0).astype(jnp.bfloat16)
    h = dense_relu(h, wl_ref, bl_ref)                           # (tm, W_last) bf16

    # group_batches (row i -> group i % batch_groups, truncated) + sum pool,
    # expressed as a single one-hot matmul (g_pad, tm) @ (tm, W_last) on the MXU.
    grp = jax.lax.broadcasted_iota(jnp.int32, (g_pad, tm), 0)
    col = jax.lax.broadcasted_iota(jnp.int32, (g_pad, tm), 1) + step * tm
    if (batch_groups & (batch_groups - 1)) == 0:
        gid = jnp.bitwise_and(col, batch_groups - 1)
    else:
        gid = jax.lax.rem(col, batch_groups)
    onehot_t = jnp.logical_and(gid == grp, col < num_valid).astype(jnp.bfloat16)
    part_ref[0] = jnp.dot(onehot_t, h, preferred_element_type=jnp.float32)   # (g_pad, W_last) f32


def blender_tail_kernel(gs_ref, wo0_ref, bo0_ref, wo1_ref, bo1_ref, wo2_ref, bo2_ref,
                        out_ref, *, batch_groups, inv_rows_per_group):
    """Mean pool finalize + output_linear transit chain + expert mean (f32, runs once)."""
    pooled = gs_ref[...] * inv_rows_per_group                   # (g_pad, W_last); padded rows are 0
    o = jnp.maximum(jnp.dot(pooled, wo0_ref[...], preferred_element_type=jnp.float32) + bo0_ref[...], 0.0)
    o = jnp.maximum(jnp.dot(o, wo1_ref[...], preferred_element_type=jnp.float32) + bo1_ref[...], 0.0)
    o = jnp.maximum(jnp.dot(o, wo2_ref[...], preferred_element_type=jnp.float32) + bo2_ref[...], 0.0)
    # reshape(-1, num_experts, expert_dim).mean(0) == mean over the (real) group rows.
    gmask = (jax.lax.broadcasted_iota(jnp.int32, o.shape, 0) < batch_groups).astype(jnp.float32)
    out_ref[...] = jnp.sum(o * gmask, axis=0, keepdims=True) * (1.0 / batch_groups)


def blender_forward(x, params, *, input_ch, batch_groups, tm):
    N, in_dim = x.shape
    if N < batch_groups:
        raise ValueError("N must be >= batch_groups (rows_per_group would be 0)")

    hidden_w = params["w1"].shape[0]
    W_last = params["wl"].shape[1]
    out_dim = params["wo2"].shape[1]
    rows_per_group = N // batch_groups
    num_valid = batch_groups * rows_per_group
    g_pad = max(8, ((batch_groups + 7) // 8) * 8)        # sublane-padded group axis
    out_pad = ((out_dim + 127) // 128) * 128             # lane-dense final output
    num_blocks = pl.cdiv(N, tm)

    bf16 = jnp.bfloat16
    # Fused pts projection weight [w0 | w3p]; all point-MLP weights in bf16, biases f32.
    w03 = jnp.concatenate([params["w0"], params["w3p"]], axis=1).astype(bf16)
    mlp_params = [w03, params["b0"],
                  params["w1"].astype(bf16), params["b1"],
                  params["w2"].astype(bf16), params["b2"],
                  params["w3h"].astype(bf16), params["b3"],
                  params["wl"].astype(bf16), params["bl"]]

    # --- kernel 1: per-tile point MLP + partial group sums (parallel grid) ---
    tiles_kernel = functools.partial(
        blender_tiles_kernel, tm=tm, input_ch=input_ch, hidden_w=hidden_w,
        batch_groups=batch_groups, g_pad=g_pad, num_valid=num_valid)

    partial_sums = pl.pallas_call(
        tiles_kernel,
        out_shape=jax.ShapeDtypeStruct((num_blocks, g_pad, W_last), jnp.float32),
        grid_spec=pltpu.PrefetchScalarGridSpec(
            num_scalar_prefetch=0,
            grid=(num_blocks,),
            in_specs=[pl.BlockSpec((tm, in_dim), lambda i: (i, 0))]
                     + [pl.BlockSpec(p.shape, lambda i: (0, 0)) for p in mlp_params],
            out_specs=pl.BlockSpec((1, g_pad, W_last), lambda i: (i, 0, 0))),
        compiler_params=pltpu.CompilerParams(dimension_semantics=("parallel",)),
    )(x, *mlp_params)

    # Trivial block reduce in XLA (keeps the big kernel's grid axis fully parallel).
    group_sums = jnp.sum(partial_sums, axis=0)           # (g_pad, W_last) f32

    # --- kernel 2: single-step finalize (scale + transit MLP + expert mean) ---
    if out_pad == out_dim:
        wo2p, bo2p = params["wo2"], params["bo2"]
    else:
        wo2p = jnp.zeros((params["wo2"].shape[0], out_pad), jnp.float32).at[:, :out_dim].set(params["wo2"])
        bo2p = jnp.zeros((1, out_pad), jnp.float32).at[:, :out_dim].set(params["bo2"])

    tail_kernel = functools.partial(
        blender_tail_kernel, batch_groups=batch_groups,
        inv_rows_per_group=1.0 / rows_per_group)

    out = pl.pallas_call(
        tail_kernel,
        out_shape=jax.ShapeDtypeStruct((1, out_pad), jnp.float32),
    )(group_sums, params["wo0"], params["bo0"], params["wo1"], params["bo1"], wo2p, bo2p)

    # TODO(synk): aggregation='linear'/'softmax' post-scaling not implemented
    # (module default / demo uses aggregation=None -> identity).
    return out[:, :out_dim]


if __name__ == "__main__":
    # Small but structurally faithful hyper-params.
    input_ch, input_ch_views = 3, 3
    D, W = 4, 128               # D pts_linears layers, hidden width W
    skips = [2]                 # skip concat after layer index 2
    W_last = 256
    expert_dim, num_experts = 16, 4
    transit_steps = 3
    batch_groups = 2
    aggregation = None          # identity
    N = 1000                    # number of input points (exercises the padded last tile)
    tm = 512                    # row tile (large M for the MXU, amortized grid overhead)

    key = jax.random.PRNGKey(0)

    def dense(k, fan_in, fan_out):
        k1, k2 = jax.random.split(k)
        w = jax.random.normal(k1, (fan_in, fan_out), jnp.float32) / np.sqrt(fan_in)
        b = 0.01 * jax.random.normal(k2, (1, fan_out), jnp.float32)
        return w, b

    keys = jax.random.split(key, 10)
    w0, b0 = dense(keys[0], input_ch, W)
    w1, b1 = dense(keys[1], W, W)
    w2, b2 = dense(keys[2], W, W)
    w3, b3 = dense(keys[3], W + input_ch, W)        # skip layer: takes cat([pts, h])
    wl, bl = dense(keys[4], W, W_last)
    dims = np.round(np.linspace(W_last, expert_dim * num_experts, transit_steps + 1)).astype(int)
    wo0, bo0 = dense(keys[5], int(dims[0]), int(dims[1]))
    wo1, bo1 = dense(keys[6], int(dims[1]), int(dims[2]))
    wo2, bo2 = dense(keys[7], int(dims[2]), int(dims[3]))

    params = dict(w0=w0, b0=b0, w1=w1, b1=b1, w2=w2, b2=b2,
                  w3p=w3[:input_ch], w3h=w3[input_ch:], b3=b3,
                  wl=wl, bl=bl, wo0=wo0, bo0=bo0, wo1=wo1, bo1=bo1, wo2=wo2, bo2=bo2)

    x = jax.random.normal(keys[8], (N, input_ch + input_ch_views), jnp.float32)

    out = blender_forward(x, params, input_ch=input_ch, batch_groups=batch_groups, tm=tm)
    out = out.reshape(num_experts, expert_dim)      # aggregation=None -> identity
    jax.block_until_ready(out)

    # Pure-JAX f32 reference mirroring the PyTorch forward (use_viewdirs=False path).
    def ref_forward(xx):
        pts = xx[:, :input_ch]
        h = jax.nn.relu(pts @ w0 + b0)
        h = jax.nn.relu(h @ w1 + b1)
        h = jax.nn.relu(h @ w2 + b2)
        h = jnp.concatenate([pts, h], -1)
        h = jax.nn.relu(h @ w3 + b3)
        h = jax.nn.relu(h @ wl + bl)
        g = jnp.stack([h[i::batch_groups][: N // batch_groups] for i in range(batch_groups)], 0)
        p = g.mean(axis=1)
        p = jax.nn.relu(p @ wo0 + bo0)
        p = jax.nn.relu(p @ wo1 + bo1)
        p = jax.nn.relu(p @ wo2 + bo2)
        return p.reshape(-1, num_experts, expert_dim).mean(axis=0)

    ref = ref_forward(x)
    # bf16 point-MLP weights/activations (f32 accumulation) -> relaxed tolerance vs f32 ref.
    np.testing.assert_allclose(np.asarray(out), np.asarray(ref), rtol=3e-2, atol=1e-2)
    print("KERNEL_OK")
</pallas_src>

<mosaic_0001>
module attributes {stable_mosaic.version = 11 : i64} {
  func.func @blender_tiles_kernel(%arg0: i32, %arg1: memref<512x6xf32, #tpu.memory_space<vmem>>, %arg2: memref<3x256xbf16, #tpu.memory_space<vmem>>, %arg3: memref<1x128xf32, #tpu.memory_space<vmem>>, %arg4: memref<128x128xbf16, #tpu.memory_space<vmem>>, %arg5: memref<1x128xf32, #tpu.memory_space<vmem>>, %arg6: memref<128x128xbf16, #tpu.memory_space<vmem>>, %arg7: memref<1x128xf32, #tpu.memory_space<vmem>>, %arg8: memref<128x128xbf16, #tpu.memory_space<vmem>>, %arg9: memref<1x128xf32, #tpu.memory_space<vmem>>, %arg10: memref<128x256xbf16, #tpu.memory_space<vmem>>, %arg11: memref<1x256xf32, #tpu.memory_space<vmem>>, %arg12: memref<1x8x256xf32, #tpu.memory_space<vmem>>) attributes {dimension_semantics = [#tpu.dimension_semantics<parallel>], iteration_bounds = array<i64: 2>, scalar_prefetch = 0 : i64, scratch_operands = 0 : i64, tpu.core_type = #tpu.core_type<tc>, window_params = [{transform_indices = @transform_0, window_bounds = array<i64: 512, 6>}, {pipeline_mode = #tpu.pipeline_mode<synchronous>, transform_indices = @transform_1, window_bounds = array<i64: 3, 256>}, {pipeline_mode = #tpu.pipeline_mode<synchronous>, transform_indices = @transform_2, window_bounds = array<i64: 1, 128>}, {pipeline_mode = #tpu.pipeline_mode<synchronous>, transform_indices = @transform_3, window_bounds = array<i64: 128, 128>}, {pipeline_mode = #tpu.pipeline_mode<synchronous>, transform_indices = @transform_4, window_bounds = array<i64: 1, 128>}, {pipeline_mode = #tpu.pipeline_mode<synchronous>, transform_indices = @transform_5, window_bounds = array<i64: 128, 128>}, {pipeline_mode = #tpu.pipeline_mode<synchronous>, transform_indices = @transform_6, window_bounds = array<i64: 1, 128>}, {pipeline_mode = #tpu.pipeline_mode<synchronous>, transform_indices = @transform_7, window_bounds = array<i64: 128, 128>}, {pipeline_mode = #tpu.pipeline_mode<synchronous>, transform_indices = @transform_8, window_bounds = array<i64: 1, 128>}, {pipeline_mode = #tpu.pipeline_mode<synchronous>, transform_indices = @transform_9, window_bounds = array<i64: 128, 256>}, {pipeline_mode = #tpu.pipeline_mode<synchronous>, transform_indices = @transform_10, window_bounds = array<i64: 1, 256>}, {transform_indices = @transform_11, window_bounds = array<i64: 1, 8, 256>}]} {
    %0 = tpu.iota {dimensions = array<i32: 0>} : vector<512x1xi32>
    %c512_i32 = arith.constant 512 : i32
    %1 = arith.muli %arg0, %c512_i32 : i32
    %2 = vector.broadcast %1 : i32 to vector<512x1xi32>
    %3 = arith.addi %0, %2 : vector<512x1xi32>
    %c1000_i32 = arith.constant 1000 : i32
    %4 = vector.broadcast %c1000_i32 : i32 to vector<512x1xi32>
    %5 = arith.cmpi slt, %3, %4 : vector<512x1xi32>
    %c0 = arith.constant 0 : index
    %c0_0 = arith.constant 0 : index
    %6 = vector.load %arg1[%c0, %c0_0] : memref<512x6xf32, #tpu.memory_space<vmem>>, vector<512x6xf32>
    %cst = arith.constant 0.000000e+00 : f32
    %7 = vector.shape_cast %5 : vector<512x1xi1> to vector<512x1xi1>
    %8 = vector.broadcast %7 : vector<512x1xi1> to vector<512x6xi1>
    %9 = vector.broadcast %cst : f32 to vector<512x6xf32>
    %10 = arith.select %8, %6, %9 : vector<512x6xi1>, vector<512x6xf32>
    %11 = vector.extract_strided_slice %10 {offsets = [0, 0], sizes = [512, 3], strides = [1, 1]} : vector<512x6xf32> to vector<512x3xf32>
    %12 = arith.truncf %11 : vector<512x3xf32> to vector<512x3xbf16>
    %c0_1 = arith.constant 0 : index
    %c0_2 = arith.constant 0 : index
    %13 = vector.load %arg2[%c0_1, %c0_2] : memref<3x256xbf16, #tpu.memory_space<vmem>>, vector<3x256xbf16>
    %cst_3 = arith.constant dense<0.000000e+00> : vector<512x256xf32>
    %14 = tpu.matmul %12, %13, %cst_3 {dimension_numbers = #tpu.dot_dimension_numbers<[1], [0], [0], [1], [0, 0, 1, 1], [], []>} : vector<512x3xbf16>, vector<3x256xbf16>, vector<512x256xf32> -> vector<512x256xf32>
    %15 = vector.extract_strided_slice %14 {offsets = [0, 0], sizes = [512, 128], strides = [1, 1]} : vector<512x256xf32> to vector<512x128xf32>
    %c0_4 = arith.constant 0 : index
    %c0_5 = arith.constant 0 : index
    %16 = vector.load %arg3[%c0_4, %c0_5] : memref<1x128xf32, #tpu.memory_space<vmem>>, vector<1x128xf32>
    %17 = vector.broadcast %16 : vector<1x128xf32> to vector<512x128xf32>
    %18 = arith.addf %15, %17 : vector<512x128xf32>
    %cst_6 = arith.constant 0.000000e+00 : f32
    %19 = vector.broadcast %cst_6 : f32 to vector<512x128xf32>
    %20 = arith.maximumf %18, %19 : vector<512x128xf32>
    %21 = arith.truncf %20 : vector<512x128xf32> to vector<512x128xbf16>
    %c0_7 = arith.constant 0 : index
    %c0_8 = arith.constant 0 : index
    %22 = vector.load %arg4[%c0_7, %c0_8] : memref<128x128xbf16, #tpu.memory_space<vmem>>, vector<128x128xbf16>
    %cst_9 = arith.constant dense<0.000000e+00> : vector<512x128xf32>
    %23 = tpu.matmul %21, %22, %cst_9 {dimension_numbers = #tpu.dot_dimension_numbers<[1], [0], [0], [1], [0, 0, 1, 1], [], []>} : vector<512x128xbf16>, vector<128x128xbf16>, vector<512x128xf32> -> vector<512x128xf32>
    %c0_10 = arith.constant 0 : index
    %c0_11 = arith.constant 0 : index
    %24 = vector.load %arg5[%c0_10, %c0_11] : memref<1x128xf32, #tpu.memory_space<vmem>>, vector<1x128xf32>
    %25 = vector.broadcast %24 : vector<1x128xf32> to vector<512x128xf32>
    %26 = arith.addf %23, %25 : vector<512x128xf32>
    %cst_12 = arith.constant 0.000000e+00 : f32
    %27 = vector.broadcast %cst_12 : f32 to vector<512x128xf32>
    %28 = arith.maximumf %26, %27 : vector<512x128xf32>
    %29 = arith.truncf %28 : vector<512x128xf32> to vector<512x128xbf16>
    %c0_13 = arith.constant 0 : index
    %c0_14 = arith.constant 0 : index
    %30 = vector.load %arg6[%c0_13, %c0_14] : memref<128x128xbf16, #tpu.memory_space<vmem>>, vector<128x128xbf16>
    %cst_15 = arith.constant dense<0.000000e+00> : vector<512x128xf32>
    %31 = tpu.matmul %29, %30, %cst_15 {dimension_numbers = #tpu.dot_dimension_numbers<[1], [0], [0], [1], [0, 0, 1, 1], [], []>} : vector<512x128xbf16>, vector<128x128xbf16>, vector<512x128xf32> -> vector<512x128xf32>
    %c0_16 = arith.constant 0 : index
    %c0_17 = arith.constant 0 : index
    %32 = vector.load %arg7[%c0_16, %c0_17] : memref<1x128xf32, #tpu.memory_space<vmem>>, vector<1x128xf32>
    %33 = vector.broadcast %32 : vector<1x128xf32> to vector<512x128xf32>
    %34 = arith.addf %31, %33 : vector<512x128xf32>
    %cst_18 = arith.constant 0.000000e+00 : f32
    %35 = vector.broadcast %cst_18 : f32 to vector<512x128xf32>
    %36 = arith.maximumf %34, %35 : vector<512x128xf32>
    %37 = arith.truncf %36 : vector<512x128xf32> to vector<512x128xbf16>
    %38 = vector.extract_strided_slice %14 {offsets = [0, 128], sizes = [512, 128], strides = [1, 1]} : vector<512x256xf32> to vector<512x128xf32>
    %c0_19 = arith.constant 0 : index
    %c0_20 = arith.constant 0 : index
    %39 = vector.load %arg8[%c0_19, %c0_20] : memref<128x128xbf16, #tpu.memory_space<vmem>>, vector<128x128xbf16>
    %cst_21 = arith.constant dense<0.000000e+00> : vector<512x128xf32>
    %40 = tpu.matmul %37, %39, %cst_21 {dimension_numbers = #tpu.dot_dimension_numbers<[1], [0], [0], [1], [0, 0, 1, 1], [], []>} : vector<512x128xbf16>, vector<128x128xbf16>, vector<512x128xf32> -> vector<512x128xf32>
    %41 = arith.addf %38, %40 : vector<512x128xf32>
    %c0_22 = arith.constant 0 : index
    %c0_23 = arith.constant 0 : index
    %42 = vector.load %arg9[%c0_22, %c0_23] : memref<1x128xf32, #tpu.memory_space<vmem>>, vector<1x128xf32>
    %43 = vector.broadcast %42 : vector<1x128xf32> to vector<512x128xf32>
    %44 = arith.addf %41, %43 : vector<512x128xf32>
    %cst_24 = arith.constant 0.000000e+00 : f32
    %45 = vector.broadcast %cst_24 : f32 to vector<512x128xf32>
    %46 = arith.maximumf %44, %45 : vector<512x128xf32>
    %47 = arith.truncf %46 : vector<512x128xf32> to vector<512x128xbf16>
    %c0_25 = arith.constant 0 : index
    %c0_26 = arith.constant 0 : index
    %48 = vector.load %arg10[%c0_25, %c0_26] : memref<128x256xbf16, #tpu.memory_space<vmem>>, vector<128x256xbf16>
    %cst_27 = arith.constant dense<0.000000e+00> : vector<512x256xf32>
    %49 = tpu.matmul %47, %48, %cst_27 {dimension_numbers = #tpu.dot_dimension_numbers<[1], [0], [0], [1], [0, 0, 1, 1], [], []>} : vector<512x128xbf16>, vector<128x256xbf16>, vector<512x256xf32> -> vector<512x256xf32>
    %c0_28 = arith.constant 0 : index
    %c0_29 = arith.constant 0 : index
    %50 = vector.load %arg11[%c0_28, %c0_29] : memref<1x256xf32, #tpu.memory_space<vmem>>, vector<1x256xf32>
    %51 = vector.broadcast %50 : vector<1x256xf32> to vector<512x256xf32>
    %52 = arith.addf %49, %51 : vector<512x256xf32>
    %cst_30 = arith.constant 0.000000e+00 : f32
    %53 = vector.broadcast %cst_30 : f32 to vector<512x256xf32>
    %54 = arith.maximumf %52, %53 : vector<512x256xf32>
    %55 = arith.truncf %54 : vector<512x256xf32> to vector<512x256xbf16>
    %56 = tpu.iota {dimensions = array<i32: 0>} : vector<8x512xi32>
    %57 = tpu.iota {dimensions = array<i32: 1>} : vector<8x512xi32>
    %c512_i32_31 = arith.constant 512 : i32
    %58 = arith.muli %arg0, %c512_i32_31 : i32
    %59 = vector.broadcast %58 : i32 to vector<8x512xi32>
    %60 = arith.addi %57, %59 : vector<8x512xi32>
    %c1_i32 = arith.constant 1 : i32
    %61 = vector.broadcast %c1_i32 : i32 to vector<8x512xi32>
    %62 = arith.andi %60, %61 : vector<8x512xi32>
    %63 = arith.cmpi eq, %62, %56 : vector<8x512xi32>
    %c1000_i32_32 = arith.constant 1000 : i32
    %64 = vector.broadcast %c1000_i32_32 : i32 to vector<8x512xi32>
    %65 = arith.cmpi slt, %60, %64 : vector<8x512xi32>
    %66 = arith.andi %63, %65 : vector<8x512xi1>
    %67 = arith.extui %66 : vector<8x512xi1> to vector<8x512xi32>
    %68 = arith.sitofp %67 : vector<8x512xi32> to vector<8x512xf32>
    %69 = arith.truncf %68 : vector<8x512xf32> to vector<8x512xbf16>
    %cst_33 = arith.constant dense<0.000000e+00> : vector<8x256xf32>
    %70 = tpu.matmul %69, %55, %cst_33 {dimension_numbers = #tpu.dot_dimension_numbers<[1], [0], [0], [1], [0, 0, 1, 1], [], []>} : vector<8x512xbf16>, vector<512x256xbf16>, vector<8x256xf32> -> vector<8x256xf32>
    %c0_34 = arith.constant 0 : index
    %c0_35 = arith.constant 0 : index
    %c0_36 = arith.constant 0 : index
    %71 = vector.load %arg12[%c0_34, %c0_35, %c0_36] : memref<1x8x256xf32, #tpu.memory_space<vmem>>, vector<1x8x256xf32>
    %72 = vector.shape_cast %71 : vector<1x8x256xf32> to vector<8x256xf32>
    %73 = vector.shape_cast %70 : vector<8x256xf32> to vector<1x8x256xf32>
    tpu.vector_store %arg12[%c0_34, %c0_35, %c0_36], %73 {strides = array<i32>} : memref<1x8x256xf32, #tpu.memory_space<vmem>>, vector<1x8x256xf32>,
    return
  }
  func.func @transform_0(%arg0: i32) -> (i32, i32) {
    %c0_i32 = arith.constant 0 : i32
    %c0_i32_0 = arith.constant 0 : i32
    return %arg0, %c0_i32 : i32, i32
  }
  func.func @transform_1(%arg0: i32) -> (i32, i32) {
    %c0_i32 = arith.constant 0 : i32
    %c0_i32_0 = arith.constant 0 : i32
    %c0_i32_1 = arith.constant 0 : i32
    return %c0_i32, %c0_i32_0 : i32, i32
  }
  func.func @transform_2(%arg0: i32) -> (i32, i32) {
    %c0_i32 = arith.constant 0 : i32
    %c0_i32_0 = arith.constant 0 : i32
    %c0_i32_1 = arith.constant 0 : i32
    return %c0_i32, %c0_i32_0 : i32, i32
  }
  func.func @transform_3(%arg0: i32) -> (i32, i32) {
    %c0_i32 = arith.constant 0 : i32
    %c0_i32_0 = arith.constant 0 : i32
    %c0_i32_1 = arith.constant 0 : i32
    return %c0_i32, %c0_i32_0 : i32, i32
  }
  func.func @transform_4(%arg0: i32) -> (i32, i32) {
    %c0_i32 = arith.constant 0 : i32
    %c0_i32_0 = arith.constant 0 : i32
    %c0_i32_1 = arith.constant 0 : i32
    return %c0_i32, %c0_i32_0 : i32, i32
  }
  func.func @transform_5(%arg0: i32) -> (i32, i32) {
    %c0_i32 = arith.constant 0 : i32
    %c0_i32_0 = arith.constant 0 : i32
    %c0_i32_1 = arith.constant 0 : i32
    return %c0_i32, %c0_i32_0 : i32, i32
  }
  func.func @transform_6(%arg0: i32) -> (i32, i32) {
    %c0_i32 = arith.constant 0 : i32
    %c0_i32_0 = arith.constant 0 : i32
    %c0_i32_1 = arith.constant 0 : i32
    return %c0_i32, %c0_i32_0 : i32, i32
  }
  func.func @transform_7(%arg0: i32) -> (i32, i32) {
    %c0_i32 = arith.constant 0 : i32
    %c0_i32_0 = arith.constant 0 : i32
    %c0_i32_1 = arith.constant 0 : i32
    return %c0_i32, %c0_i32_0 : i32, i32
  }
  func.func @transform_8(%arg0: i32) -> (i32, i32) {
    %c0_i32 = arith.constant 0 : i32
    %c0_i32_0 = arith.constant 0 : i32
    %c0_i32_1 = arith.constant 0 : i32
    return %c0_i32, %c0_i32_0 : i32, i32
  }
  func.func @transform_9(%arg0: i32) -> (i32, i32) {
    %c0_i32 = arith.constant 0 : i32
    %c0_i32_0 = arith.constant 0 : i32
    %c0_i32_1 = arith.constant 0 : i32
    return %c0_i32, %c0_i32_0 : i32, i32
  }
  func.func @transform_10(%arg0: i32) -> (i32, i32) {
    %c0_i32 = arith.constant 0 : i32
    %c0_i32_0 = arith.constant 0 : i32
    %c0_i32_1 = arith.constant 0 : i32
    return %c0_i32, %c0_i32_0 : i32, i32
  }
  func.func @transform_11(%arg0: i32) -> (i32, i32, i32) {
    %c0_i32 = arith.constant 0 : i32
    %c0_i32_0 = arith.constant 0 : i32
    %c0_i32_1 = arith.constant 0 : i32
    return %arg0, %c0_i32, %c0_i32_0 : i32, i32, i32
  }
}

</mosaic_0001>

<bundles_post_ra>
// kernel: tpu_custom_call.1
= control target key start
LH: loop header
LB: loop body
LE: loop exit
PB: predicated region body
PF: predicated region fallthrough
CT: control target
= control target key end

     0   :  { %s5901_s0 = inlined_call_operand.vmem [shape: f32[1000,6], index: 0, kind: input, shape index: {}]   ;;  %s5902_s1 = inlined_call_operand.vmem [shape: bf16[3,256], index: 1, kind: input, shape index: {}]   ;;  %s5903_s2 = inlined_call_operand.vmem [shape: f32[1,128], index: 2, kind: input, shape index: {}]   ;;  %s5904_s3 = inlined_call_operand.vmem [shape: bf16[128,128], index: 3, kind: input, shape index: {}]   ;;  %s5905_s4 = inlined_call_operand.vmem [shape: f32[1,128], index: 4, kind: input, shape index: {}]   ;;  %s5906_s5 = inlined_call_operand.vmem [shape: bf16[128,128], index: 5, kind: input, shape index: {}]   ;;  %s5907_s6 = inlined_call_operand.vmem [shape: f32[1,128], index: 6, kind: input, shape index: {}]   ;;  %s5908_s7 = inlined_call_operand.vmem [shape: bf16[128,128], index: 7, kind: input, shape index: {}]   ;;  %s5909_s8 = inlined_call_operand.vmem [shape: f32[1,128], index: 8, kind: input, shape index: {}]   ;;  %s5910_s9 = inlined_call_operand.vmem [shape: bf16[128,256], index: 9, kind: input, shape index: {}]   ;;  %s5911_s10 = inlined_call_operand.vmem [shape: f32[1,256], index: 10, kind: input, shape index: {}]   ;;  %s5912_s11 = inlined_call_operand.hbm [shape: f32[2,8,256], index: 11, kind: output, shape index: {}]  }
   0x1   :  { %5920 = sst [smem:[#allocation30_spill]] %s5901_s0 }
   0x2   :  { %16 = vsyncpa [#allocation3], 0 }
   0x3   :  { %18 = vsyncpa [#allocation3 + $0x1], 0  ;;  %s4567_s17 = smov 0   ;;  %s4569_s18 = smov 0  }
   0x4   :  { %s4571_s19 = smov 0   ;;  %s4573_s20 = smov 0  }
   0x5 LB: > { %s4588_s21 = sadd.s32 4294967295, %s4501_s20   ;;  %s3872_s22 = sadd.s32 4294967294, %s4501_s20   ;;  %s4501_s20 = sphi %s4573_s20, %s5979_s20   ;;  %s4497_s19 = sphi %s4571_s19, %s5978_s19   ;;  %s4493_s18 = sphi %s4569_s18, %s5977_s18   ;;  %s4489_s17 = sphi %s4567_s17, %s5976_s17  }
   0x6   : > { %s4592_s23 = sadd.s32 1, %s4501_s20   ;;  %s267_s24 = sadd.s32 1, %s4497_s19 }
   0x7   : > { %s264_s25 = ssub.s32 %s4501_s20, %s4592_s23  ;;  %p277_p0 = scmp.ne.s32.totalorder %s4497_s19, %s4493_s18 }
   0x8   : > { %p265_p1 = scmp.eq.s32.totalorder %s264_s25, 0  ;;  %p278_p2 = scmp.eq.s32.totalorder %s4588_s21, 1 }
   0x9   : > { %p283_p3 = scmp.ne.s32.totalorder %s4493_s18, %s4489_s17  ;;  %p284_p4 = scmp.eq.s32.totalorder %s3872_s22, 1 }
   0xa   : > { %s4603_s26 = scalar_select %p265_p1, %s4497_s19, %s267_s24  }
   0xb   : > { %p4605_p5 = por %p278_p2, %p277_p0  ;;  %p4609_p6 = por %p284_p4, %p283_p3 }
   0xc   : > { %p3875_p7 = scmp.ge.s32.totalorder %s4501_s20, 1  ;;  %p349_p8 = scmp.lt.s32.totalorder %s4501_s20, 3 }
   0xe   : > { %p350_p9 = pnand %p3875_p7, %p349_p8 }
  0x10   : > { %353 = sbr.rel (%p350_p9) target bundleno = 1605 (0x645), region = 64 }
  0x15   : > { %v3880_v0 = vld.sshfl [vmem:[%s5902_s1] sm:$0x33 pattern:$0x76325410]  ;;  %vm998_vm0 = vcmask 1040384   ;;  %vm999_vm1 = vcmask 1041408   ;;  %v5913_v1 = vlaneseq }
  0x16   : > { %v900_v2 = vcombine.high %v3880_v0, %v3880_v0  ;;  %v4503_v3 = vmov 65535   ;;  %v5914_v5 = vmov 0   ;;  %v4393_v6 = vld [vmem:[%s5904_s3 + $0x38] sm:$0xff]   ;;  %s3877_s14 = sshll.u32 %s4588_s21, 6  ;;  %s3879_s15 = sshll.u32 %s4588_s21, 9  ;;  %v4394_v14 = vld [vmem:[%s5904_s3 + $0x30] sm:$0xff]  }
  0x17   : > { %v1000_v4 = vsel %vm998_vm0, 4294967295, %v4503_v3  ;;  %1040 = vmatprep.mubr.bf16.mxu0 %v5914_v5  ;;  %v4624_v7 = vshrl.u32 %v5913_v1, 7  ;;  %p398_p10 = scmp.lt.s32.totalorder %s3877_s14, 124  ;;  %v4627_v9 = vstv %s3879_s15  ;;  %4335 = vmatprep.subr.bf16.mxu1 %v4393_v6  ;;  %s5925_s0 = sld [smem:[#allocation30_spill]]  ;;  %v4395_v20 = vld [vmem:[%s5904_s3 + $0x28] sm:$0xff]   ;;  %vm901_vm4 = vcmask 23552  }
  0x18   : > { %v1001_v8 = vsel %vm999_vm1, %v1000_v4, 0  ;;  %5924 = vst [vmem:[#allocation6_spill] sm:$0xff] %v4627_v9  ;;  %4343 = vmatpush3.bf16.msra.mxu1 %v4393_v6  ;;  %v4396_v30 = vld [vmem:[%s5904_s3 + $0x20] sm:$0xff]   ;;  %v4397_v35 = vld [vmem:[%s5904_s3 + $0x18] sm:$0xff]   ;;  %v4398_v61 = vld [vmem:[%s5904_s3 + $0x10] sm:$0xff]   ;;  %s3974_s29 = sshll.u32 %s4588_s21, 8 }
  0x19   : > { %5923 = vst [vmem:[#allocation5_spill] sm:$0xff] %v4624_v7  ;;  %v1006_v10 = vand.u32 %v1001_v8, %v900_v2  ;;  %v1003_v11 = vand.u32 %v3880_v0, %v1001_v8  ;;  %v410_v12 = vadd.s32 8, %v4624_v7  ;;  %v475_v13 = vadd.s32 %v4627_v9, %v4624_v7  ;;  %s5981_s14 = smov (!%p398_p10, %s3877_s14), 124  ;;  %4336 = vmatprep.subr.bf16.mxu1 %v4394_v14  ;;  %s5860_s16 = scalar_lea.hbm %s5912_s11, %s3974_s29 }
  0x1a   : > { %v411_v15 = vadd.s32 16, %v4624_v7  ;;  %v412_v16 = vadd.s32 24, %v4624_v7  ;;  %s3878_s24 = sshll.u32 %s5981_s14, 3  ;;  %v413_v25 = vadd.s32 32, %v4624_v7  ;;  %v414_v29 = vadd.s32 40, %v4624_v7  ;;  %s4506_s22 = smov [#allocation2]  }
  0x1b   : > { %1022 = vmatprep.subr.bf16.mxu0 %v1006_v10  ;;  %v476_v17 = vadd.s32 %v4627_v9, %v410_v12  ;;  %vm539_vm2 = vcmp.lt.s32.totalorder %v475_v13, 1000  ;;  %v415_v37 = vadd.s32 48, %v4624_v7  ;;  %v416_v40 = vadd.s32 56, %v4624_v7 }
  0x1c   : > { %1023 = vmatpush1.bf16.msra.mxu0 %v1003_v11  ;;  %v477_v18 = vadd.s32 %v4627_v9, %v411_v15  ;;  %v478_v19 = vadd.s32 %v4627_v9, %v412_v16  ;;  %4344 = vmatpush3.bf16.msra.mxu1 %v4394_v14  ;;  %v479_v33 = vadd.s32 %v4627_v9, %v413_v25  ;;  %v417_v48 = vadd.s32 64, %v4624_v7 }
  0x1d   : > { %4095 = vmatprep.subr.bf16.mxu0 %v4393_v6  ;;  %s4643_s30 = scalar_lea.vmem %s5925_s0, %s3878_s24  ;;  %vm540_vm3 = vcmp.lt.s32.totalorder %v476_v17, 1000  ;;  %4337 = vmatprep.subr.bf16.mxu1 %v4395_v20  ;;  %v480_v34 = vadd.s32 %v4627_v9, %v414_v29  ;;  %v481_v43 = vadd.s32 %v4627_v9, %v415_v37  ;;  %v482_v44 = vadd.s32 %v4627_v9, %v416_v40  ;;  %s390_s24 = sand.u32 1, %s4493_s18  }
  0x1e   : > { %v603_v21 = vld [vmem:[%s4643_s30] sm:$0xff]  ;;  %v604_v22 = vld [vmem:[%s4643_s30 + $0x8] sm:$0xff]  ;;  %vm541_vm5 = vcmp.lt.s32.totalorder %v477_v18, 1000  ;;  %vm542_vm6 = vcmp.lt.s32.totalorder %v478_v19, 1000  ;;  %v605_v27 = vld [vmem:[%s4643_s30 + $0x10] sm:$0xff]  ;;  %vm543_vm7 = vcmp.lt.s32.totalorder %v479_v33, 1000  ;;  %v483_v52 = vadd.s32 %v4627_v9, %v417_v48 }
  0x1f   : > { %v795_v23 = vsel %vm539_vm2, %v603_v21, 0.0  ;;  %v796_v24 = vsel %vm540_vm3, %v604_v22, 0.0  ;;  %v606_v28 = vld [vmem:[%s4643_s30 + $0x18] sm:$0xff]  ;;  %v797_v31 = vsel %vm541_vm5, %v605_v27, 0.0  ;;  %vm544_vm8 = vcmp.lt.s32.totalorder %v480_v34, 1000  ;;  %v607_v38 = vld [vmem:[%s4643_s30 + $0x20] sm:$0xff] }
  0x20   : > { %v859_v26 = vpack.c.bf16 %v796_v24, %v795_v23  ;;  %4345 = vmatpush3.bf16.msra.mxu1 %v4395_v20  ;;  %v798_v32 = vsel %vm542_vm6, %v606_v28, 0.0  ;;  %v608_v39 = vld [vmem:[%s4643_s30 + $0x28] sm:$0xff]  ;;  %v799_v41 = vsel %vm543_vm7, %v607_v38, 0.0  ;;  %vm545_vm9 = vcmp.lt.s32.totalorder %v481_v43, 1000  ;;  %v609_v46 = vld [vmem:[%s4643_s30 + $0x30] sm:$0xff]  ;;  %v610_v47 = vld [vmem:[%s4643_s30 + $0x38] sm:$0xff] }
  0x21   : > { %4338 = vmatprep.subr.bf16.mxu1 %v4396_v30  ;;  %v860_v36 = vpack.c.bf16 %v798_v32, %v797_v31  ;;  %v800_v42 = vsel %vm544_vm8, %v608_v39, 0.0  ;;  %vm546_vm10 = vcmp.lt.s32.totalorder %v482_v44, 1000  ;;  %v418_v49 = vadd.s32 72, %v4624_v7  ;;  %v611_v55 = vld [vmem:[%s4643_s30 + $0x40] sm:$0xff]  ;;  %v612_v56 = vld [vmem:[%s4643_s30 + $0x48] sm:$0xff]  ;;  %v613_v2 = vld [vmem:[%s4643_s30 + $0x50] sm:$0xff] }
  0x22   : > { %3881 = vmatmul.mubr.msk.bf16.vlgmr.msra.gmra.mxu0 %vm901_vm4, %v859_v26  ;;  %v861_v45 = vpack.c.bf16 %v800_v42, %v799_v41  ;;  %v801_v50 = vsel %vm545_vm9, %v609_v46, 0.0  ;;  %v802_v51 = vsel %vm546_vm10, %v610_v47, 0.0  ;;  %v419_v57 = vadd.s32 80, %v4624_v7  ;;  %v614_v3 = vld [vmem:[%s4643_s30 + $0x58] sm:$0xff]  ;;  %v616_v15 = vld [vmem:[%s4643_s30 + $0x68] sm:$0xff]  ;;  %v617_v23 = vld [vmem:[%s4643_s30 + $0x70] sm:$0xff] }
  0x23   : > { %4096 = vmatpush3.bf16.msra.mxu0 %v4393_v6  ;;  %1050 = vmatprep.mubr.bf16.mxu0 %v5914_v5  ;;  %v484_v53 = vadd.s32 %v4627_v9, %v418_v49  ;;  %v862_v54 = vpack.c.bf16 %v802_v51, %v801_v50  ;;  %vm547_vm11 = vcmp.lt.s32.totalorder %v483_v52, 1000  ;;  %v420_v58 = vadd.s32 88, %v4624_v7  ;;  %v618_v24 = vld [vmem:[%s4643_s30 + $0x78] sm:$0xff]  ;;  %v619_v32 = vld [vmem:[%s4643_s30 + $0x80] sm:$0xff]  ;;  %v620_v33 = vld [vmem:[%s4643_s30 + $0x88] sm:$0xff]  ;;  %s3876_s25 = sshll.u32 %s390_s24, 4 }
  0x24   : > { %4097 = vmatprep.subr.bf16.mxu0 %v4394_v14  ;;  %4346 = vmatpush3.bf16.msra.mxu1 %v4396_v30  ;;  %v803_v59 = vsel %vm547_vm11, %v611_v55, 0.0  ;;  %v485_v62 = vadd.s32 %v4627_v9, %v419_v57  ;;  %v421_v4 = vadd.s32 96, %v4624_v7  ;;  %v422_v6 = vadd.s32 104, %v4624_v7  ;;  %v4399_v38 = vld [vmem:[%s5904_s3 + $0x8] sm:$0xff]   ;;  %v621_v42 = vld [vmem:[%s4643_s30 + $0x90] sm:$0xff]  ;;  %v622_v43 = vld [vmem:[%s4643_s30 + $0x98] sm:$0xff] }
  0x25   : > { %4339 = vmatprep.subr.bf16.mxu1 %v4397_v35  ;;  %vm548_vm12 = vcmp.lt.s32.totalorder %v484_v53, 1000  ;;  %v486_v63 = vadd.s32 %v4627_v9, %v420_v58  ;;  %v423_v16 = vadd.s32 112, %v4624_v7  ;;  %v424_v17 = vadd.s32 120, %v4624_v7  ;;  %v623_v51 = vld [vmem:[%s4643_s30 + $0xa0] sm:$0xff]  ;;  %v624_v52 = vld [vmem:[%s4643_s30 + $0xa8] sm:$0xff]  ;;  %s392_s12 = scalar_lea.vmem [#allocation2], %s3876_s25 }
  0x26   : > { %v804_v60 = vsel %vm548_vm12, %v612_v56, 0.0  ;;  %vm549_vm13 = vcmp.lt.s32.totalorder %v485_v62, 1000  ;;  %v487_v11 = vadd.s32 %v4627_v9, %v421_v4  ;;  %v488_v12 = vadd.s32 %v4627_v9, %v422_v6  ;;  %s3813_s13 = sshll.u32 %s392_s12, 4  ;;  %s3799_s21 = scalar_lea.sflag [#allocation3], %s390_s24  ;;  %s5862_s13 = int_to_ptr.vmem [resolvable:$true] %s3813_s13 }
  0x27   : > { %4098 = vmatpush3.bf16.msra.mxu0 %v4394_v14  ;;  %v863_v0 = vpack.c.bf16 %v804_v60, %v803_v59  ;;  %vm550_vm14 = vcmp.lt.s32.totalorder %v486_v63, 1000  ;;  %v805_v8 = vsel %vm549_vm13, %v613_v2, 0.0  ;;  %v615_v14 = vld [vmem:[%s4643_s30 + $0x60] sm:$0xff]  ;;  %v490_v21 = vadd.s32 %v4627_v9, %v424_v17  ;;  %v625_v60 = vld [vmem:[%s4643_s30 + $0xb0] sm:$0xff]  ;;  %s4445_s25 = sshll.u32 %s4506_s22, 4  ;;  %s4446_s25 = int_to_ptr.vmem [resolvable:$false] %s4445_s25 }
  0x28   : > { %4099 = vmatprep.subr.bf16.mxu0 %v4395_v20  ;;  %4347 = vmatpush3.bf16.msra.mxu1 %v4397_v35  ;;  %v806_v10 = vsel %vm550_vm14, %v614_v3, 0.0  ;;  %vm551_vm15 = vcmp.lt.s32.totalorder %v487_v11, 1000  ;;  %vm552_vm0 = vcmp.lt.s32.totalorder %v488_v12, 1000  ;;  %v425_v25 = vadd.s32 128, %v4624_v7  ;;  %s4447_s14 = scalar_lea.vmem %s4446_s25, 512  ;;  %p4448_p0 = scmp.lt.s32.totalorder %s5862_s13, %s4446_s25 }
  0x29   : > { %4340 = vmatprep.subr.bf16.mxu1 %v4398_v61  ;;  %v864_v13 = vpack.c.bf16 %v806_v10, %v805_v8  ;;  %v807_v18 = vsel %vm551_vm15, %v615_v14, 0.0  ;;  %v808_v19 = vsel %vm552_vm0, %v616_v15, 0.0  ;;  %vm554_vm2 = vcmp.lt.s32.totalorder %v490_v21, 1000  ;;  %v627_v8 = vld [vmem:[%s4643_s30 + $0xc0] sm:$0xff]  ;;  %v628_v10 = vld [vmem:[%s4643_s30 + $0xc8] sm:$0xff] }
  0x2a   : > { %3882 = vmatmul.mubr.msk.bf16.gmra.mxu0 %vm901_vm4, %v860_v36  ;;  %v865_v22 = vpack.c.bf16 %v808_v19, %v807_v18  ;;  %v426_v26 = vadd.s32 136, %v4624_v7  ;;  %v810_v28 = vsel %vm554_vm2, %v618_v24, 0.0  ;;  %v491_v29 = vadd.s32 %v4627_v9, %v425_v25  ;;  %v629_v18 = vld [vmem:[%s4643_s30 + $0xd0] sm:$0xff]  ;;  %v630_v19 = vld [vmem:[%s4643_s30 + $0xd8] sm:$0xff]  ;;  %v4400_v24 = vld [vmem:[%s5904_s3] sm:$0xff]  }
  0x2b   : > { %1060 = vmatprep.mubr.bf16.mxu0 %v5914_v5  ;;  %4100 = vmatpush3.bf16.msra.mxu0 %v4395_v20  ;;  %v489_v20 = vadd.s32 %v4627_v9, %v423_v16  ;;  %v427_v34 = vadd.s32 144, %v4624_v7  ;;  %v429_v44 = vadd.s32 160, %v4624_v7  ;;  %v431_v53 = vadd.s32 176, %v4624_v7 }
  0x2c   : > { %4101 = vmatprep.subr.bf16.mxu0 %v4396_v30  ;;  %4348 = vmatpush3.bf16.msra.mxu1 %v4398_v61  ;;  %vm555_vm3 = vcmp.lt.s32.totalorder %v491_v29, 1000  ;;  %v433_v62 = vadd.s32 192, %v4624_v7  ;;  %v434_v63 = vadd.s32 200, %v4624_v7  ;;  %v435_v11 = vadd.s32 208, %v4624_v7  ;;  %v632_v29 = vld [vmem:[%s4643_s30 + $0xe8] sm:$0xff] }
  0x2d   : > { %vm553_vm1 = vcmp.lt.s32.totalorder %v489_v20, 1000  ;;  %v811_v36 = vsel %vm555_vm3, %v619_v32, 0.0  ;;  %v493_v39 = vadd.s32 %v4627_v9, %v427_v34  ;;  %4341 = vmatprep.subr.bf16.mxu1 %v4399_v38  ;;  %v495_v48 = vadd.s32 %v4627_v9, %v429_v44 }
  0x2e   : > { %v809_v27 = vsel %vm553_vm1, %v617_v23, 0.0  ;;  %v497_v57 = vadd.s32 %v4627_v9, %v431_v53  ;;  %v499_v3 = vadd.s32 %v4627_v9, %v433_v62  ;;  %v500_v4 = vadd.s32 %v4627_v9, %v434_v63 }
  0x2f   : > { %4102 = vmatpush3.bf16.msra.mxu0 %v4396_v30  ;;  %v492_v30 = vadd.s32 %v4627_v9, %v426_v26  ;;  %v866_v31 = vpack.c.bf16 %v810_v28, %v809_v27  ;;  %vm557_vm6 = vcmp.lt.s32.totalorder %v493_v39, 1000  ;;  %vm559_vm8 = vcmp.lt.s32.totalorder %v495_v48, 1000  ;;  %v631_v28 = vld [vmem:[%s4643_s30 + $0xe0] sm:$0xff] }
  0x30   : > { %4103 = vmatprep.subr.bf16.mxu0 %v4397_v35  ;;  %4349 = vmatpush3.bf16.msra.mxu1 %v4399_v38  ;;  %v813_v46 = vsel %vm557_vm6, %v621_v42, 0.0  ;;  %v815_v55 = vsel %vm559_vm8, %v623_v51, 0.0  ;;  %vm561_vm10 = vcmp.lt.s32.totalorder %v497_v57, 1000  ;;  %vm563_vm12 = vcmp.lt.s32.totalorder %v499_v3, 1000 }
  0x31   : > { %vm556_vm5 = vcmp.lt.s32.totalorder %v492_v30, 1000  ;;  %vm564_vm13 = vcmp.lt.s32.totalorder %v500_v4, 1000  ;;  %v436_v12 = vadd.s32 216, %v4624_v7  ;;  %v501_v15 = vadd.s32 %v4627_v9, %v435_v11  ;;  %4342 = vmatprep.subr.bf16.mxu1 %v4400_v24 }
  0x32   : > { %3883 = vmatmul.mubr.msk.bf16.gmra.mxu0 %vm901_vm4, %v861_v45  ;;  %v812_v37 = vsel %vm556_vm5, %v620_v33, 0.0  ;;  %v430_v45 = vadd.s32 168, %v4624_v7  ;;  %v820_v14 = vsel %vm564_vm13, %v628_v10, 0.0  ;;  %v437_v20 = vadd.s32 224, %v4624_v7 }
  0x33   : > { %1070 = vmatprep.mubr.bf16.mxu0 %v5914_v5  ;;  %4104 = vmatpush3.bf16.msra.mxu0 %v4397_v35  ;;  %v428_v35 = vadd.s32 152, %v4624_v7  ;;  %v867_v41 = vpack.c.bf16 %v812_v37, %v811_v36  ;;  %v502_v16 = vadd.s32 %v4627_v9, %v436_v12  ;;  %vm565_vm14 = vcmp.lt.s32.totalorder %v501_v15, 1000  ;;  %v633_v37 = vld [vmem:[%s4643_s30 + $0xf0] sm:$0xff] }
  0x34   : > { %4105 = vmatprep.subr.bf16.mxu0 %v4398_v61  ;;  %v496_v49 = vadd.s32 %v4627_v9, %v430_v45  ;;  %v438_v21 = vadd.s32 232, %v4624_v7  ;;  %v503_v25 = vadd.s32 %v4627_v9, %v437_v20  ;;  %4350 = vmatpush3.bf16.msra.mxu1 %v4400_v24  ;;  %v439_v30 = vadd.s32 240, %v4624_v7 }
  0x35   : > { %v494_v40 = vadd.s32 %v4627_v9, %v428_v35  ;;  %vm566_vm15 = vcmp.lt.s32.totalorder %v502_v16, 1000  ;;  %v441_v39 = vadd.s32 256, %v4624_v7  ;;  %v443_v48 = vadd.s32 272, %v4624_v7 }
  0x36   : > { %vm560_vm9 = vcmp.lt.s32.totalorder %v496_v49, 1000  ;;  %v822_v23 = vsel %vm566_vm15, %v630_v19, 0.0  ;;  %v504_v26 = vadd.s32 %v4627_v9, %v438_v21  ;;  %vm567_vm0 = vcmp.lt.s32.totalorder %v503_v25, 1000 }
  0x37   : > { %4106 = vmatpush3.bf16.msra.mxu0 %v4398_v61  ;;  %vm558_vm7 = vcmp.lt.s32.totalorder %v494_v40, 1000  ;;  %v816_v56 = vsel %vm560_vm9, %v624_v52, 0.0  ;;  %v626_v61 = vld [vmem:[%s4643_s30 + $0xb8] sm:$0xff]  ;;  %v823_v32 = vsel %vm567_vm0, %v631_v28, 0.0  ;;  %v505_v34 = vadd.s32 %v4627_v9, %v439_v30 }
  0x38   : > { %4107 = vmatprep.subr.bf16.mxu0 %v4399_v38  ;;  %v814_v47 = vsel %vm558_vm7, %v622_v43, 0.0  ;;  %v869_v59 = vpack.c.bf16 %v816_v56, %v815_v55  ;;  %vm568_vm1 = vcmp.lt.s32.totalorder %v504_v26, 1000  ;;  %v442_v40 = vadd.s32 264, %v4624_v7  ;;  %v637_v55 = vld [vmem:[%s4643_s30 + $0x110] sm:$0xff]  ;;  %v638_v56 = vld [vmem:[%s4643_s30 + $0x118] sm:$0xff] }
  0x39   : > { %v868_v50 = vpack.c.bf16 %v814_v47, %v813_v46  ;;  %v824_v33 = vsel %vm568_vm1, %v632_v29, 0.0  ;;  %vm569_vm2 = vcmp.lt.s32.totalorder %v505_v34, 1000  ;;  %v507_v43 = vadd.s32 %v4627_v9, %v441_v39  ;;  %v635_v46 = vld [vmem:[%s4643_s30 + $0x100] sm:$0xff]  ;;  %v636_v47 = vld [vmem:[%s4643_s30 + $0x108] sm:$0xff] }
  0x3a   : > { %3884 = vmatmul.mubr.msk.bf16.gmra.mxu0 %vm901_vm4, %v862_v54  ;;  %v432_v54 = vadd.s32 184, %v4624_v7  ;;  %v873_v36 = vpack.c.bf16 %v824_v33, %v823_v32  ;;  %v508_v44 = vadd.s32 %v4627_v9, %v442_v40  ;;  %v444_v49 = vadd.s32 280, %v4624_v7  ;;  %v646_v32 = vld [vmem:[%s4643_s30 + $0x158] sm:$0xff]  ;;  %v647_v40 = vld [vmem:[%s4643_s30 + $0x160] sm:$0xff] }
  0x3b   : > { %1080 = vmatprep.mubr.bf16.mxu0 %v5914_v5  ;;  %4108 = vmatpush3.bf16.msra.mxu0 %v4399_v38  ;;  %v634_v38 = vld [vmem:[%s4643_s30 + $0xf8] sm:$0xff]  ;;  %vm571_vm5 = vcmp.lt.s32.totalorder %v507_v43, 1000  ;;  %v509_v52 = vadd.s32 %v4627_v9, %v443_v48  ;;  %v445_v57 = vadd.s32 288, %v4624_v7  ;;  %v447_v3 = vadd.s32 304, %v4624_v7 }
  0x3c   : > { %v498_v58 = vadd.s32 %v4627_v9, %v432_v54  ;;  %4109 = vmatprep.subr.bf16.mxu0 %v4400_v24  ;;  %vm572_vm6 = vcmp.lt.s32.totalorder %v508_v44, 1000  ;;  %v510_v53 = vadd.s32 %v4627_v9, %v444_v49  ;;  %v448_v4 = vadd.s32 312, %v4624_v7  ;;  %v649_v49 = vld [vmem:[%s4643_s30 + $0x170] sm:$0xff] }
  0x3d   : > { %v828_v51 = vsel %vm572_vm6, %v636_v47, 0.0  ;;  %vm573_vm7 = vcmp.lt.s32.totalorder %v509_v52, 1000  ;;  %v513_v10 = vadd.s32 %v4627_v9, %v447_v3  ;;  %v449_v15 = vadd.s32 320, %v4624_v7 }
  0x3e   : > { %vm562_vm11 = vcmp.lt.s32.totalorder %v498_v58, 1000  ;;  %vm574_vm8 = vcmp.lt.s32.totalorder %v510_v53, 1000  ;;  %v446_v58 = vadd.s32 296, %v4624_v7  ;;  %v514_v11 = vadd.s32 %v4627_v9, %v448_v4  ;;  %v653_v4 = vld [vmem:[%s4643_s30 + $0x190] sm:$0xff] }
  0x3f   : > { %v818_v2 = vsel %vm562_vm11, %v626_v61, 0.0  ;;  %4110 = vmatpush3.bf16.msra.mxu0 %v4400_v24  ;;  %v511_v61 = vadd.s32 %v4627_v9, %v445_v57  ;;  %vm577_vm11 = vcmp.lt.s32.totalorder %v513_v10, 1000  ;;  %v450_v16 = vadd.s32 328, %v4624_v7 }
  0x40   : > { %v512_v62 = vadd.s32 %v4627_v9, %v446_v58  ;;  %v515_v19 = vadd.s32 %v4627_v9, %v449_v15  ;;  %v451_v24 = vadd.s32 336, %v4624_v7  ;;  %v452_v25 = vadd.s32 344, %v4624_v7  ;;  %v651_v58 = vld [vmem:[%s4643_s30 + $0x180] sm:$0xff] }
  0x41   : > { %vm575_vm9 = vcmp.lt.s32.totalorder %v511_v61, 1000  ;;  %v516_v20 = vadd.s32 %v4627_v9, %v450_v16  ;;  %v453_v33 = vadd.s32 352, %v4624_v7  ;;  %v454_v34 = vadd.s32 360, %v4624_v7 }
  0x42   : > { %3885 = vmatmul.mubr.msk.bf16.gmra.mxu0 %vm901_vm4, %v863_v0  ;;  %v817_v0 = vsel %vm561_vm10, %v625_v60, 0.0  ;;  %v830_v60 = vsel %vm574_vm8, %v638_v56, 0.0  ;;  %vm576_vm10 = vcmp.lt.s32.totalorder %v512_v62, 1000  ;;  %vm579_vm13 = vcmp.lt.s32.totalorder %v515_v19, 1000 }
  0x43   : > { %1090 = vmatprep.mubr.bf16.mxu0 %v5914_v5  ;;  %v870_v6 = vpack.c.bf16 %v818_v2, %v817_v0  ;;  %v639_v0 = vld [vmem:[%s4643_s30 + $0x120] sm:$0xff]  ;;  %v640_v2 = vld [vmem:[%s4643_s30 + $0x128] sm:$0xff]  ;;  %v517_v28 = vadd.s32 %v4627_v9, %v451_v24  ;;  %v518_v29 = vadd.s32 %v4627_v9, %v452_v25  ;;  %v456_v43 = vadd.s32 376, %v4624_v7 }
  0x44   : > { %v458_v52 = vadd.s32 392, %v4624_v7  ;;  %v460_v61 = vadd.s32 408, %v4624_v7  ;;  %v462_v10 = vadd.s32 424, %v4624_v7 }
  0x45   : > { %vm581_vm15 = vcmp.lt.s32.totalorder %v517_v28, 1000  ;;  %vm582_vm0 = vcmp.lt.s32.totalorder %v518_v29, 1000  ;;  %v522_v47 = vadd.s32 %v4627_v9, %v456_v43 }
  0x46   : > { %v524_v56 = vadd.s32 %v4627_v9, %v458_v52  ;;  %v528_v16 = vadd.s32 %v4627_v9, %v462_v10 }
  0x4a   : > { %3886 = vmatmul.mubr.msk.bf16.gmra.mxu0 %vm901_vm4, %v864_v13  ;;  %v819_v13 = vsel %vm563_vm12, %v627_v8, 0.0  ;;  %v832_v8 = vsel %vm576_vm10, %v640_v2, 0.0  ;;  %vm578_vm12 = vcmp.lt.s32.totalorder %v514_v11, 1000  ;;  %v526_v2 = vadd.s32 %v4627_v9, %v460_v61 }
  0x4b   : > { %1100 = vmatprep.mubr.bf16.mxu0 %v5914_v5  ;;  %v871_v17 = vpack.c.bf16 %v820_v14, %v819_v13  ;;  %v641_v13 = vld [vmem:[%s4643_s30 + $0x130] sm:$0xff]  ;;  %v642_v14 = vld [vmem:[%s4643_s30 + $0x138] sm:$0xff]  ;;  %v469_v61 = vadd.s32 480, %v4624_v7 }
  0x52   : > { %3887 = vmatmul.mubr.msk.bf16.gmra.mxu0 %vm901_vm4, %v865_v22  ;;  %v821_v22 = vsel %vm565_vm14, %v629_v18, 0.0  ;;  %v834_v18 = vsel %vm578_vm12, %v642_v14, 0.0  ;;  %vm580_vm14 = vcmp.lt.s32.totalorder %v516_v20, 1000  ;;  %v655_v20 = vld [vmem:[%s4643_s30 + $0x1a0] sm:$0xff] }
  0x53   : > { %1110 = vmatprep.mubr.bf16.mxu0 %v5914_v5  ;;  %v872_v27 = vpack.c.bf16 %v822_v23, %v821_v22  ;;  %v643_v22 = vld [vmem:[%s4643_s30 + $0x140] sm:$0xff]  ;;  %v644_v23 = vld [vmem:[%s4643_s30 + $0x148] sm:$0xff] }
  0x54   : > { %v835_v26 = vsel %vm579_vm13, %v643_v22, 0.0  ;;  %v463_v22 = vadd.s32 432, %v4624_v7 }
  0x56   : > { %v529_v28 = vadd.s32 %v4627_v9, %v463_v22 }
  0x58   : > { %vm593_vm12 = vcmp.lt.s32.totalorder %v529_v28, 1000 }
  0x5a   : > { %3888 = vmatmul.mubr.msk.bf16.gmra.mxu0 %vm901_vm4, %v866_v31  ;;  %v440_v31 = vadd.s32 248, %v4624_v7 }
  0x5b   : > { %1120 = vmatprep.mubr.bf16.mxu0 %v5914_v5 }
  0x5c   : > { %v506_v35 = vadd.s32 %v4627_v9, %v440_v31  ;;  %v645_v31 = vld [vmem:[%s4643_s30 + $0x150] sm:$0xff] }
  0x5e   : > { %vm570_vm3 = vcmp.lt.s32.totalorder %v506_v35, 1000  ;;  %v837_v35 = vsel %vm581_vm15, %v645_v31, 0.0 }
  0x5f   : > { %v826_v42 = vsel %vm570_vm3, %v634_v38, 0.0  ;;  %v520_v38 = vadd.s32 %v4627_v9, %v454_v34  ;;  %v658_v34 = vld [vmem:[%s4643_s30 + $0x1b8] sm:$0xff] }
  0x62   : > { %3889 = vmatmul.mubr.msk.bf16.gmra.mxu0 %vm901_vm4, %v867_v41  ;;  %v825_v41 = vsel %vm569_vm2, %v633_v37, 0.0  ;;  %v519_v37 = vadd.s32 %v4627_v9, %v453_v33  ;;  %vm584_vm2 = vcmp.lt.s32.totalorder %v520_v38, 1000  ;;  %v657_v33 = vld [vmem:[%s4643_s30 + $0x1b0] sm:$0xff] }
  0x63   : > { %1130 = vmatprep.mubr.bf16.mxu0 %v5914_v5  ;;  %v874_v45 = vpack.c.bf16 %v826_v42, %v825_v41  ;;  %v648_v41 = vld [vmem:[%s4643_s30 + $0x168] sm:$0xff]  ;;  %v455_v42 = vadd.s32 368, %v4624_v7  ;;  %v849_v38 = vsel %vm593_vm12, %v657_v33, 0.0 }
  0x64   : > { %vm583_vm1 = vcmp.lt.s32.totalorder %v519_v37, 1000 }
  0x65   : > { %v839_v44 = vsel %vm583_vm1, %v647_v40, 0.0 }
  0x6a   : > { %3890 = vmatmul.mubr.msk.bf16.gmra.mxu0 %vm901_vm4, %v868_v50  ;;  %v827_v50 = vsel %vm571_vm5, %v635_v46, 0.0  ;;  %v521_v46 = vadd.s32 %v4627_v9, %v455_v42  ;;  %vm586_vm5 = vcmp.lt.s32.totalorder %v522_v47, 1000  ;;  %v660_v47 = vld [vmem:[%s4643_s30 + $0x1c8] sm:$0xff] }
  0x6b   : > { %1140 = vmatprep.mubr.bf16.mxu0 %v5914_v5  ;;  %v875_v54 = vpack.c.bf16 %v828_v51, %v827_v50  ;;  %v650_v50 = vld [vmem:[%s4643_s30 + $0x178] sm:$0xff]  ;;  %v457_v51 = vadd.s32 384, %v4624_v7 }
  0x6c   : > { %vm585_vm3 = vcmp.lt.s32.totalorder %v521_v46, 1000  ;;  %v659_v46 = vld [vmem:[%s4643_s30 + $0x1c0] sm:$0xff] }
  0x6d   : > { %v841_v53 = vsel %vm585_vm3, %v649_v49, 0.0  ;;  %v468_v49 = vadd.s32 472, %v4624_v7 }
  0x72   : > { %3891 = vmatmul.mubr.msk.bf16.gmra.mxu0 %vm901_vm4, %v869_v59  ;;  %v829_v59 = vsel %vm573_vm7, %v637_v55, 0.0  ;;  %v523_v55 = vadd.s32 %v4627_v9, %v457_v51  ;;  %vm588_vm7 = vcmp.lt.s32.totalorder %v524_v56, 1000 }
  0x73   : > { %1150 = vmatprep.mubr.bf16.mxu0 %v5914_v5  ;;  %v876_v63 = vpack.c.bf16 %v830_v60, %v829_v59  ;;  %v652_v59 = vld [vmem:[%s4643_s30 + $0x188] sm:$0xff]  ;;  %v459_v60 = vadd.s32 400, %v4624_v7 }
  0x74   : > { %vm587_vm6 = vcmp.lt.s32.totalorder %v523_v55, 1000  ;;  %v534_v55 = vadd.s32 %v4627_v9, %v468_v49 }
  0x75   : > { %v843_v62 = vsel %vm587_vm6, %v651_v58, 0.0 }
  0x76   : > { %vm598_vm1 = vcmp.lt.s32.totalorder %v534_v55, 1000 }
  0x7a   : > { %3892 = vmatmul.mubr.msk.bf16.gmra.mxu0 %vm901_vm4, %v870_v6  ;;  %v831_v6 = vsel %vm575_vm9, %v639_v0, 0.0  ;;  %v525_v0 = vadd.s32 %v4627_v9, %v459_v60  ;;  %vm590_vm9 = vcmp.lt.s32.totalorder %v526_v2, 1000  ;;  %v662_v60 = vld [vmem:[%s4643_s30 + $0x1d8] sm:$0xff] }
  0x7b   : > { %1160 = vmatprep.mubr.bf16.mxu0 %v5914_v5  ;;  %v877_v12 = vpack.c.bf16 %v832_v8, %v831_v6  ;;  %v654_v6 = vld [vmem:[%s4643_s30 + $0x198] sm:$0xff]  ;;  %v461_v8 = vadd.s32 416, %v4624_v7  ;;  %v854_v2 = vsel %vm598_vm1, %v662_v60, 0.0 }
  0x7c   : > { %vm589_vm8 = vcmp.lt.s32.totalorder %v525_v0, 1000 }
  0x7d   : > { %v527_v15 = vadd.s32 %v4627_v9, %v461_v8 }
  0x7f   : > { %vm591_vm10 = vcmp.lt.s32.totalorder %v527_v15, 1000  ;;  %v664_v15 = vld [vmem:[%s4643_s30 + $0x1e8] sm:$0xff] }
  0x80   : > { %v847_v25 = vsel %vm591_vm10, %v655_v20, 0.0 }
  0x82   : > { %3893 = vmatmul.mubr.msk.bf16.gmra.mxu0 %vm901_vm4, %v871_v17  ;;  %v833_v17 = vsel %vm577_vm11, %v641_v13, 0.0  ;;  %v846_v13 = vsel %vm590_vm9, %v654_v6, 0.0  ;;  %vm592_vm11 = vcmp.lt.s32.totalorder %v528_v16, 1000  ;;  %v471_v16 = vadd.s32 496, %v4624_v7 }
  0x83   : > { %1170 = vmatprep.mubr.bf16.mxu0 %v5914_v5  ;;  %v878_v21 = vpack.c.bf16 %v834_v18, %v833_v17 }
  0x8a   : > { %3894 = vmatmul.mubr.msk.bf16.gmra.mxu0 %vm901_vm4, %v872_v27  ;;  %v836_v27 = vsel %vm580_vm14, %v644_v23, 0.0  ;;  %v464_v23 = vadd.s32 440, %v4624_v7 }
  0x8b   : > { %1180 = vmatprep.mubr.bf16.mxu0 %v5914_v5  ;;  %v879_v30 = vpack.c.bf16 %v836_v27, %v835_v26 }
  0x8c   : > { %v530_v29 = vadd.s32 %v4627_v9, %v464_v23 }
  0x8e   : > { %vm594_vm13 = vcmp.lt.s32.totalorder %v530_v29, 1000 }
  0x92   : > { %3895 = vmatmul.mubr.msk.bf16.gmra.mxu0 %vm901_vm4, %v873_v36  ;;  %v838_v36 = vsel %vm582_vm0, %v646_v32, 0.0 }
  0x93   : > { %1190 = vmatprep.mubr.bf16.mxu0 %v5914_v5  ;;  %v880_v39 = vpack.c.bf16 %v838_v36, %v837_v35  ;;  %v465_v35 = vadd.s32 448, %v4624_v7  ;;  %v466_v36 = vadd.s32 456, %v4624_v7 }
  0x95   : > { %v532_v42 = vadd.s32 %v4627_v9, %v466_v36 }
  0x97   : > { %vm596_vm15 = vcmp.lt.s32.totalorder %v532_v42, 1000 }
  0x98   : > { %v852_v52 = vsel %vm596_vm15, %v660_v47, 0.0 }
  0x9a   : > { %3896 = vmatmul.mubr.msk.bf16.gmra.mxu0 %vm901_vm4, %v874_v45  ;;  %v840_v45 = vsel %vm584_vm2, %v648_v41, 0.0  ;;  %v531_v41 = vadd.s32 %v4627_v9, %v465_v35  ;;  %v666_v35 = vld [vmem:[%s4643_s30 + $0x1f8] sm:$0xff] }
  0x9b   : > { %1200 = vmatprep.mubr.bf16.mxu0 %v5914_v5  ;;  %v881_v48 = vpack.c.bf16 %v840_v45, %v839_v44 }
  0x9c   : > { %vm595_vm14 = vcmp.lt.s32.totalorder %v531_v41, 1000 }
  0x9d   : > { %v851_v51 = vsel %vm595_vm14, %v659_v46, 0.0 }
  0xa2   : > { %3897 = vmatmul.mubr.msk.bf16.gmra.mxu0 %vm901_vm4, %v875_v54  ;;  %v842_v54 = vsel %vm586_vm5, %v650_v50, 0.0 }
  0xa3   : > { %1210 = vmatprep.mubr.bf16.mxu0 %v5914_v5  ;;  %v882_v57 = vpack.c.bf16 %v842_v54, %v841_v53 }
  0xaa   : > { %3898 = vmatmul.mubr.msk.bf16.gmra.mxu0 %vm901_vm4, %v876_v63  ;;  %v844_v63 = vsel %vm588_vm7, %v652_v59, 0.0  ;;  %v661_v59 = vld [vmem:[%s4643_s30 + $0x1d0] sm:$0xff] }
  0xab   : > { %1220 = vmatprep.mubr.bf16.mxu0 %v5914_v5  ;;  %v883_v3 = vpack.c.bf16 %v844_v63, %v843_v62  ;;  %v470_v62 = vadd.s32 488, %v4624_v7 }
  0xad   : > { %v536_v6 = vadd.s32 %v4627_v9, %v470_v62 }
  0xaf   : > { %vm600_vm3 = vcmp.lt.s32.totalorder %v536_v6, 1000 }
  0xb0   : > { %v856_v22 = vsel %vm600_vm3, %v664_v15, 0.0 }
  0xb2   : > { %3899 = vmatmul.mubr.msk.bf16.gmra.mxu0 %vm901_vm4, %v877_v12  ;;  %v845_v12 = vsel %vm589_vm8, %v653_v4, 0.0  ;;  %v535_v4 = vadd.s32 %v4627_v9, %v469_v61 }
  0xb3   : > { %1230 = vmatprep.mubr.bf16.mxu0 %v5914_v5  ;;  %v884_v18 = vpack.c.bf16 %v846_v13, %v845_v12  ;;  %v663_v13 = vld [vmem:[%s4643_s30 + $0x1e0] sm:$0xff] }
  0xb4   : > { %vm599_vm2 = vcmp.lt.s32.totalorder %v535_v4, 1000 }
  0xba   : > { %3900 = vmatmul.mubr.msk.bf16.gmra.mxu0 %vm901_vm4, %v878_v21  ;;  %v656_v21 = vld [vmem:[%s4643_s30 + $0x1a8] sm:$0xff] }
  0xbb   : > { %1240 = vmatprep.mubr.bf16.mxu0 %v5914_v5  ;;  %v848_v26 = vsel %vm592_vm11, %v656_v21, 0.0  ;;  %v855_v21 = vsel %vm599_vm2, %v663_v13, 0.0 }
  0xbc   : > { %v885_v31 = vpack.c.bf16 %v848_v26, %v847_v25  ;;  %v537_v25 = vadd.s32 %v4627_v9, %v471_v16  ;;  %v889_v29 = vpack.c.bf16 %v856_v22, %v855_v21 }
  0xbe   : > { %vm601_vm5 = vcmp.lt.s32.totalorder %v537_v25, 1000 }
  0xc2   : > { %3901 = vmatmul.mubr.msk.bf16.gmra.mxu0 %vm901_vm4, %v879_v30 }
  0xc3   : > { %1250 = vmatprep.mubr.bf16.mxu0 %v5914_v5 }
  0xca   : > { %3902 = vmatmul.mubr.msk.bf16.gmra.mxu0 %vm901_vm4, %v880_v39  ;;  %v850_v39 = vsel %vm594_vm13, %v658_v34, 0.0  ;;  %v665_v34 = vld [vmem:[%s4643_s30 + $0x1f0] sm:$0xff]  ;;  %s4441_s30 = scalar_lea.vmem %s5862_s13, 256 }
  0xcb   : > { %1260 = vmatprep.mubr.bf16.mxu0 %v5914_v5  ;;  %v886_v44 = vpack.c.bf16 %v850_v39, %v849_v38  ;;  %v857_v41 = vsel %vm601_vm5, %v665_v34, 0.0  ;;  %p4442_p11 = scmp.ne.s32.totalorder %s5862_s13, %s4441_s30  ;;  %p4449_p1 = scmp.lt.s32.totalorder %s4447_s14, %s4441_s30 }
  0xcd   : > { %p4443_p12 = pnand %p4442_p11, %p4605_p5  ;;  %p4450_p2 = por %p4449_p1, %p4448_p0 }
  0xcf   : > { %p4444_p13 = pneg %p4443_p12 }
  0xd1   : > { %p4451_p3 = pnand %p4450_p2, %p4444_p13 }
  0xd2   : > { %3903 = vmatmul.mubr.msk.bf16.gmra.mxu0 %vm901_vm4, %v881_v48  ;;  %v467_v48 = vadd.s32 464, %v4624_v7 }
  0xd3   : > { %1270 = vmatprep.mubr.bf16.mxu0 %v5914_v5 }
  0xd4   : > { %v533_v54 = vadd.s32 %v4627_v9, %v467_v48 }
  0xd6   : > { %vm597_vm0 = vcmp.lt.s32.totalorder %v533_v54, 1000 }
  0xd7   : > { %v853_v0 = vsel %vm597_vm0, %v661_v59, 0.0 }
  0xd8   : > { %v888_v10 = vpack.c.bf16 %v854_v2, %v853_v0 }
  0xda   : > { %3904 = vmatmul.mubr.msk.bf16.gmra.mxu0 %vm901_vm4, %v882_v57  ;;  %v887_v57 = vpack.c.bf16 %v852_v52, %v851_v51 }
  0xdb   : > { %1280 = vmatprep.mubr.bf16.mxu0 %v5914_v5 }
  0xe2   : > { %v4861_v11 = vpop.f32.mrf.mxu0  ;;  %3905 = vmatmul.mubr.msk.bf16.gmra.mxu0 %vm901_vm4, %v883_v3 }
  0xe3   : > { %1290 = vmatprep.mubr.bf16.mxu0 %v5914_v5 }
  0xe4   : > { %v4865_v14 = vpop.f32.mrf.mxu0 }
  0xe6   : > { %v4869_v17 = vpop.f32.mrf.mxu0 }
  0xe8   : > { %v4871_v19 = vpop.f32.mrf.mxu0 }
  0xea   : > { %v4877_v24 = vpop.f32.mrf.mxu0  ;;  %3906 = vmatmul.mubr.msk.bf16.gmra.mxu0 %vm901_vm4, %v884_v18  ;;  %v472_v18 = vadd.s32 504, %v4624_v7 }
  0xeb   : > { %1300 = vmatprep.mubr.bf16.mxu0 %v5914_v5 }
  0xec   : > { %v4881_v27 = vpop.f32.mrf.mxu0  ;;  %v538_v26 = vadd.s32 %v4627_v9, %v472_v18 }
  0xee   : > { %v4885_v30 = vpop.f32.mrf.mxu0  ;;  %vm602_vm6 = vcmp.lt.s32.totalorder %v538_v26, 1000 }
  0xef   : > { %v858_v42 = vsel %vm602_vm6, %v666_v35, 0.0 }
  0xf0   : > { %v4887_v32 = vpop.f32.mrf.mxu0  ;;  %v890_v48 = vpack.c.bf16 %v858_v42, %v857_v41 }
  0xf2   : > { %v4893_v37 = vpop.f32.mrf.mxu0  ;;  %3907 = vmatmul.mubr.msk.bf16.gmra.mxu0 %vm901_vm4, %v885_v31  ;;  %v4950_v31 = vld [vmem:[%s5903_s2] ss:$0 sm:$0xff] }
  0xf3   : > { %1310 = vmatprep.mubr.bf16.mxu0 %v5914_v5  ;;  %v1369_v36 = vadd.f32 %v4950_v31, %v4869_v17  ;;  %v1368_v39 = vadd.f32 %v4950_v31, %v4861_v11  ;;  %v1371_v51 = vadd.f32 %v4950_v31, %v4885_v30  ;;  %v1370_v11 = vadd.f32 %v4950_v31, %v4877_v24  ;;  %v4978_v30 = vld [vmem:[%s5906_s5 + $0x38] sm:$0xff]  }
  0xf4   : > { %v4897_v40 = vpop.f32.mrf.mxu0  ;;  %4175 = vmatprep.subr.bf16.mxu1 %v4978_v30 }
  0xf5   : > { %v1433_v46 = vmax.f32 %v1369_v36, 0.0  ;;  %v1432_v49 = vmax.f32 %v1368_v39, 0.0  ;;  %v1435_v59 = vmax.f32 %v1371_v51, 0.0 }
  0xf6   : > { %v4901_v43 = vpop.f32.mrf.mxu0 }
  0xf7   : > { %v1496_v52 = vpack.c.bf16 %v1433_v46, %v1432_v49  ;;  %v1373_v54 = vadd.f32 %v4950_v31, %v4901_v43  ;;  %v1434_v43 = vmax.f32 %v1370_v11, 0.0 }
  0xf8   : > { %v4903_v45 = vpop.f32.mrf.mxu0 }
  0xf9   : > { %v1437_v61 = vmax.f32 %v1373_v54, 0.0  ;;  %v1497_v0 = vpack.c.bf16 %v1435_v59, %v1434_v43 }
  0xfa   : > { %v4909_v50 = vpop.f32.mrf.mxu0  ;;  %3908 = vmatmul.mubr.msk.bf16.gmra.mxu0 %vm901_vm4, %v886_v44 }
  0xfb   : > { %1320 = vmatprep.mubr.bf16.mxu0 %v5914_v5 }
  0xfc   : > { %v4913_v53 = vpop.f32.mrf.mxu0 }
  0xfe   : > { %v4917_v56 = vpop.f32.mrf.mxu0 }
  0xff   : > { %v1375_v2 = vadd.f32 %v4950_v31, %v4917_v56 }
 0x100   : > { %v4919_v58 = vpop.f32.mrf.mxu0 }
 0x101   : > { %v1439_v16 = vmax.f32 %v1375_v2, 0.0 }
 0x102   : > { %v4925_v63 = vpop.f32.mrf.mxu0  ;;  %3909 = vmatmul.mubr.msk.bf16.gmra.mxu0 %vm901_vm4, %v887_v57  ;;  %v1372_v57 = vadd.f32 %v4950_v31, %v4893_v37 }
 0x103   : > { %1330 = vmatprep.mubr.bf16.mxu0 %v5914_v5  ;;  %v1376_v15 = vadd.f32 %v4950_v31, %v4925_v63 }
 0x104   : > { %v4929_v3 = vpop.f32.mrf.mxu0  ;;  %v1436_v62 = vmax.f32 %v1372_v57, 0.0 }
 0x105   : > { %v1440_v25 = vmax.f32 %v1376_v15, 0.0 }
 0x106   : > { %v1086_v8 = vpop.f32.mrf.mxu0  ;;  %v1498_v4 = vpack.c.bf16 %v1437_v61, %v1436_v62 }
 0x107   : > { %v1377_v6 = vadd.f32 %v4950_v31, %v1086_v8 }
 0x108   : > { %v4933_v12 = vpop.f32.mrf.mxu0 }
 0x109   : > { %v1441_v21 = vmax.f32 %v1377_v6, 0.0 }
 0x10a   : > { %v4939_v20 = vpop.f32.mrf.mxu0  ;;  %3910 = vmatmul.mubr.msk.bf16.gmra.mxu0 %vm901_vm4, %v888_v10  ;;  %v1374_v10 = vadd.f32 %v4950_v31, %v4909_v50 }
 0x10b   : > { %1340 = vmatprep.mubr.bf16.mxu0 %v5914_v5  ;;  %v1500_v34 = vpack.c.bf16 %v1441_v21, %v1440_v25  ;;  %v1378_v35 = vadd.f32 %v4950_v31, %v4939_v20 }
 0x10c   : > { %v4943_v23 = vpop.f32.mrf.mxu0  ;;  %v1438_v22 = vmax.f32 %v1374_v10, 0.0 }
 0x10d   : > { %v1442_v46 = vmax.f32 %v1378_v35, 0.0 }
 0x10e   : > { %v1096_v28 = vpop.f32.mrf.mxu0  ;;  %v1499_v26 = vpack.c.bf16 %v1439_v16, %v1438_v22 }
 0x110   : > { %v4952_v33 = vpop.f32.mrf.mxu0 }
 0x112   : > { %v1102_v38 = vpop.f32.mrf.mxu0  ;;  %3911 = vmatmul.mubr.msk.bf16.gmra.mxu0 %vm901_vm4, %v889_v29  ;;  %v1379_v29 = vadd.f32 %v4950_v31, %v1096_v28 }
 0x113   : > { %1350 = vmatprep.mubr.bf16.mxu0 %v5914_v5  ;;  %v1380_v36 = vadd.f32 %v4950_v31, %v1102_v38 }
 0x114   : > { %v4962_v44 = vpop.f32.mrf.mxu0  ;;  %v1443_v39 = vmax.f32 %v1379_v29, 0.0 }
 0x115   : > { %v1444_v28 = vmax.f32 %v1380_v36, 0.0 }
 0x116   : > { %v1106_v47 = vpop.f32.mrf.mxu0  ;;  %v1501_v49 = vpack.c.bf16 %v1443_v39, %v1442_v46 }
 0x117   : > { %v1381_v50 = vadd.f32 %v4950_v31, %v1106_v47 }
 0x118   : > { %v4966_v17 = vpop.f32.mrf.mxu0 }
 0x119   : > { %v1445_v42 = vmax.f32 %v1381_v50, 0.0 }
 0x11a   : > { %v1112_v55 = vpop.f32.mrf.mxu0  ;;  %3912 = vmatmul.mubr.msk.bf16.gmra.mxu0 %vm901_vm4, %v890_v48 }
 0x11b   : > { %4111 = vmatprep.mubr.bf16.mxu0 %v1496_v52  ;;  %v1502_v47 = vpack.c.bf16 %v1445_v42, %v1444_v28  ;;  %v1382_v54 = vadd.f32 %v4950_v31, %v1112_v55 }
 0x11c   : > { %v4980_v60 = vpop.f32.mrf.mxu0 }
 0x11d   : > { %v1446_v62 = vmax.f32 %v1382_v54, 0.0 }
 0x11e   : > { %v1116_v24 = vpop.f32.mrf.mxu0 }
 0x11f   : > { %v1383_v51 = vadd.f32 %v4950_v31, %v1116_v24 }
 0x120   : > { %v4985_v37 = vpop.f32.mrf.mxu0 }
 0x121   : > { %v1447_v57 = vmax.f32 %v1383_v51, 0.0 }
 0x122   : > { %v1122_v13 = vpop.f32.mrf.mxu0  ;;  %4112 = vmatmul.mubr.bf16.vlgmr.msra.gmra.mxu0 %v1497_v0 }
 0x123   : > { %4115 = vmatprep.mubr.bf16.mxu0 %v1498_v4  ;;  %v1384_v38 = vadd.f32 %v4950_v31, %v1122_v13  ;;  %v1503_v4 = vpack.c.bf16 %v1447_v57, %v1446_v62 }
 0x124   : > { %v4992_v18 = vpop.f32.mrf.mxu0 }
 0x125   : > { %v1448_v0 = vmax.f32 %v1384_v38, 0.0 }
 0x126   : > { %v1126_v56 = vpop.f32.mrf.mxu0 }
 0x127   : > { %v1385_v20 = vadd.f32 %v4950_v31, %v1126_v56 }
 0x128   : > { %v4995_v8 = vpop.f32.mrf.mxu0 }
 0x129   : > { %v1449_v61 = vmax.f32 %v1385_v20, 0.0  ;;  %v4403_v20 = vld [vmem:[%s5906_s5 + $0x28] sm:$0xff]  }
 0x12a   : > { %v1132_v63 = vpop.f32.mrf.mxu0  ;;  %4116 = vmatmul.mubr.bf16.gmra.mxu0 %v1499_v26 }
 0x12b   : > { %4119 = vmatprep.mubr.bf16.mxu0 %v1500_v34  ;;  %v1504_v10 = vpack.c.bf16 %v1449_v61, %v1448_v0  ;;  %v1386_v16 = vadd.f32 %v4950_v31, %v1132_v63 }
 0x12c   : > { %v5001_v41 = vpop.f32.mrf.mxu0 }
 0x12d   : > { %v1450_v29 = vmax.f32 %v1386_v16, 0.0  ;;  %v4406_v16 = vld [vmem:[%s5906_s5 + $0x10] sm:$0xff]  }
 0x12e   : > { %v1136_v48 = vpop.f32.mrf.mxu0 }
 0x12f   : > { %v1387_v6 = vadd.f32 %v4950_v31, %v1136_v48  ;;  %v4402_v48 = vld [vmem:[%s5906_s5 + $0x30] sm:$0xff]  }
 0x130   : > { %v5004_v52 = vpop.f32.mrf.mxu0 }
 0x131   : > { %v1451_v56 = vmax.f32 %v1387_v6, 0.0 }
 0x132   : > { %v1142_v11 = vpop.f32.mrf.mxu0  ;;  %4120 = vmatmul.mubr.bf16.gmra.mxu0 %v1501_v49 }
 0x133   : > { %4123 = vmatprep.mubr.bf16.mxu0 %v1502_v47  ;;  %v1388_v43 = vadd.f32 %v4950_v31, %v1142_v11  ;;  %v1505_v35 = vpack.c.bf16 %v1451_v56, %v1450_v29 }
 0x134   : > { %v5009_v59 = vpop.f32.mrf.mxu0 }
 0x135   : > { %v1452_v15 = vmax.f32 %v1388_v43, 0.0  ;;  %v4404_v43 = vld [vmem:[%s5906_s5 + $0x20] sm:$0xff]  }
 0x136   : > { %v1146_v24 = vpop.f32.mrf.mxu0 }
 0x137   : > { %v1389_v2 = vadd.f32 %v4950_v31, %v1146_v24 }
 0x138   : > { %v5014_v55 = vpop.f32.mrf.mxu0 }
 0x139   : > { %v1453_v13 = vmax.f32 %v1389_v2, 0.0  ;;  %v4405_v2 = vld [vmem:[%s5906_s5 + $0x18] sm:$0xff]  }
 0x13a   : > { %v1152_v21 = vpop.f32.mrf.mxu0  ;;  %4124 = vmatmul.mubr.bf16.gmra.mxu0 %v1503_v4 }
 0x13b   : > { %4127 = vmatprep.mubr.bf16.mxu0 %v1504_v10  ;;  %v1506_v22 = vpack.c.bf16 %v1453_v13, %v1452_v15  ;;  %v1390_v26 = vadd.f32 %v4950_v31, %v1152_v21 }
 0x13c   : > { %v5017_v25 = vpop.f32.mrf.mxu0 }
 0x13d   : > { %4131 = vmatprep.mubr.bf16.mxu1 %v1506_v22  ;;  %v1454_v39 = vmax.f32 %v1390_v26, 0.0 }
 0x13e   : > { %v1156_v34 = vpop.f32.mrf.mxu0 }
 0x13f   : > { %v1391_v50 = vadd.f32 %v4950_v31, %v1156_v34 }
 0x140   : > { %v5021_v36 = vpop.f32.mrf.mxu0 }
 0x141   : > { %v1455_v42 = vmax.f32 %v1391_v50, 0.0 }
 0x142   : > { %v1162_v63 = vpop.f32.mrf.mxu0  ;;  %4128 = vmatmul.mubr.bf16.gmra.mxu0 %v1505_v35 }
 0x143   : > { %v1507_v46 = vpack.c.bf16 %v1455_v42, %v1454_v39  ;;  %v1392_v49 = vadd.f32 %v4950_v31, %v1162_v63  ;;  %v4407_v42 = vld [vmem:[%s5906_s5 + $0x8] sm:$0xff]  }
 0x144   : > { %v5026_v28 = vpop.f32.mrf.mxu0 }
 0x145   : > { %4132 = vmatmul.mubr.bf16.vlgmr.msra.gmra.mxu1 %v1507_v46  ;;  %v1456_v11 = vmax.f32 %v1392_v49, 0.0 }
 0x146   : > { %v1166_v51 = vpop.f32.mrf.mxu0  ;;  %4176 = vmatpush3.bf16.msra.mxu1 %v4978_v30 }
 0x147   : > { %v1393_v47 = vadd.f32 %v4950_v31, %v1166_v51  ;;  %4177 = vmatprep.subr.bf16.mxu1 %v4402_v48 }
 0x148   : > { %v5034_v54 = vpop.f32.mrf.mxu0 }
 0x149   : > { %v1457_v38 = vmax.f32 %v1393_v47, 0.0 }
 0x14a   : > { %v1172_v57 = vpop.f32.mrf.mxu0  ;;  %4178 = vmatpush3.bf16.msra.mxu1 %v4402_v48 }
 0x14b   : > { %v1508_v61 = vpack.c.bf16 %v1457_v38, %v1456_v11  ;;  %4179 = vmatprep.subr.bf16.mxu1 %v4403_v20  ;;  %v1394_v62 = vadd.f32 %v4950_v31, %v1172_v57 }
 0x14c   : > { %v5039_v30 = vpop.f32.mrf.mxu0 }
 0x14d   : > { %4135 = vmatprep.mubr.bf16.mxu1 %v1508_v61  ;;  %v1458_v6 = vmax.f32 %v1394_v62, 0.0 }
 0x14e   : > { %v1176_v24 = vpop.f32.mrf.mxu0  ;;  %4180 = vmatpush3.bf16.msra.mxu1 %v4403_v20 }
 0x14f   : > { %v1395_v0 = vadd.f32 %v4950_v31, %v1176_v24  ;;  %4181 = vmatprep.subr.bf16.mxu1 %v4404_v43  ;;  %v4408_v24 = vld [vmem:[%s5906_s5] sm:$0xff]  }
 0x150   : > { %v5046_v4 = vpop.f32.mrf.mxu0 }
 0x151   : > { %v1459_v10 = vmax.f32 %v1395_v0, 0.0 }
 0x152   : > { %v1182_v15 = vpop.f32.mrf.mxu0  ;;  %4182 = vmatpush3.bf16.msra.mxu1 %v4404_v43 }
 0x153   : > { %v1509_v13 = vpack.c.bf16 %v1459_v10, %v1458_v6  ;;  %4183 = vmatprep.subr.bf16.mxu1 %v4405_v2  ;;  %v1396_v22 = vadd.f32 %v4950_v31, %v1182_v15 }
 0x154   : > { %v5051_v21 = vpop.f32.mrf.mxu0 }
 0x155   : > { %4136 = vmatmul.mubr.bf16.gmra.mxu1 %v1509_v13  ;;  %v1460_v34 = vmax.f32 %v1396_v22, 0.0 }
 0x156   : > { %v1186_v56 = vpop.f32.mrf.mxu0  ;;  %4184 = vmatpush3.bf16.msra.mxu1 %v4405_v2 }
 0x157   : > { %v1397_v26 = vadd.f32 %v4950_v31, %v1186_v56  ;;  %4185 = vmatprep.subr.bf16.mxu1 %v4406_v16 }
 0x158   : > { %v5055_v29 = vpop.f32.mrf.mxu0 }
 0x159   : > { %v1461_v50 = vmax.f32 %v1397_v26, 0.0 }
 0x15a   : > { %v1192_v35 = vpop.f32.mrf.mxu0  ;;  %4186 = vmatpush3.bf16.msra.mxu1 %v4406_v16 }
 0x15b   : > { %v1510_v39 = vpack.c.bf16 %v1461_v50, %v1460_v34  ;;  %v1398_v46 = vadd.f32 %v4950_v31, %v1192_v35  ;;  %4187 = vmatprep.subr.bf16.mxu1 %v4407_v42 }
 0x15c   : > { %v5060_v63 = vpop.f32.mrf.mxu0 }
 0x15d   : > { %4139 = vmatprep.mubr.bf16.mxu1 %v1510_v39  ;;  %v1462_v47 = vmax.f32 %v1398_v46, 0.0 }
 0x15e   : > { %v1196_v48 = vpop.f32.mrf.mxu0  ;;  %4188 = vmatpush3.bf16.msra.mxu1 %v4407_v42 }
 0x15f   : > { %v1399_v49 = vadd.f32 %v4950_v31, %v1196_v48  ;;  %4189 = vmatprep.subr.bf16.mxu1 %v4408_v24 }
 0x160   : > { %v5064_v51 = vpop.f32.mrf.mxu0 }
 0x161   : > { %v1463_v20 = vmax.f32 %v1399_v49, 0.0 }
 0x162   : > { %v1202_v11 = vpop.f32.mrf.mxu0  ;;  %4190 = vmatpush3.bf16.msra.mxu1 %v4408_v24 }
 0x163   : > { %v1511_v38 = vpack.c.bf16 %v1463_v20, %v1462_v47  ;;  %v1400_v61 = vadd.f32 %v4950_v31, %v1202_v11 }
 0x164   : > { %v5066_v57 = vpop.f32.mrf.mxu0 }
 0x165   : > { %4140 = vmatmul.mubr.bf16.gmra.mxu1 %v1511_v38  ;;  %v1464_v2 = vmax.f32 %v1400_v61, 0.0 }
 0x166   : > { %v1206_v43 = vpop.f32.mrf.mxu0 }
 0x167   : > { %v1401_v62 = vadd.f32 %v4950_v31, %v1206_v43 }
 0x168   : > { %v5073_v0 = vpop.f32.mrf.mxu0 }
 0x169   : > { %v1465_v6 = vmax.f32 %v1401_v62, 0.0 }
 0x16a   : > { %v1212_v10 = vpop.f32.mrf.mxu0 }
 0x16b   : > { %v1512_v15 = vpack.c.bf16 %v1465_v6, %v1464_v2  ;;  %v1402_v16 = vadd.f32 %v4950_v31, %v1212_v10 }
 0x16c   : > { %v5075_v13 = vpop.f32.mrf.mxu0 }
 0x16d   : > { %4143 = vmatprep.mubr.bf16.mxu1 %v1512_v15  ;;  %v1466_v34 = vmax.f32 %v1402_v16, 0.0 }
 0x16e   : > { %v1216_v22 = vpop.f32.mrf.mxu0 }
 0x16f   : > { %v1403_v56 = vadd.f32 %v4950_v31, %v1216_v22 }
 0x170   : > { %v5079_v26 = vpop.f32.mrf.mxu0 }
 0x171   : > { %v1467_v50 = vmax.f32 %v1403_v56, 0.0 }
 0x172   : > { %v1222_v35 = vpop.f32.mrf.mxu0 }
 0x173   : > { %v1513_v39 = vpack.c.bf16 %v1467_v50, %v1466_v34  ;;  %v1404_v46 = vadd.f32 %v4950_v31, %v1222_v35 }
 0x174   : > { %v5081_v42 = vpop.f32.mrf.mxu0 }
 0x175   : > { %4144 = vmatmul.mubr.bf16.gmra.mxu1 %v1513_v39  ;;  %v1468_v20 = vmax.f32 %v1404_v46, 0.0 }
 0x176   : > { %v1226_v48 = vpop.f32.mrf.mxu0 }
 0x177   : > { %v1405_v49 = vadd.f32 %v4950_v31, %v1226_v48 }
 0x178   : > { %v5085_v47 = vpop.f32.mrf.mxu0 }
 0x179   : > { %v1469_v11 = vmax.f32 %v1405_v49, 0.0 }
 0x17a   : > { %v1232_v38 = vpop.f32.mrf.mxu0 }
 0x17b   : > { %v1514_v61 = vpack.c.bf16 %v1469_v11, %v1468_v20  ;;  %v1406_v62 = vadd.f32 %v4950_v31, %v1232_v38 }
 0x17c   : > { %v5087_v43 = vpop.f32.mrf.mxu0 }
 0x17d   : > { %4147 = vmatprep.mubr.bf16.mxu1 %v1514_v61  ;;  %v1470_v10 = vmax.f32 %v1406_v62, 0.0 }
 0x17e   : > { %v1236_v24 = vpop.f32.mrf.mxu0 }
 0x17f   : > { %v1407_v2 = vadd.f32 %v4950_v31, %v1236_v24 }
 0x180   : > { %v5091_v6 = vpop.f32.mrf.mxu0 }
 0x181   : > { %v1471_v15 = vmax.f32 %v1407_v2, 0.0 }
 0x182   : > { %v1242_v16 = vpop.f32.mrf.mxu0 }
 0x183   : > { %v1515_v22 = vpack.c.bf16 %v1471_v15, %v1470_v10  ;;  %v1408_v34 = vadd.f32 %v4950_v31, %v1242_v16 }
 0x184   : > { %v5093_v56 = vpop.f32.mrf.mxu0 }
 0x185   : > { %5926 = vst [vmem:[#allocation7_spill] sm:$0xff] %v5093_v56  ;;  %4148 = vmatmul.mubr.bf16.gmra.mxu1 %v1515_v22  ;;  %v1472_v46 = vmax.f32 %v1408_v34, 0.0 }
 0x186   : > { %v1246_v50 = vpop.f32.mrf.mxu0 }
 0x187   : > { %v1409_v35 = vadd.f32 %v4950_v31, %v1246_v50 }
 0x188   : > { %v5097_v39 = vpop.f32.mrf.mxu0 }
 0x189   : > { %v1473_v48 = vmax.f32 %v1409_v35, 0.0 }
 0x18a   : > { %v1252_v49 = vpop.f32.mrf.mxu0 }
 0x18b   : > { %v1516_v20 = vpack.c.bf16 %v1473_v48, %v1472_v46  ;;  %v1410_v38 = vadd.f32 %v4950_v31, %v1252_v49 }
 0x18c   : > { %v5099_v11 = vpop.f32.mrf.mxu0 }
 0x18d   : > { %5927 = vst [vmem:[#allocation8_spill] sm:$0xff] %v5099_v11  ;;  %4151 = vmatprep.mubr.bf16.mxu1 %v1516_v20  ;;  %v1474_v2 = vmax.f32 %v1410_v38, 0.0 }
 0x18e   : > { %v1256_v61 = vpop.f32.mrf.mxu0 }
 0x18f   : > { %v1411_v62 = vadd.f32 %v4950_v31, %v1256_v61 }
 0x190   : > { %v5103_v24 = vpop.f32.mrf.mxu0 }
 0x191   : > { %5928 = vst [vmem:[#allocation9_spill] sm:$0xff] %v5103_v24  ;;  %v1475_v10 = vmax.f32 %v1411_v62, 0.0 }
 0x192   : > { %v1262_v15 = vpop.f32.mrf.mxu0 }
 0x193   : > { %v1517_v16 = vpack.c.bf16 %v1475_v10, %v1474_v2  ;;  %v1412_v34 = vadd.f32 %v4950_v31, %v1262_v15 }
 0x194   : > { %v5105_v22 = vpop.f32.mrf.mxu0 }
 0x195   : > { %5929 = vst [vmem:[#allocation10_spill] sm:$0xff] %v5105_v22  ;;  %4152 = vmatmul.mubr.bf16.gmra.mxu1 %v1517_v16  ;;  %v1476_v48 = vmax.f32 %v1412_v34, 0.0 }
 0x196   : > { %v1266_v50 = vpop.f32.mrf.mxu0 }
 0x197   : > { %v1413_v35 = vadd.f32 %v4950_v31, %v1266_v50 }
 0x198   : > { %v5109_v46 = vpop.f32.mrf.mxu0 }
 0x199   : > { %5930 = vst [vmem:[#allocation11_spill] sm:$0xff] %v5109_v46  ;;  %v1477_v49 = vmax.f32 %v1413_v35, 0.0 }
 0x19a   : > { %v1272_v20 = vpop.f32.mrf.mxu0 }
 0x19b   : > { %v1518_v61 = vpack.c.bf16 %v1477_v49, %v1476_v48  ;;  %v1414_v38 = vadd.f32 %v4950_v31, %v1272_v20 }
 0x19c   : > { %v5111_v1 = vpop.f32.mrf.mxu0 }
 0x19d   : > { %5931 = vst [vmem:[#allocation12_spill] sm:$0xff] %v5111_v1  ;;  %4155 = vmatprep.mubr.bf16.mxu1 %v1518_v61  ;;  %v1478_v15 = vmax.f32 %v1414_v38, 0.0 }
 0x19e   : > { %v1276_v62 = vpop.f32.mrf.mxu0 }
 0x19f   : > { %v1415_v2 = vadd.f32 %v4950_v31, %v1276_v62 }
 0x1a0   : > { %v5115_v10 = vpop.f32.mrf.mxu0 }
 0x1a1   : > { %5932 = vst [vmem:[#allocation13_spill] sm:$0xff] %v5115_v10  ;;  %v1479_v16 = vmax.f32 %v1415_v2, 0.0 }
 0x1a2   : > { %v1282_v5 = vpop.f32.mrf.mxu0 }
 0x1a3   : > { %v1519_v50 = vpack.c.bf16 %v1479_v16, %v1478_v15  ;;  %v1416_v34 = vadd.f32 %v4950_v31, %v1282_v5 }
 0x1a4   : > { %v5117_v9 = vpop.f32.mrf.mxu0 }
 0x1a5   : > { %5933 = vst [vmem:[#allocation14_spill] sm:$0xff] %v5117_v9  ;;  %4156 = vmatmul.mubr.bf16.gmra.mxu1 %v1519_v50  ;;  %v1480_v20 = vmax.f32 %v1416_v34, 0.0 }
 0x1a6   : > { %v1286_v35 = vpop.f32.mrf.mxu0 }
 0x1a7   : > { %v1417_v48 = vadd.f32 %v4950_v31, %v1286_v35 }
 0x1a8   : > { %v5121_v49 = vpop.f32.mrf.mxu0 }
 0x1a9   : > { %5934 = vst [vmem:[#allocation15_spill] sm:$0xff] %v5121_v49  ;;  %v1481_v61 = vmax.f32 %v1417_v48, 0.0 }
 0x1aa   : > { %v1292_v7 = vpop.f32.mrf.mxu0 }
 0x1ab   : > { %v1520_v62 = vpack.c.bf16 %v1481_v61, %v1480_v20  ;;  %v1418_v38 = vadd.f32 %v4950_v31, %v1292_v7 }
 0x1ac   : > { %v5123_v1 = vpop.f32.mrf.mxu0 }
 0x1ad   : > { %5935 = vst [vmem:[#allocation16_spill] sm:$0xff] %v5123_v1  ;;  %4159 = vmatprep.mubr.bf16.mxu1 %v1520_v62  ;;  %v1482_v5 = vmax.f32 %v1418_v38, 0.0 }
 0x1ae   : > { %v1296_v2 = vpop.f32.mrf.mxu0 }
 0x1af   : > { %v1419_v15 = vadd.f32 %v4950_v31, %v1296_v2 }
 0x1b0   : > { %v5127_v16 = vpop.f32.mrf.mxu0 }
 0x1b1   : > { %5936 = vst [vmem:[#allocation17_spill] sm:$0xff] %v5127_v16  ;;  %v1483_v50 = vmax.f32 %v1419_v15, 0.0 }
 0x1b2   : > { %v1302_v9 = vpop.f32.mrf.mxu0 }
 0x1b3   : > { %v1521_v35 = vpack.c.bf16 %v1483_v50, %v1482_v5  ;;  %v1420_v34 = vadd.f32 %v4950_v31, %v1302_v9 }
 0x1b4   : > { %v5129_v10 = vpop.f32.mrf.mxu0 }
 0x1b5   : > { %5937 = vst [vmem:[#allocation18_spill] sm:$0xff] %v5129_v10  ;;  %4160 = vmatmul.mubr.bf16.gmra.mxu1 %v1521_v35  ;;  %v1484_v7 = vmax.f32 %v1420_v34, 0.0 }
 0x1b6   : > { %v1306_v48 = vpop.f32.mrf.mxu0 }
 0x1b7   : > { %v1421_v20 = vadd.f32 %v4950_v31, %v1306_v48 }
 0x1b8   : > { %v5133_v61 = vpop.f32.mrf.mxu0 }
 0x1b9   : > { %5938 = vst [vmem:[#allocation19_spill] sm:$0xff] %v5133_v61  ;;  %v1485_v62 = vmax.f32 %v1421_v20, 0.0 }
 0x1ba   : > { %v1312_v1 = vpop.f32.mrf.mxu0 }
 0x1bb   : > { %v1522_v2 = vpack.c.bf16 %v1485_v62, %v1484_v7  ;;  %v1422_v38 = vadd.f32 %v4950_v31, %v1312_v1 }
 0x1bc   : > { %v5135_v49 = vpop.f32.mrf.mxu0 }
 0x1bd   : > { %5939 = vst [vmem:[#allocation20_spill] sm:$0xff] %v5135_v49  ;;  %4163 = vmatprep.mubr.bf16.mxu1 %v1522_v2  ;;  %v1486_v9 = vmax.f32 %v1422_v38, 0.0 }
 0x1be   : > { %v1316_v15 = vpop.f32.mrf.mxu0 }
 0x1bf   : > { %v1423_v5 = vadd.f32 %v4950_v31, %v1316_v15 }
 0x1c0   : > { %v5139_v50 = vpop.f32.mrf.mxu0 }
 0x1c1   : > { %5940 = vst [vmem:[#allocation21_spill] sm:$0xff] %v5139_v50  ;;  %v1487_v35 = vmax.f32 %v1423_v5, 0.0 }
 0x1c2   : > { %v1322_v10 = vpop.f32.mrf.mxu0 }
 0x1c3   : > { %v1523_v48 = vpack.c.bf16 %v1487_v35, %v1486_v9  ;;  %v1424_v34 = vadd.f32 %v4950_v31, %v1322_v10 }
 0x1c4   : > { %v5141_v16 = vpop.f32.mrf.mxu0 }
 0x1c5   : > { %5941 = vst [vmem:[#allocation22_spill] sm:$0xff] %v5141_v16  ;;  %4164 = vmatmul.mubr.bf16.gmra.mxu1 %v1523_v48  ;;  %v1488_v1 = vmax.f32 %v1424_v34, 0.0 }
 0x1c6   : > { %v1326_v20 = vpop.f32.mrf.mxu0 }
 0x1c7   : > { %v1425_v7 = vadd.f32 %v4950_v31, %v1326_v20 }
 0x1c8   : > { %v5145_v62 = vpop.f32.mrf.mxu0 }
 0x1c9   : > { %5942 = vst [vmem:[#allocation23_spill] sm:$0xff] %v5145_v62  ;;  %v1489_v2 = vmax.f32 %v1425_v7, 0.0 }
 0x1ca   : > { %v1332_v49 = vpop.f32.mrf.mxu0 }
 0x1cb   : > { %v1524_v15 = vpack.c.bf16 %v1489_v2, %v1488_v1  ;;  %v1426_v38 = vadd.f32 %v4950_v31, %v1332_v49 }
 0x1cc   : > { %v5147_v61 = vpop.f32.mrf.mxu0 }
 0x1cd   : > { %5943 = vst [vmem:[#allocation24_spill] sm:$0xff] %v5147_v61  ;;  %4167 = vmatprep.mubr.bf16.mxu1 %v1524_v15  ;;  %v1490_v10 = vmax.f32 %v1426_v38, 0.0 }
 0x1ce   : > { %v1336_v5 = vpop.f32.mrf.mxu0 }
 0x1cf   : > { %v1427_v9 = vadd.f32 %v4950_v31, %v1336_v5 }
 0x1d0   : > { %v5151_v35 = vpop.f32.mrf.mxu0 }
 0x1d1   : > { %5944 = vst [vmem:[#allocation25_spill] sm:$0xff] %v5151_v35  ;;  %v1491_v48 = vmax.f32 %v1427_v9, 0.0 }
 0x1d2   : > { %v1342_v16 = vpop.f32.mrf.mxu0 }
 0x1d3   : > { %v1525_v20 = vpack.c.bf16 %v1491_v48, %v1490_v10  ;;  %v1428_v34 = vadd.f32 %v4950_v31, %v1342_v16 }
 0x1d4   : > { %v5153_v50 = vpop.f32.mrf.mxu0 }
 0x1d5   : > { %5945 = vst [vmem:[#allocation26_spill] sm:$0xff] %v5153_v50  ;;  %4168 = vmatmul.mubr.bf16.gmra.mxu1 %v1525_v20  ;;  %v1492_v49 = vmax.f32 %v1428_v34, 0.0  ;;  %v5168_v34 = vld [vmem:[%s5905_s4] ss:$0 sm:$0xff] }
 0x1d6   : > { %v1346_v7 = vpop.f32.mrf.mxu0 }
 0x1d7   : > { %v1429_v1 = vadd.f32 %v4950_v31, %v1346_v7 }
 0x1d8   : > { %v5157_v2 = vpop.f32.mrf.mxu0 }
 0x1d9   : > { %5946 = vst [vmem:[#allocation27_spill] sm:$0xff] %v5157_v2  ;;  %v1493_v15 = vmax.f32 %v1429_v1, 0.0 }
 0x1da   : > { %v1352_v61 = vpop.f32.mrf.mxu0 }
 0x1db   : > { %v1526_v5 = vpack.c.bf16 %v1493_v15, %v1492_v49  ;;  %v1430_v38 = vadd.f32 %v4950_v31, %v1352_v61 }
 0x1dc   : > { %v5159_v62 = vpop.f32.mrf.mxu0 }
 0x1dd   : > { %5947 = vst [vmem:[#allocation28_spill] sm:$0xff] %v5159_v62  ;;  %4171 = vmatprep.mubr.bf16.mxu1 %v1526_v5  ;;  %v1494_v16 = vmax.f32 %v1430_v38, 0.0 }
 0x1de   : > { %v1356_v9 = vpop.f32.mrf.mxu0 }
 0x1df   : > { %v1431_v10 = vadd.f32 %v4950_v31, %v1356_v9 }
 0x1e0   : > { %v5163_v48 = vpop.f32.mrf.mxu0 }
 0x1e1   : > { %5948 = vst [vmem:[#allocation29_spill] sm:$0xff] %v5163_v48  ;;  %v1495_v20 = vmax.f32 %v1431_v10, 0.0 }
 0x1e2   : > { %v4113_v50 = vpop.f32.mrf.mxu0 }
 0x1e3   : > { %v1527_v7 = vpack.c.bf16 %v1495_v20, %v1494_v16  ;;  %v1642_v31 = vadd.f32 %v4113_v50, %v5168_v34 }
 0x1e4   : > { %v1633_v35 = vpop.f32.mrf.mxu0 }
 0x1e5   : > { %4172 = vmatmul.mubr.bf16.gmra.mxu1 %v1527_v7  ;;  %v1634_v61 = vadd.f32 %v5168_v34, %v1633_v35  ;;  %v1890_v20 = vmax.f32 %v1642_v31, 0.0 }
 0x1e6   : > { %v4114_v1 = vpop.f32.mrf.mxu0 }
 0x1e7   : > { %v1645_v49 = vadd.f32 %v4114_v1, %v5168_v34  ;;  %v1888_v10 = vmax.f32 %v1634_v61, 0.0 }
 0x1e8   : > { %v1636_v15 = vpop.f32.mrf.mxu0 }
 0x1e9   : > { %v1637_v5 = vadd.f32 %v5168_v34, %v1636_v15  ;;  %v1891_v38 = vmax.f32 %v1645_v49, 0.0 }
 0x1ea   : > { %v4117_v9 = vpop.f32.mrf.mxu0 }
 0x1eb   : > { %v1889_v16 = vmax.f32 %v1637_v5, 0.0  ;;  %v1953_v2 = vpack.c.bf16 %v1891_v38, %v1890_v20  ;;  %v1658_v1 = vadd.f32 %v4117_v9, %v5168_v34 }
 0x1ec   : > { %v1649_v62 = vpop.f32.mrf.mxu0 }
 0x1ed   : > { %v1952_v48 = vpack.c.bf16 %v1889_v16, %v1888_v10  ;;  %v1650_v7 = vadd.f32 %v5168_v34, %v1649_v62  ;;  %v1894_v31 = vmax.f32 %v1658_v1, 0.0 }
 0x1ee   : > { %v4118_v22 = vpop.f32.mrf.mxu0 }
 0x1ef   : > { %v1661_v35 = vadd.f32 %v4118_v22, %v5168_v34  ;;  %4191 = vmatprep.mubr.bf16.mxu1 %v1952_v48  ;;  %v1892_v61 = vmax.f32 %v1650_v7, 0.0 }
 0x1f0   : > { %v1652_v50 = vpop.f32.mrf.mxu0  ;;  %4192 = vmatmul.mubr.bf16.vlgmr.msra.gmra.mxu1 %v1953_v2 }
 0x1f1   : > { %v1653_v15 = vadd.f32 %v5168_v34, %v1652_v50  ;;  %v1895_v49 = vmax.f32 %v1661_v35, 0.0 }
 0x1f2   : > { %v4121_v46 = vpop.f32.mrf.mxu0 }
 0x1f3   : > { %v1893_v5 = vmax.f32 %v1653_v15, 0.0  ;;  %v1955_v38 = vpack.c.bf16 %v1895_v49, %v1894_v31  ;;  %v1674_v48 = vadd.f32 %v4121_v46, %v5168_v34 }
 0x1f4   : > { %v1665_v11 = vpop.f32.mrf.mxu0 }
 0x1f5   : > { %v1954_v10 = vpack.c.bf16 %v1893_v5, %v1892_v61  ;;  %v1666_v62 = vadd.f32 %v5168_v34, %v1665_v11  ;;  %v1898_v1 = vmax.f32 %v1674_v48, 0.0 }
 0x1f6   : > { %v4122_v16 = vpop.f32.mrf.mxu0 }
 0x1f7   : > { %v1677_v22 = vadd.f32 %v4122_v16, %v5168_v34  ;;  %4195 = vmatprep.mubr.bf16.mxu1 %v1954_v10  ;;  %v1896_v7 = vmax.f32 %v1666_v62, 0.0 }
 0x1f8   : > { %v1668_v9 = vpop.f32.mrf.mxu0  ;;  %4196 = vmatmul.mubr.bf16.gmra.mxu1 %v1955_v38 }
 0x1f9   : > { %v1669_v2 = vadd.f32 %v5168_v34, %v1668_v9  ;;  %v1899_v20 = vmax.f32 %v1677_v22, 0.0 }
 0x1fa   : > { %v4125_v35 = vpop.f32.mrf.mxu0 }
 0x1fb   : > { %v1897_v50 = vmax.f32 %v1669_v2, 0.0  ;;  %v1957_v49 = vpack.c.bf16 %v1899_v20, %v1898_v1  ;;  %v1690_v46 = vadd.f32 %v4125_v35, %v5168_v34 }
 0x1fc   : > { %v1681_v15 = vpop.f32.mrf.mxu0 }
 0x1fd   : > { %v1956_v61 = vpack.c.bf16 %v1897_v50, %v1896_v7  ;;  %v1682_v11 = vadd.f32 %v5168_v34, %v1681_v15  ;;  %v1902_v48 = vmax.f32 %v1690_v46, 0.0 }
 0x1fe   : > { %v4126_v5 = vpop.f32.mrf.mxu0 }
 0x1ff   : > { %v1693_v31 = vadd.f32 %v4126_v5, %v5168_v34  ;;  %4199 = vmatprep.mubr.bf16.mxu1 %v1956_v61  ;;  %v1900_v62 = vmax.f32 %v1682_v11, 0.0 }
 0x200   : > { %v1684_v10 = vpop.f32.mrf.mxu0  ;;  %4200 = vmatmul.mubr.bf16.gmra.mxu1 %v1957_v49 }
 0x201   : > { %v1685_v38 = vadd.f32 %v5168_v34, %v1684_v10  ;;  %v1903_v16 = vmax.f32 %v1693_v31, 0.0 }
 0x202   : > { %v4129_v22 = vpop.f32.mrf.mxu0 }
 0x203   : > { %v1901_v9 = vmax.f32 %v1685_v38, 0.0  ;;  %v1959_v50 = vpack.c.bf16 %v1903_v16, %v1902_v48  ;;  %v1706_v35 = vadd.f32 %v4129_v22, %v5168_v34 }
 0x204   : > { %v1697_v2 = vpop.f32.mrf.mxu0 }
 0x205   : > { %v1958_v7 = vpack.c.bf16 %v1901_v9, %v1900_v62  ;;  %v4133_v20 = vpop.f32.mrf.mxu1  ;;  %v1698_v15 = vadd.f32 %v5168_v34, %v1697_v2  ;;  %v1906_v9 = vmax.f32 %v1706_v35, 0.0  ;;  %v4409_v35 = vld [vmem:[%s5908_s7 + $0x38] sm:$0xff]  }
 0x206   : > { %v4130_v1 = vpop.f32.mrf.mxu0  ;;  %4255 = vmatprep.subr.bf16.mxu0 %v4409_v35 }
 0x207   : > { %v1709_v61 = vadd.f32 %v4130_v1, %v5168_v34  ;;  %v1713_v5 = vpop.f32.mrf.mxu1  ;;  %4203 = vmatprep.mubr.bf16.mxu1 %v1958_v7  ;;  %v1904_v38 = vmax.f32 %v1698_v15, 0.0  ;;  %4256 = vmatpush3.bf16.msra.mxu0 %v4409_v35 }
 0x208   : > { %v1700_v49 = vpop.f32.mrf.mxu0  ;;  %4204 = vmatmul.mubr.bf16.gmra.mxu1 %v1959_v50  ;;  %v1714_v46 = vadd.f32 %v5168_v34, %v1713_v5  ;;  %v1722_v50 = vadd.f32 %v4133_v20, %v5168_v34 }
 0x209   : > { %v1701_v31 = vadd.f32 %v5168_v34, %v1700_v49  ;;  %v4134_v11 = vpop.f32.mrf.mxu1  ;;  %v1907_v10 = vmax.f32 %v1709_v61, 0.0 }
 0x20a   : > { %v1908_v24 = vmax.f32 %v1714_v46, 0.0  ;;  %v1725_v7 = vadd.f32 %v4134_v11, %v5168_v34  ;;  %v1910_v5 = vmax.f32 %v1722_v50, 0.0 }
 0x20b   : > { %v1905_v62 = vmax.f32 %v1701_v31, 0.0  ;;  %v1716_v16 = vpop.f32.mrf.mxu1  ;;  %v1961_v1 = vpack.c.bf16 %v1907_v10, %v1906_v9 }
 0x20c   : > { %v1717_v48 = vadd.f32 %v5168_v34, %v1716_v16  ;;  %v1911_v61 = vmax.f32 %v1725_v7, 0.0 }
 0x20d   : > { %v1960_v2 = vpack.c.bf16 %v1905_v62, %v1904_v38 }
 0x20e   : > { %v1909_v22 = vmax.f32 %v1717_v48, 0.0  ;;  %v1963_v31 = vpack.c.bf16 %v1911_v61, %v1910_v5  ;;  %v4410_v48 = vld [vmem:[%s5908_s7 + $0x30] sm:$0xff]  }
 0x20f   : > { %4207 = vmatprep.mubr.bf16.mxu1 %v1960_v2  ;;  %4257 = vmatprep.subr.bf16.mxu0 %v4410_v48 }
 0x210   : > { %4208 = vmatmul.mubr.bf16.gmra.mxu1 %v1961_v1  ;;  %v1962_v49 = vpack.c.bf16 %v1909_v22, %v1908_v24  ;;  %4258 = vmatpush3.bf16.msra.mxu0 %v4410_v48  ;;  %v4412_v22 = vld [vmem:[%s5908_s7 + $0x20] sm:$0xff]   ;;  %v4415_v48 = vld [vmem:[%s5908_s7 + $0x8] sm:$0xff]  }
 0x212   : > { %4211 = vmatprep.mubr.bf16.mxu1 %v1962_v49 }
 0x215   : > { %v4137_v15 = vpop.f32.mrf.mxu1 }
 0x216   : > { %v1738_v20 = vadd.f32 %v4137_v15, %v5168_v34 }
 0x217   : > { %v1729_v56 = vpop.f32.mrf.mxu1 }
 0x218   : > { %4212 = vmatmul.mubr.bf16.gmra.mxu1 %v1963_v31  ;;  %v1730_v11 = vadd.f32 %v5168_v34, %v1729_v56  ;;  %v4411_v56 = vld [vmem:[%s5908_s7 + $0x28] sm:$0xff]   ;;  %v1914_v2 = vmax.f32 %v1738_v20, 0.0 }
 0x219   : > { %v4138_v10 = vpop.f32.mrf.mxu1  ;;  %4259 = vmatprep.subr.bf16.mxu0 %v4411_v56 }
 0x21a   : > { %v1741_v46 = vadd.f32 %v4138_v10, %v5168_v34  ;;  %v1912_v16 = vmax.f32 %v1730_v11, 0.0  ;;  %4260 = vmatpush3.bf16.msra.mxu0 %v4411_v56  ;;  %v4413_v11 = vld [vmem:[%s5908_s7 + $0x18] sm:$0xff]  }
 0x21b   : > { %v1732_v24 = vpop.f32.mrf.mxu1  ;;  %4261 = vmatprep.subr.bf16.mxu0 %v4412_v22 }
 0x21c   : > { %v1733_v38 = vadd.f32 %v5168_v34, %v1732_v24  ;;  %v1915_v62 = vmax.f32 %v1741_v46, 0.0 }
 0x21e   : > { %v1913_v9 = vmax.f32 %v1733_v38, 0.0  ;;  %v1965_v7 = vpack.c.bf16 %v1915_v62, %v1914_v2  ;;  %4262 = vmatpush3.bf16.msra.mxu0 %v4412_v22  ;;  %v4414_v38 = vld [vmem:[%s5908_s7 + $0x10] sm:$0xff]  }
 0x21f   : > { %4263 = vmatprep.subr.bf16.mxu0 %v4413_v11 }
 0x220   : > { %v1964_v1 = vpack.c.bf16 %v1913_v9, %v1912_v16 }
 0x222   : > { %4215 = vmatprep.mubr.bf16.mxu1 %v1964_v1  ;;  %4264 = vmatpush3.bf16.msra.mxu0 %v4413_v11  ;;  %v4416_v1 = vld [vmem:[%s5908_s7] sm:$0xff]  }
 0x223   : > { %4216 = vmatmul.mubr.bf16.gmra.mxu1 %v1965_v7  ;;  %4265 = vmatprep.subr.bf16.mxu0 %v4414_v38 }
 0x225   : > { %v4141_v50 = vpop.f32.mrf.mxu1 }
 0x226   : > { %v1754_v31 = vadd.f32 %v4141_v50, %v5168_v34  ;;  %4266 = vmatpush3.bf16.msra.mxu0 %v4414_v38 }
 0x227   : > { %v1745_v49 = vpop.f32.mrf.mxu1  ;;  %4267 = vmatprep.subr.bf16.mxu0 %v4415_v48 }
 0x228   : > { %v1746_v5 = vadd.f32 %v5168_v34, %v1745_v49  ;;  %v1918_v62 = vmax.f32 %v1754_v31, 0.0 }
 0x229   : > { %v4142_v61 = vpop.f32.mrf.mxu1 }
 0x22a   : > { %v1757_v15 = vadd.f32 %v4142_v61, %v5168_v34  ;;  %v1916_v20 = vmax.f32 %v1746_v5, 0.0  ;;  %4268 = vmatpush3.bf16.msra.mxu0 %v4415_v48 }
 0x22b   : > { %v1748_v35 = vpop.f32.mrf.mxu1  ;;  %4269 = vmatprep.subr.bf16.mxu0 %v4416_v1 }
 0x22c   : > { %v1749_v10 = vadd.f32 %v5168_v34, %v1748_v35  ;;  %v1919_v46 = vmax.f32 %v1757_v15, 0.0 }
 0x22e   : > { %v1917_v24 = vmax.f32 %v1749_v10, 0.0  ;;  %v1967_v9 = vpack.c.bf16 %v1919_v46, %v1918_v62  ;;  %4270 = vmatpush3.bf16.msra.mxu0 %v4416_v1 }
 0x230   : > { %v1966_v16 = vpack.c.bf16 %v1917_v24, %v1916_v20 }
 0x232   : > { %4219 = vmatprep.mubr.bf16.mxu1 %v1966_v16 }
 0x233   : > { %4220 = vmatmul.mubr.bf16.gmra.mxu1 %v1967_v9 }
 0x235   : > { %v4145_v56 = vpop.f32.mrf.mxu1 }
 0x236   : > { %v1770_v49 = vadd.f32 %v4145_v56, %v5168_v34 }
 0x237   : > { %v1761_v2 = vpop.f32.mrf.mxu1 }
 0x238   : > { %v1762_v22 = vadd.f32 %v5168_v34, %v1761_v2  ;;  %v1922_v10 = vmax.f32 %v1770_v49, 0.0 }
 0x239   : > { %v4146_v7 = vpop.f32.mrf.mxu1 }
 0x23a   : > { %v1773_v50 = vadd.f32 %v4146_v7, %v5168_v34  ;;  %v1920_v31 = vmax.f32 %v1762_v22, 0.0 }
 0x23b   : > { %v1764_v61 = vpop.f32.mrf.mxu1 }
 0x23c   : > { %v1765_v5 = vadd.f32 %v5168_v34, %v1764_v61  ;;  %v1923_v15 = vmax.f32 %v1773_v50, 0.0 }
 0x23e   : > { %v1921_v35 = vmax.f32 %v1765_v5, 0.0  ;;  %v1969_v46 = vpack.c.bf16 %v1923_v15, %v1922_v10 }
 0x240   : > { %v1968_v11 = vpack.c.bf16 %v1921_v35, %v1920_v31 }
 0x242   : > { %4223 = vmatprep.mubr.bf16.mxu1 %v1968_v11 }
 0x243   : > { %4224 = vmatmul.mubr.bf16.gmra.mxu1 %v1969_v46 }
 0x245   : > { %v4149_v20 = vpop.f32.mrf.mxu1 }
 0x246   : > { %v1786_v9 = vadd.f32 %v4149_v20, %v5168_v34 }
 0x247   : > { %v1777_v24 = vpop.f32.mrf.mxu1 }
 0x248   : > { %v1778_v62 = vadd.f32 %v5168_v34, %v1777_v24  ;;  %v1926_v22 = vmax.f32 %v1786_v9, 0.0 }
 0x249   : > { %v4150_v38 = vpop.f32.mrf.mxu1 }
 0x24a   : > { %v1789_v16 = vadd.f32 %v4150_v38, %v5168_v34  ;;  %v1924_v1 = vmax.f32 %v1778_v62, 0.0 }
 0x24b   : > { %v1780_v48 = vpop.f32.mrf.mxu1 }
 0x24c   : > { %v1781_v56 = vadd.f32 %v5168_v34, %v1780_v48  ;;  %v1927_v2 = vmax.f32 %v1789_v16, 0.0 }
 0x24e   : > { %v1925_v7 = vmax.f32 %v1781_v56, 0.0  ;;  %v1971_v49 = vpack.c.bf16 %v1927_v2, %v1926_v22 }
 0x250   : > { %v1970_v50 = vpack.c.bf16 %v1925_v7, %v1924_v1 }
 0x252   : > { %4227 = vmatprep.mubr.bf16.mxu1 %v1970_v50 }
 0x253   : > { %4228 = vmatmul.mubr.bf16.gmra.mxu1 %v1971_v49 }
 0x255   : > { %v4153_v61 = vpop.f32.mrf.mxu1 }
 0x256   : > { %v1802_v10 = vadd.f32 %v4153_v61, %v5168_v34 }
 0x257   : > { %v1793_v5 = vpop.f32.mrf.mxu1 }
 0x258   : > { %v1794_v31 = vadd.f32 %v5168_v34, %v1793_v5  ;;  %v1930_v62 = vmax.f32 %v1802_v10, 0.0 }
 0x259   : > { %v4154_v15 = vpop.f32.mrf.mxu1 }
 0x25a   : > { %v1805_v35 = vadd.f32 %v4154_v15, %v5168_v34  ;;  %v1928_v24 = vmax.f32 %v1794_v31, 0.0 }
 0x25b   : > { %v1796_v11 = vpop.f32.mrf.mxu1 }
 0x25c   : > { %v1797_v46 = vadd.f32 %v5168_v34, %v1796_v11  ;;  %v1931_v20 = vmax.f32 %v1805_v35, 0.0 }
 0x25e   : > { %v1929_v38 = vmax.f32 %v1797_v46, 0.0  ;;  %v1973_v9 = vpack.c.bf16 %v1931_v20, %v1930_v62 }
 0x260   : > { %v1972_v16 = vpack.c.bf16 %v1929_v38, %v1928_v24 }
 0x262   : > { %4231 = vmatprep.mubr.bf16.mxu1 %v1972_v16 }
 0x263   : > { %4232 = vmatmul.mubr.bf16.gmra.mxu1 %v1973_v9 }
 0x265   : > { %v4157_v48 = vpop.f32.mrf.mxu1 }
 0x266   : > { %v1818_v22 = vadd.f32 %v4157_v48, %v5168_v34 }
 0x267   : > { %v1809_v56 = vpop.f32.mrf.mxu1 }
 0x268   : > { %v1810_v1 = vadd.f32 %v5168_v34, %v1809_v56  ;;  %v1934_v31 = vmax.f32 %v1818_v22, 0.0 }
 0x269   : > { %v4158_v2 = vpop.f32.mrf.mxu1 }
 0x26a   : > { %v1821_v7 = vadd.f32 %v4158_v2, %v5168_v34  ;;  %v1932_v5 = vmax.f32 %v1810_v1, 0.0 }
 0x26b   : > { %v1812_v50 = vpop.f32.mrf.mxu1 }
 0x26c   : > { %v1813_v49 = vadd.f32 %v5168_v34, %v1812_v50  ;;  %v1935_v61 = vmax.f32 %v1821_v7, 0.0 }
 0x26e   : > { %v1933_v15 = vmax.f32 %v1813_v49, 0.0  ;;  %v1975_v10 = vpack.c.bf16 %v1935_v61, %v1934_v31 }
 0x270   : > { %v1974_v35 = vpack.c.bf16 %v1933_v15, %v1932_v5 }
 0x272   : > { %4235 = vmatprep.mubr.bf16.mxu1 %v1974_v35 }
 0x273   : > { %4236 = vmatmul.mubr.bf16.gmra.mxu1 %v1975_v10 }
 0x275   : > { %v4161_v11 = vpop.f32.mrf.mxu1 }
 0x276   : > { %v1834_v62 = vadd.f32 %v4161_v11, %v5168_v34  ;;  %v4417_v11 = vld [vmem:[%s5910_s9 + $0x70] ss:$8 sps:$4 sm:$0xff]  }
 0x277   : > { %v1825_v46 = vpop.f32.mrf.mxu1 }
 0x278   : > { %v1826_v24 = vadd.f32 %v5168_v34, %v1825_v46  ;;  %v1938_v1 = vmax.f32 %v1834_v62, 0.0  ;;  %v4419_v46 = vld [vmem:[%s5910_s9 + $0x74] ss:$8 sps:$4 sm:$0xff]  }
 0x279   : > { %v4162_v20 = vpop.f32.mrf.mxu1  ;;  %3132 = vmatprep.subr.bf16.mxu1 %v4419_v46 }
 0x27a   : > { %v1837_v38 = vadd.f32 %v4162_v20, %v5168_v34  ;;  %v1936_v56 = vmax.f32 %v1826_v24, 0.0  ;;  %3133 = vmatpush1.bf16.msra.mxu1 %v4417_v11 }
 0x27b   : > { %v1828_v16 = vpop.f32.mrf.mxu1 }
 0x27c   : > { %v1829_v9 = vadd.f32 %v5168_v34, %v1828_v16  ;;  %v1939_v48 = vmax.f32 %v1837_v38, 0.0 }
 0x27e   : > { %v1937_v2 = vmax.f32 %v1829_v9, 0.0  ;;  %v1977_v22 = vpack.c.bf16 %v1939_v48, %v1938_v1 }
 0x280   : > { %v1976_v7 = vpack.c.bf16 %v1937_v2, %v1936_v56 }
 0x282   : > { %4239 = vmatprep.mubr.bf16.mxu1 %v1976_v7 }
 0x283   : > { %4240 = vmatmul.mubr.bf16.gmra.mxu1 %v1977_v22 }
 0x285   : > { %v4165_v50 = vpop.f32.mrf.mxu1 }
 0x286   : > { %v1850_v31 = vadd.f32 %v4165_v50, %v5168_v34 }
 0x287   : > { %v1841_v49 = vpop.f32.mrf.mxu1 }
 0x288   : > { %v1842_v5 = vadd.f32 %v5168_v34, %v1841_v49  ;;  %v1942_v62 = vmax.f32 %v1850_v31, 0.0 }
 0x289   : > { %v4166_v61 = vpop.f32.mrf.mxu1 }
 0x28a   : > { %v1853_v15 = vadd.f32 %v4166_v61, %v5168_v34  ;;  %v1940_v24 = vmax.f32 %v1842_v5, 0.0  ;;  %v4420_v61 = vld [vmem:[%s5910_s9 + $0x60] ss:$8 sps:$4 sm:$0xff]   ;;  %v4422_v5 = vld [vmem:[%s5910_s9 + $0x64] ss:$8 sps:$4 sm:$0xff]  }
 0x28b   : > { %v1844_v35 = vpop.f32.mrf.mxu1  ;;  %3134 = vmatprep.subr.bf16.mxu1 %v4422_v5 }
 0x28c   : > { %v1845_v10 = vadd.f32 %v5168_v34, %v1844_v35  ;;  %v1943_v20 = vmax.f32 %v1853_v15, 0.0  ;;  %3135 = vmatpush1.bf16.msra.mxu1 %v4420_v61 }
 0x28e   : > { %v1941_v38 = vmax.f32 %v1845_v10, 0.0  ;;  %v1979_v9 = vpack.c.bf16 %v1943_v20, %v1942_v62 }
 0x290   : > { %v1978_v16 = vpack.c.bf16 %v1941_v38, %v1940_v24 }
 0x292   : > { %4243 = vmatprep.mubr.bf16.mxu1 %v1978_v16 }
 0x293   : > { %4244 = vmatmul.mubr.bf16.gmra.mxu1 %v1979_v9 }
 0x295   : > { %v4169_v48 = vpop.f32.mrf.mxu1 }
 0x296   : > { %v1866_v22 = vadd.f32 %v4169_v48, %v5168_v34 }
 0x297   : > { %v1857_v56 = vpop.f32.mrf.mxu1 }
 0x298   : > { %v1858_v1 = vadd.f32 %v5168_v34, %v1857_v56  ;;  %v1946_v10 = vmax.f32 %v1866_v22, 0.0 }
 0x299   : > { %v4170_v2 = vpop.f32.mrf.mxu1 }
 0x29a   : > { %v1869_v7 = vadd.f32 %v4170_v2, %v5168_v34  ;;  %v1944_v31 = vmax.f32 %v1858_v1, 0.0  ;;  %v4423_v2 = vld [vmem:[%s5910_s9 + $0x50] ss:$8 sps:$4 sm:$0xff]   ;;  %v4425_v1 = vld [vmem:[%s5910_s9 + $0x54] ss:$8 sps:$4 sm:$0xff]  }
 0x29b   : > { %v1860_v50 = vpop.f32.mrf.mxu1  ;;  %3136 = vmatprep.subr.bf16.mxu1 %v4425_v1 }
 0x29c   : > { %v1861_v49 = vadd.f32 %v5168_v34, %v1860_v50  ;;  %v1947_v15 = vmax.f32 %v1869_v7, 0.0  ;;  %3137 = vmatpush1.bf16.msra.mxu1 %v4423_v2 }
 0x29e   : > { %v1945_v35 = vmax.f32 %v1861_v49, 0.0  ;;  %v1981_v46 = vpack.c.bf16 %v1947_v15, %v1946_v10  ;;  %v5949_v10 = vmov 0  }
 0x2a0   : > { %v1980_v11 = vpack.c.bf16 %v1945_v35, %v1944_v31 }
 0x2a2   : > { %4247 = vmatprep.mubr.bf16.mxu1 %v1980_v11 }
 0x2a3   : > { %4248 = vmatmul.mubr.bf16.gmra.mxu1 %v1981_v46 }
 0x2a5   : > { %v4173_v20 = vpop.f32.mrf.mxu1 }
 0x2a6   : > { %v1882_v9 = vadd.f32 %v4173_v20, %v5168_v34 }
 0x2a7   : > { %v1873_v24 = vpop.f32.mrf.mxu1 }
 0x2a8   : > { %v1874_v62 = vadd.f32 %v5168_v34, %v1873_v24  ;;  %v1950_v49 = vmax.f32 %v1882_v9, 0.0 }
 0x2a9   : > { %v4174_v38 = vpop.f32.mrf.mxu1 }
 0x2aa   : > { %v1885_v16 = vadd.f32 %v4174_v38, %v5168_v34  ;;  %v1948_v22 = vmax.f32 %v1874_v62, 0.0 }
 0x2ab   : > { %v1876_v48 = vpop.f32.mrf.mxu1 }
 0x2ac   : > { %v1877_v56 = vadd.f32 %v5168_v34, %v1876_v48  ;;  %v1951_v7 = vmax.f32 %v1885_v16, 0.0  ;;  %v5279_v34 = vld [vmem:[%s5907_s6] ss:$0 sm:$0xff] }
 0x2ae   : > { %v1949_v50 = vmax.f32 %v1877_v56, 0.0  ;;  %v1983_v15 = vpack.c.bf16 %v1951_v7, %v1950_v49  ;;  %v4428_v49 = vld [vmem:[%s5910_s9 + $0x44] ss:$8 sps:$4 sm:$0xff]  }
 0x2af   : > { %3138 = vmatprep.subr.bf16.mxu1 %v4428_v49 }
 0x2b0   : > { %v4193_v61 = vpop.f32.mrf.mxu1  ;;  %v1982_v5 = vpack.c.bf16 %v1949_v50, %v1948_v22  ;;  %v4426_v50 = vld [vmem:[%s5910_s9 + $0x40] ss:$8 sps:$4 sm:$0xff]  }
 0x2b1   : > { %v2098_v20 = vadd.f32 %v4193_v61, %v5279_v34  ;;  %3139 = vmatpush1.bf16.msra.mxu1 %v4426_v50 }
 0x2b2   : > { %v2089_v31 = vpop.f32.mrf.mxu1  ;;  %4251 = vmatprep.mubr.bf16.mxu1 %v1982_v5 }
 0x2b3   : > { %4252 = vmatmul.mubr.bf16.gmra.mxu1 %v1983_v15  ;;  %v2090_v11 = vadd.f32 %v5279_v34, %v2089_v31  ;;  %v2346_v56 = vmax.f32 %v2098_v20, 0.0 }
 0x2b4   : > { %v4194_v35 = vpop.f32.mrf.mxu1  ;;  %3164 = vmatprep.mubr.bf16.mxu1 %v5949_v10 }
 0x2b5   : > { %v2101_v46 = vadd.f32 %v4194_v35, %v5279_v34  ;;  %v2344_v9 = vmax.f32 %v2090_v11, 0.0 }
 0x2b6   : > { %v2092_v24 = vpop.f32.mrf.mxu1 }
 0x2b7   : > { %v2093_v38 = vadd.f32 %v5279_v34, %v2092_v24  ;;  %v2347_v62 = vmax.f32 %v2101_v46, 0.0 }
 0x2b8   : > { %v4197_v16 = vpop.f32.mrf.mxu1 }
 0x2b9   : > { %v2345_v48 = vmax.f32 %v2093_v38, 0.0  ;;  %v2409_v7 = vpack.c.bf16 %v2347_v62, %v2346_v56  ;;  %v2114_v15 = vadd.f32 %v4197_v16, %v5279_v34 }
 0x2ba   : > { %v2105_v2 = vpop.f32.mrf.mxu1 }
 0x2bb   : > { %v2408_v1 = vpack.c.bf16 %v2345_v48, %v2344_v9  ;;  %v2106_v61 = vadd.f32 %v5279_v34, %v2105_v2  ;;  %v2350_v38 = vmax.f32 %v2114_v15, 0.0 }
 0x2bc   : > { %v4198_v22 = vpop.f32.mrf.mxu1 }
 0x2bd   : > { %v2117_v5 = vadd.f32 %v4198_v22, %v5279_v34  ;;  %4271 = vmatprep.mubr.bf16.mxu0 %v2408_v1  ;;  %v2348_v20 = vmax.f32 %v2106_v61, 0.0 }
 0x2be   : > { %v2108_v31 = vpop.f32.mrf.mxu1  ;;  %4272 = vmatmul.mubr.bf16.vlgmr.msra.gmra.mxu0 %v2409_v7 }
 0x2bf   : > { %v2109_v35 = vadd.f32 %v5279_v34, %v2108_v31  ;;  %v2351_v11 = vmax.f32 %v2117_v5, 0.0 }
 0x2c0   : > { %v4201_v46 = vpop.f32.mrf.mxu1 }
 0x2c1   : > { %v2349_v24 = vmax.f32 %v2109_v35, 0.0  ;;  %v2411_v48 = vpack.c.bf16 %v2351_v11, %v2350_v38  ;;  %v2130_v16 = vadd.f32 %v4201_v46, %v5279_v34  ;;  %v4431_v46 = vld [vmem:[%s5910_s9 + $0x34] ss:$8 sps:$4 sm:$0xff]  }
 0x2c2   : > { %v2121_v62 = vpop.f32.mrf.mxu1  ;;  %3140 = vmatprep.subr.bf16.mxu1 %v4431_v46 }
 0x2c3   : > { %v2410_v9 = vpack.c.bf16 %v2349_v24, %v2348_v20  ;;  %v2122_v2 = vadd.f32 %v5279_v34, %v2121_v62  ;;  %v2354_v15 = vmax.f32 %v2130_v16, 0.0  ;;  %v4429_v24 = vld [vmem:[%s5910_s9 + $0x30] ss:$8 sps:$4 sm:$0xff]  }
 0x2c4   : > { %v4202_v56 = vpop.f32.mrf.mxu1  ;;  %3141 = vmatpush1.bf16.msra.mxu1 %v4429_v24 }
 0x2c5   : > { %v2133_v1 = vadd.f32 %v4202_v56, %v5279_v34  ;;  %4275 = vmatprep.mubr.bf16.mxu0 %v2410_v9  ;;  %v2352_v61 = vmax.f32 %v2122_v2, 0.0 }
 0x2c6   : > { %v2124_v7 = vpop.f32.mrf.mxu1  ;;  %4276 = vmatmul.mubr.bf16.gmra.mxu0 %v2411_v48 }
 0x2c7   : > { %v2125_v22 = vadd.f32 %v5279_v34, %v2124_v7  ;;  %v2355_v50 = vmax.f32 %v2133_v1, 0.0 }
 0x2c8   : > { %v4205_v49 = vpop.f32.mrf.mxu1 }
 0x2c9   : > { %v2353_v5 = vmax.f32 %v2125_v22, 0.0  ;;  %v2413_v11 = vpack.c.bf16 %v2355_v50, %v2354_v15  ;;  %v2146_v9 = vadd.f32 %v4205_v49, %v5279_v34 }
 0x2ca   : > { %v2137_v31 = vpop.f32.mrf.mxu1 }
 0x2cb   : > { %v2412_v35 = vpack.c.bf16 %v2353_v5, %v2352_v61  ;;  %v2138_v38 = vadd.f32 %v5279_v34, %v2137_v31  ;;  %v2358_v22 = vmax.f32 %v2146_v9, 0.0 }
 0x2cc   : > { %v4206_v20 = vpop.f32.mrf.mxu1 }
 0x2cd   : > { %v2149_v62 = vadd.f32 %v4206_v20, %v5279_v34  ;;  %4279 = vmatprep.mubr.bf16.mxu0 %v2412_v35  ;;  %v2356_v16 = vmax.f32 %v2138_v38, 0.0 }
 0x2ce   : > { %v2140_v48 = vpop.f32.mrf.mxu1  ;;  %4280 = vmatmul.mubr.bf16.gmra.mxu0 %v2413_v11 }
 0x2cf   : > { %v2141_v56 = vadd.f32 %v5279_v34, %v2140_v48  ;;  %v2359_v2 = vmax.f32 %v2149_v62, 0.0 }
 0x2d0   : > { %v4209_v1 = vpop.f32.mrf.mxu1 }
 0x2d1   : > { %v2357_v7 = vmax.f32 %v2141_v56, 0.0  ;;  %v2415_v5 = vpack.c.bf16 %v2359_v2, %v2358_v22  ;;  %v2162_v49 = vadd.f32 %v4209_v1, %v5279_v34  ;;  %v4434_v1 = vld [vmem:[%s5910_s9 + $0x24] ss:$8 sps:$4 sm:$0xff]  }
 0x2d2   : > { %v2153_v50 = vpop.f32.mrf.mxu1  ;;  %3142 = vmatprep.subr.bf16.mxu1 %v4434_v1 }
 0x2d3   : > { %v2414_v61 = vpack.c.bf16 %v2357_v7, %v2356_v16  ;;  %v2154_v31 = vadd.f32 %v5279_v34, %v2153_v50  ;;  %v2362_v9 = vmax.f32 %v2162_v49, 0.0  ;;  %v4432_v7 = vld [vmem:[%s5910_s9 + $0x20] ss:$8 sps:$4 sm:$0xff]  }
 0x2d4   : > { %v4210_v15 = vpop.f32.mrf.mxu1  ;;  %3143 = vmatpush1.bf16.msra.mxu1 %v4432_v7 }
 0x2d5   : > { %v2165_v35 = vadd.f32 %v4210_v15, %v5279_v34  ;;  %4283 = vmatprep.mubr.bf16.mxu0 %v2414_v61  ;;  %v2360_v38 = vmax.f32 %v2154_v31, 0.0 }
 0x2d6   : > { %v2156_v11 = vpop.f32.mrf.mxu1  ;;  %4284 = vmatmul.mubr.bf16.gmra.mxu0 %v2415_v5 }
 0x2d7   : > { %v2157_v20 = vadd.f32 %v5279_v34, %v2156_v11  ;;  %v2363_v24 = vmax.f32 %v2165_v35, 0.0 }
 0x2d8   : > { %v4213_v46 = vpop.f32.mrf.mxu1 }
 0x2d9   : > { %v2361_v62 = vmax.f32 %v2157_v20, 0.0  ;;  %v2417_v2 = vpack.c.bf16 %v2363_v24, %v2362_v9  ;;  %v2178_v61 = vadd.f32 %v4213_v46, %v5279_v34 }
 0x2da   : > { %v2169_v48 = vpop.f32.mrf.mxu1 }
 0x2db   : > { %v2416_v56 = vpack.c.bf16 %v2361_v62, %v2360_v38  ;;  %v2170_v22 = vadd.f32 %v5279_v34, %v2169_v48  ;;  %v2366_v11 = vmax.f32 %v2178_v61, 0.0  ;;  %v4437_v61 = vld [vmem:[%s5910_s9 + $0x14] ss:$8 sps:$4 sm:$0xff]  }
 0x2dc   : > { %v4214_v16 = vpop.f32.mrf.mxu1  ;;  %3144 = vmatprep.subr.bf16.mxu1 %v4437_v61 }
 0x2dd   : > { %v2181_v50 = vadd.f32 %v4214_v16, %v5279_v34  ;;  %4287 = vmatprep.mubr.bf16.mxu0 %v2416_v56  ;;  %v2364_v35 = vmax.f32 %v2170_v22, 0.0 }
 0x2de   : > { %v2172_v5 = vpop.f32.mrf.mxu1  ;;  %4288 = vmatmul.mubr.bf16.gmra.mxu0 %v2417_v2 }
 0x2df   : > { %v2173_v15 = vadd.f32 %v5279_v34, %v2172_v5  ;;  %v2367_v31 = vmax.f32 %v2181_v50, 0.0  ;;  %v4435_v50 = vld [vmem:[%s5910_s9 + $0x10] ss:$8 sps:$4 sm:$0xff]  }
 0x2e0   : > { %3145 = vmatpush1.bf16.msra.mxu1 %v4435_v50 }
 0x2e1   : > { %v2365_v49 = vmax.f32 %v2173_v15, 0.0  ;;  %v2419_v38 = vpack.c.bf16 %v2367_v31, %v2366_v11 }
 0x2e3   : > { %v4217_v20 = vpop.f32.mrf.mxu1  ;;  %v2418_v24 = vpack.c.bf16 %v2365_v49, %v2364_v35 }
 0x2e4   : > { %v2194_v56 = vadd.f32 %v4217_v20, %v5279_v34 }
 0x2e5   : > { %v2185_v62 = vpop.f32.mrf.mxu1  ;;  %4291 = vmatprep.mubr.bf16.mxu0 %v2418_v24 }
 0x2e6   : > { %4292 = vmatmul.mubr.bf16.gmra.mxu0 %v2419_v38  ;;  %v2186_v48 = vadd.f32 %v5279_v34, %v2185_v62  ;;  %v2370_v5 = vmax.f32 %v2194_v56, 0.0 }
 0x2e7   : > { %v4218_v9 = vpop.f32.mrf.mxu1 }
 0x2e8   : > { %v2197_v46 = vadd.f32 %v4218_v9, %v5279_v34  ;;  %v2368_v1 = vmax.f32 %v2186_v48, 0.0 }
 0x2e9   : > { %v2188_v2 = vpop.f32.mrf.mxu1 }
 0x2ea   : > { %v2189_v16 = vadd.f32 %v5279_v34, %v2188_v2  ;;  %v2371_v7 = vmax.f32 %v2197_v46, 0.0  ;;  %v4438_v2 = vld [vmem:[%s5910_s9] ss:$8 sps:$4 sm:$0xff]  }
 0x2ec   : > { %v2369_v22 = vmax.f32 %v2189_v16, 0.0  ;;  %v2421_v31 = vpack.c.bf16 %v2371_v7, %v2370_v5  ;;  %v4440_v16 = vld [vmem:[%s5910_s9 + $0x4] ss:$8 sps:$4 sm:$0xff]  }
 0x2ed   : > { %3146 = vmatprep.subr.bf16.mxu1 %v4440_v16 }
 0x2ee   : > { %v2420_v15 = vpack.c.bf16 %v2369_v22, %v2368_v1  ;;  %3147 = vmatpush1.bf16.msra.mxu1 %v4438_v2 }
 0x2f0   : > { %4295 = vmatprep.mubr.bf16.mxu0 %v2420_v15 }
 0x2f1   : > { %4296 = vmatmul.mubr.bf16.gmra.mxu0 %v2421_v31 }
 0x2f3   : > { %v4221_v35 = vpop.f32.mrf.mxu1 }
 0x2f4   : > { %v2210_v38 = vadd.f32 %v4221_v35, %v5279_v34 }
 0x2f5   : > { %v2201_v49 = vpop.f32.mrf.mxu1 }
 0x2f6   : > { %v2202_v20 = vadd.f32 %v5279_v34, %v2201_v49  ;;  %v2374_v7 = vmax.f32 %v2210_v38, 0.0 }
 0x2f7   : > { %v4222_v11 = vpop.f32.mrf.mxu1 }
 0x2f8   : > { %v2213_v24 = vadd.f32 %v4222_v11, %v5279_v34  ;;  %v2372_v46 = vmax.f32 %v2202_v20, 0.0 }
 0x2f9   : > { %v2204_v62 = vpop.f32.mrf.mxu1 }
 0x2fa   : > { %v2205_v9 = vadd.f32 %v5279_v34, %v2204_v62  ;;  %v2375_v48 = vmax.f32 %v2213_v24, 0.0 }
 0x2fc   : > { %v2373_v56 = vmax.f32 %v2205_v9, 0.0  ;;  %v2423_v22 = vpack.c.bf16 %v2375_v48, %v2374_v7 }
 0x2fe   : > { %v2422_v1 = vpack.c.bf16 %v2373_v56, %v2372_v46 }
 0x300   : > { %4299 = vmatprep.mubr.bf16.mxu0 %v2422_v1 }
 0x301   : > { %4300 = vmatmul.mubr.bf16.gmra.mxu0 %v2423_v22 }
 0x303   : > { %v4225_v50 = vpop.f32.mrf.mxu1 }
 0x304   : > { %v2226_v35 = vadd.f32 %v4225_v50, %v5279_v34 }
 0x305   : > { %v2217_v61 = vpop.f32.mrf.mxu1 }
 0x306   : > { %v2218_v15 = vadd.f32 %v5279_v34, %v2217_v61  ;;  %v2378_v62 = vmax.f32 %v2226_v35, 0.0 }
 0x307   : > { %v4226_v5 = vpop.f32.mrf.mxu1 }
 0x308   : > { %v2229_v31 = vadd.f32 %v4226_v5, %v5279_v34  ;;  %v2376_v24 = vmax.f32 %v2218_v15, 0.0 }
 0x309   : > { %v2220_v49 = vpop.f32.mrf.mxu1 }
 0x30a   : > { %v2221_v11 = vadd.f32 %v5279_v34, %v2220_v49  ;;  %v2379_v20 = vmax.f32 %v2229_v31, 0.0 }
 0x30c   : > { %v2377_v38 = vmax.f32 %v2221_v11, 0.0  ;;  %v2425_v48 = vpack.c.bf16 %v2379_v20, %v2378_v62 }
 0x30e   : > { %v2424_v9 = vpack.c.bf16 %v2377_v38, %v2376_v24 }
 0x310   : > { %4303 = vmatprep.mubr.bf16.mxu0 %v2424_v9 }
 0x311   : > { %4304 = vmatmul.mubr.bf16.gmra.mxu0 %v2425_v48 }
 0x313   : > { %v4229_v46 = vpop.f32.mrf.mxu1 }
 0x314   : > { %v2242_v1 = vadd.f32 %v4229_v46, %v5279_v34 }
 0x315   : > { %v2233_v56 = vpop.f32.mrf.mxu1 }
 0x316   : > { %v2234_v16 = vadd.f32 %v5279_v34, %v2233_v56  ;;  %v2382_v31 = vmax.f32 %v2242_v1, 0.0 }
 0x317   : > { %v4230_v2 = vpop.f32.mrf.mxu1 }
 0x318   : > { %v2245_v7 = vadd.f32 %v4230_v2, %v5279_v34  ;;  %v2380_v5 = vmax.f32 %v2234_v16, 0.0 }
 0x319   : > { %v2236_v22 = vpop.f32.mrf.mxu1 }
 0x31a   : > { %v2237_v50 = vadd.f32 %v5279_v34, %v2236_v22  ;;  %v2383_v61 = vmax.f32 %v2245_v7, 0.0 }
 0x31c   : > { %v2381_v15 = vmax.f32 %v2237_v50, 0.0  ;;  %v2427_v49 = vpack.c.bf16 %v2383_v61, %v2382_v31 }
 0x31e   : > { %v2426_v35 = vpack.c.bf16 %v2381_v15, %v2380_v5 }
 0x320   : > { %4307 = vmatprep.mubr.bf16.mxu0 %v2426_v35 }
 0x321   : > { %4308 = vmatmul.mubr.bf16.gmra.mxu0 %v2427_v49 }
 0x323   : > { %v4233_v11 = vpop.f32.mrf.mxu1 }
 0x324   : > { %v2258_v9 = vadd.f32 %v4233_v11, %v5279_v34 }
 0x325   : > { %v2249_v20 = vpop.f32.mrf.mxu1 }
 0x326   : > { %v2250_v38 = vadd.f32 %v5279_v34, %v2249_v20  ;;  %v2386_v7 = vmax.f32 %v2258_v9, 0.0 }
 0x327   : > { %v4234_v24 = vpop.f32.mrf.mxu1 }
 0x328   : > { %v2261_v62 = vadd.f32 %v4234_v24, %v5279_v34  ;;  %v2384_v2 = vmax.f32 %v2250_v38, 0.0 }
 0x329   : > { %v2252_v48 = vpop.f32.mrf.mxu1 }
 0x32a   : > { %v2253_v46 = vadd.f32 %v5279_v34, %v2252_v48  ;;  %v2387_v56 = vmax.f32 %v2261_v62, 0.0 }
 0x32c   : > { %v2385_v16 = vmax.f32 %v2253_v46, 0.0  ;;  %v2429_v22 = vpack.c.bf16 %v2387_v56, %v2386_v7 }
 0x32e   : > { %v2428_v1 = vpack.c.bf16 %v2385_v16, %v2384_v2 }
 0x330   : > { %4311 = vmatprep.mubr.bf16.mxu0 %v2428_v1 }
 0x331   : > { %4312 = vmatmul.mubr.bf16.gmra.mxu0 %v2429_v22 }
 0x333   : > { %v4237_v50 = vpop.f32.mrf.mxu1 }
 0x334   : > { %v2274_v35 = vadd.f32 %v4237_v50, %v5279_v34 }
 0x335   : > { %v2265_v61 = vpop.f32.mrf.mxu1 }
 0x336   : > { %v2266_v15 = vadd.f32 %v5279_v34, %v2265_v61  ;;  %v2390_v62 = vmax.f32 %v2274_v35, 0.0 }
 0x337   : > { %v4238_v5 = vpop.f32.mrf.mxu1 }
 0x338   : > { %v2277_v31 = vadd.f32 %v4238_v5, %v5279_v34  ;;  %v2388_v24 = vmax.f32 %v2266_v15, 0.0 }
 0x339   : > { %v2268_v49 = vpop.f32.mrf.mxu1 }
 0x33a   : > { %v2269_v11 = vadd.f32 %v5279_v34, %v2268_v49  ;;  %v2391_v20 = vmax.f32 %v2277_v31, 0.0 }
 0x33c   : > { %v2389_v38 = vmax.f32 %v2269_v11, 0.0  ;;  %v2431_v48 = vpack.c.bf16 %v2391_v20, %v2390_v62 }
 0x33e   : > { %v2430_v9 = vpack.c.bf16 %v2389_v38, %v2388_v24 }
 0x340   : > { %4315 = vmatprep.mubr.bf16.mxu0 %v2430_v9 }
 0x341   : > { %4316 = vmatmul.mubr.bf16.gmra.mxu0 %v2431_v48 }
 0x343   : > { %v4241_v46 = vpop.f32.mrf.mxu1 }
 0x344   : > { %v2290_v1 = vadd.f32 %v4241_v46, %v5279_v34 }
 0x345   : > { %v2281_v56 = vpop.f32.mrf.mxu1 }
 0x346   : > { %v2282_v16 = vadd.f32 %v5279_v34, %v2281_v56  ;;  %v2394_v31 = vmax.f32 %v2290_v1, 0.0 }
 0x347   : > { %v4242_v2 = vpop.f32.mrf.mxu1 }
 0x348   : > { %v2293_v7 = vadd.f32 %v4242_v2, %v5279_v34  ;;  %v2392_v5 = vmax.f32 %v2282_v16, 0.0 }
 0x349   : > { %v2284_v22 = vpop.f32.mrf.mxu1 }
 0x34a   : > { %v2285_v50 = vadd.f32 %v5279_v34, %v2284_v22  ;;  %v2395_v61 = vmax.f32 %v2293_v7, 0.0 }
 0x34c   : > { %v2393_v15 = vmax.f32 %v2285_v50, 0.0  ;;  %v2433_v49 = vpack.c.bf16 %v2395_v61, %v2394_v31 }
 0x34e   : > { %v2432_v35 = vpack.c.bf16 %v2393_v15, %v2392_v5 }
 0x350   : > { %4319 = vmatprep.mubr.bf16.mxu0 %v2432_v35 }
 0x351   : > { %4320 = vmatmul.mubr.bf16.gmra.mxu0 %v2433_v49 }
 0x353   : > { %v4245_v11 = vpop.f32.mrf.mxu1 }
 0x354   : > { %v2306_v9 = vadd.f32 %v4245_v11, %v5279_v34 }
 0x355   : > { %v2297_v20 = vpop.f32.mrf.mxu1 }
 0x356   : > { %v2298_v38 = vadd.f32 %v5279_v34, %v2297_v20  ;;  %v2398_v7 = vmax.f32 %v2306_v9, 0.0 }
 0x357   : > { %v4246_v24 = vpop.f32.mrf.mxu1 }
 0x358   : > { %v2309_v62 = vadd.f32 %v4246_v24, %v5279_v34  ;;  %v2396_v2 = vmax.f32 %v2298_v38, 0.0 }
 0x359   : > { %v2300_v48 = vpop.f32.mrf.mxu1 }
 0x35a   : > { %v2301_v46 = vadd.f32 %v5279_v34, %v2300_v48  ;;  %v2399_v56 = vmax.f32 %v2309_v62, 0.0 }
 0x35c   : > { %v2397_v16 = vmax.f32 %v2301_v46, 0.0  ;;  %v2435_v22 = vpack.c.bf16 %v2399_v56, %v2398_v7 }
 0x35e   : > { %v2434_v1 = vpack.c.bf16 %v2397_v16, %v2396_v2 }
 0x360   : > { %4323 = vmatprep.mubr.bf16.mxu0 %v2434_v1 }
 0x361   : > { %4324 = vmatmul.mubr.bf16.gmra.mxu0 %v2435_v22 }
 0x363   : > { %v4249_v50 = vpop.f32.mrf.mxu1 }
 0x364   : > { %v2322_v35 = vadd.f32 %v4249_v50, %v5279_v34 }
 0x365   : > { %v2313_v61 = vpop.f32.mrf.mxu1 }
 0x366   : > { %v2314_v15 = vadd.f32 %v5279_v34, %v2313_v61  ;;  %v2402_v62 = vmax.f32 %v2322_v35, 0.0 }
 0x367   : > { %v4250_v5 = vpop.f32.mrf.mxu1 }
 0x368   : > { %v2325_v31 = vadd.f32 %v4250_v5, %v5279_v34  ;;  %v2400_v24 = vmax.f32 %v2314_v15, 0.0 }
 0x369   : > { %v2316_v49 = vpop.f32.mrf.mxu1 }
 0x36a   : > { %v2317_v11 = vadd.f32 %v5279_v34, %v2316_v49  ;;  %v2403_v20 = vmax.f32 %v2325_v31, 0.0 }
 0x36c   : > { %v2401_v38 = vmax.f32 %v2317_v11, 0.0  ;;  %v2437_v48 = vpack.c.bf16 %v2403_v20, %v2402_v62  ;;  %v5380_v62 = vld [vmem:[%s5909_s8] ss:$0 sm:$0xff] }
 0x36e   : > { %v2436_v9 = vpack.c.bf16 %v2401_v38, %v2400_v24 }
 0x370   : > { %4327 = vmatprep.mubr.bf16.mxu0 %v2436_v9 }
 0x371   : > { %4328 = vmatmul.mubr.bf16.gmra.mxu0 %v2437_v48 }
 0x373   : > { %v4253_v46 = vpop.f32.mrf.mxu1 }
 0x374   : > { %v2338_v1 = vadd.f32 %v4253_v46, %v5279_v34 }
 0x375   : > { %v2329_v56 = vpop.f32.mrf.mxu1 }
 0x376   : > { %v2330_v16 = vadd.f32 %v5279_v34, %v2329_v56  ;;  %v2406_v31 = vmax.f32 %v2338_v1, 0.0 }
 0x377   : > { %v4254_v2 = vpop.f32.mrf.mxu1 }
 0x378   : > { %v2341_v7 = vadd.f32 %v4254_v2, %v5279_v34  ;;  %v2404_v5 = vmax.f32 %v2330_v16, 0.0 }
 0x379   : > { %v2332_v22 = vpop.f32.mrf.mxu1 }
 0x37a   : > { %v2333_v50 = vadd.f32 %v5279_v34, %v2332_v22  ;;  %v2407_v61 = vmax.f32 %v2341_v7, 0.0 }
 0x37c   : > { %v2405_v15 = vmax.f32 %v2333_v50, 0.0  ;;  %v2439_v11 = vpack.c.bf16 %v2407_v61, %v2406_v31 }
 0x37e   : > { %v4273_v35 = vpop.f32.mrf.mxu0  ;;  %v2438_v49 = vpack.c.bf16 %v2405_v15, %v2404_v5 }
 0x380   : > { %v2538_v20 = vpop.f32.mrf.mxu0  ;;  %4331 = vmatprep.mubr.bf16.mxu0 %v2438_v49 }
 0x381   : > { %v2793_v24 = vadd.f32 %v2538_v20, %v4865_v14  ;;  %4332 = vmatmul.mubr.bf16.gmra.mxu0 %v2439_v11  ;;  %v2795_v14 = vadd.f32 %v4273_v35, %v4881_v27 }
 0x382   : > { %v4274_v38 = vpop.f32.mrf.mxu0 }
 0x383   : > { %v2864_v34 = vadd.f32 %v5380_v62, %v2793_v24  ;;  %v2796_v56 = vadd.f32 %v4274_v38, %v4887_v32  ;;  %v2866_v15 = vadd.f32 %v5380_v62, %v2795_v14 }
 0x384   : > { %v2541_v9 = vpop.f32.mrf.mxu0 }
 0x385   : > { %v2794_v48 = vadd.f32 %v2541_v9, %v4871_v19  ;;  %v2928_v7 = vmax.f32 %v2864_v34, 0.0  ;;  %v2867_v50 = vadd.f32 %v5380_v62, %v2796_v56  ;;  %v2930_v49 = vmax.f32 %v2866_v15, 0.0 }
 0x386   : > { %v4277_v46 = vpop.f32.mrf.mxu0 }
 0x387   : > { %v2865_v2 = vadd.f32 %v5380_v62, %v2794_v48  ;;  %v2931_v19 = vmax.f32 %v2867_v50, 0.0  ;;  %v2799_v48 = vadd.f32 %v4277_v46, %v4913_v53 }
 0x388   : > { %v2554_v16 = vpop.f32.mrf.mxu0 }
 0x389   : > { %v2929_v1 = vmax.f32 %v2865_v2, 0.0  ;;  %v2797_v11 = vadd.f32 %v2554_v16, %v4897_v40  ;;  %v2993_v27 = vpack.c.bf16 %v2931_v19, %v2930_v49  ;;  %v2870_v16 = vadd.f32 %v5380_v62, %v2799_v48 }
 0x38a   : > { %v4278_v22 = vpop.f32.mrf.mxu0 }
 0x38b   : > { %v2992_v61 = vpack.c.bf16 %v2929_v1, %v2928_v7  ;;  %v2868_v24 = vadd.f32 %v5380_v62, %v2797_v11  ;;  %v2800_v38 = vadd.f32 %v4278_v22, %v4919_v58  ;;  %v2934_v50 = vmax.f32 %v2870_v16, 0.0 }
 0x38c   : > { %v2557_v5 = vpop.f32.mrf.mxu0 }
 0x38d   : > { %3165 = vmatmul.mubr.bf16.vlgmr.msra.gmra.mxu1 %v2992_v61  ;;  %v2798_v32 = vadd.f32 %v2557_v5, %v4903_v45  ;;  %v2932_v45 = vmax.f32 %v2868_v24, 0.0  ;;  %v2871_v56 = vadd.f32 %v5380_v62, %v2800_v38 }
 0x38e   : > { %3174 = vmatprep.mubr.bf16.mxu1 %v5949_v10  ;;  %v4281_v31 = vpop.f32.mrf.mxu0 }
 0x38f   : > { %v2869_v35 = vadd.f32 %v5380_v62, %v2798_v32  ;;  %v2935_v14 = vmax.f32 %v2871_v56, 0.0  ;;  %v2803_v32 = vadd.f32 %v4281_v31, %v4943_v23 }
 0x390   : > { %v2570_v20 = vpop.f32.mrf.mxu0 }
 0x391   : > { %v2933_v9 = vmax.f32 %v2869_v35, 0.0  ;;  %v2801_v58 = vadd.f32 %v2570_v20, %v4929_v3  ;;  %v2995_v22 = vpack.c.bf16 %v2935_v14, %v2934_v50 }
 0x392   : > { %v4282_v34 = vpop.f32.mrf.mxu0 }
 0x393   : > { %v2994_v2 = vpack.c.bf16 %v2933_v9, %v2932_v45  ;;  %v2872_v61 = vadd.f32 %v5380_v62, %v2801_v58  ;;  %v2804_v5 = vadd.f32 %v4282_v34, %v4952_v33 }
 0x394   : > { %v2573_v40 = vpop.f32.mrf.mxu0 }
 0x395   : > { %3175 = vmatmul.mubr.bf16.gmra.mxu1 %v2993_v27  ;;  %v2802_v7 = vadd.f32 %v2573_v40, %v4933_v12  ;;  %v2936_v12 = vmax.f32 %v2872_v61, 0.0  ;;  %v2875_v49 = vadd.f32 %v5380_v62, %v2804_v5  ;;  %v2874_v27 = vadd.f32 %v5380_v62, %v2803_v32 }
 0x396   : > { %3184 = vmatprep.mubr.bf16.mxu1 %v5949_v10  ;;  %v4285_v1 = vpop.f32.mrf.mxu0 }
 0x397   : > { %v2873_v53 = vadd.f32 %v5380_v62, %v2802_v7  ;;  %v2939_v35 = vmax.f32 %v2875_v49, 0.0  ;;  %v2938_v38 = vmax.f32 %v2874_v27, 0.0 }
 0x398   : > { %v2586_v46 = vpop.f32.mrf.mxu0 }
 0x399   : > { %v2937_v15 = vmax.f32 %v2873_v53, 0.0  ;;  %v2805_v33 = vadd.f32 %v2586_v46, %v4962_v44  ;;  %v2997_v9 = vpack.c.bf16 %v2939_v35, %v2938_v38 }
 0x39a   : > { %v4286_v19 = vpop.f32.mrf.mxu0 }
 0x39b   : > { %v2996_v11 = vpack.c.bf16 %v2937_v15, %v2936_v12  ;;  %v2876_v34 = vadd.f32 %v5380_v62, %v2805_v33  ;;  %v2808_v48 = vadd.f32 %v4286_v19, %v4985_v37 }
 0x39c   : > { %v2589_v3 = vpop.f32.mrf.mxu0 }
 0x39d   : > { %3185 = vmatmul.mubr.bf16.gmra.mxu1 %v2994_v2  ;;  %v2806_v20 = vadd.f32 %v2589_v3, %v4966_v17  ;;  %v2807_v2 = vadd.f32 %v4285_v1, %v4980_v60  ;;  %v2940_v17 = vmax.f32 %v2876_v34, 0.0  ;;  %v2879_v40 = vadd.f32 %v5380_v62, %v2808_v48 }
 0x39e   : > { %3194 = vmatprep.mubr.bf16.mxu1 %v5949_v10  ;;  %v4289_v24 = vpop.f32.mrf.mxu0 }
 0x39f   : > { %v2877_v23 = vadd.f32 %v5380_v62, %v2806_v20  ;;  %v2878_v14 = vadd.f32 %v5380_v62, %v2807_v2  ;;  %v2943_v7 = vmax.f32 %v2879_v40, 0.0  ;;  %v2811_v19 = vadd.f32 %v4289_v24, %v5001_v41 }
 0x3a0   : > { %v2602_v31 = vpop.f32.mrf.mxu0 }
 0x3a1   : > { %v2941_v45 = vmax.f32 %v2877_v23, 0.0  ;;  %v2809_v37 = vadd.f32 %v2602_v31, %v4992_v18  ;;  %v2882_v49 = vadd.f32 %v5380_v62, %v2811_v19 }
 0x3a2   : > { %v4290_v56 = vpop.f32.mrf.mxu0 }
 0x3a3   : > { %v2998_v16 = vpack.c.bf16 %v2941_v45, %v2940_v17  ;;  %v2880_v46 = vadd.f32 %v5380_v62, %v2809_v37  ;;  %v2812_v61 = vadd.f32 %v4290_v56, %v5004_v52  ;;  %v2946_v35 = vmax.f32 %v2882_v49, 0.0 }
 0x3a4   : > { %v2605_v44 = vpop.f32.mrf.mxu0 }
 0x3a5   : > { %3195 = vmatmul.mubr.bf16.gmra.mxu1 %v2995_v22  ;;  %v2810_v50 = vadd.f32 %v2605_v44, %v4995_v8  ;;  %v2942_v22 = vmax.f32 %v2878_v14, 0.0  ;;  %v2944_v8 = vmax.f32 %v2880_v46, 0.0  ;;  %v2883_v32 = vadd.f32 %v5380_v62, %v2812_v61 }
 0x3a6   : > { %3204 = vmatprep.mubr.bf16.mxu1 %v5949_v10  ;;  %v4293_v58 = vpop.f32.mrf.mxu0 }
 0x3a7   : > { %v2999_v53 = vpack.c.bf16 %v2943_v7, %v2942_v22  ;;  %v2881_v60 = vadd.f32 %v5380_v62, %v2810_v50  ;;  %v2815_v31 = vadd.f32 %v4293_v58, %v5017_v25 }
 0x3a8   : > { %v2618_v1 = vpop.f32.mrf.mxu0 }
 0x3a9   : > { %v2945_v5 = vmax.f32 %v2881_v60, 0.0  ;;  %v2813_v52 = vadd.f32 %v2618_v1, %v5009_v59  ;;  %v2886_v45 = vadd.f32 %v5380_v62, %v2815_v31 }
 0x3aa   : > { %v4294_v15 = vpop.f32.mrf.mxu0 }
 0x3ab   : > { %v3000_v12 = vpack.c.bf16 %v2945_v5, %v2944_v8  ;;  %v2884_v38 = vadd.f32 %v5380_v62, %v2813_v52  ;;  %v2816_v33 = vadd.f32 %v4294_v15, %v5021_v36  ;;  %v2950_v40 = vmax.f32 %v2886_v45, 0.0 }
 0x3ac   : > { %v2621_v18 = vpop.f32.mrf.mxu0 }
 0x3ad   : > { %3205 = vmatmul.mubr.bf16.gmra.mxu1 %v2996_v11  ;;  %v2947_v11 = vmax.f32 %v2883_v32, 0.0  ;;  %v2814_v3 = vadd.f32 %v2621_v18, %v5014_v55  ;;  %v2948_v55 = vmax.f32 %v2884_v38, 0.0  ;;  %v2887_v34 = vadd.f32 %v5380_v62, %v2816_v33 }
 0x3ae   : > { %3214 = vmatprep.mubr.bf16.mxu1 %v5949_v10 }
 0x3af   : > { %v3001_v20 = vpack.c.bf16 %v2947_v11, %v2946_v35  ;;  %v2885_v41 = vadd.f32 %v5380_v62, %v2814_v3  ;;  %v2951_v56 = vmax.f32 %v2887_v34, 0.0 }
 0x3b1   : > { %v4297_v27 = vpop.f32.mrf.mxu0 }
 0x3b2   : > { %v2819_v22 = vadd.f32 %v4297_v27, %v5039_v30 }
 0x3b3   : > { %v2634_v24 = vpop.f32.mrf.mxu0 }
 0x3b4   : > { %v2817_v36 = vadd.f32 %v2634_v24, %v5026_v28  ;;  %v2890_v60 = vadd.f32 %v5380_v62, %v2819_v22 }
 0x3b5   : > { %3215 = vmatmul.mubr.bf16.gmra.mxu1 %v2997_v9  ;;  %v2949_v9 = vmax.f32 %v2885_v41, 0.0  ;;  %v4298_v23 = vpop.f32.mrf.mxu0 }
 0x3b6   : > { %3224 = vmatprep.mubr.bf16.mxu1 %v5949_v10  ;;  %v2888_v14 = vadd.f32 %v5380_v62, %v2817_v36  ;;  %v2820_v7 = vadd.f32 %v4298_v23, %v5046_v4  ;;  %v2954_v5 = vmax.f32 %v2890_v60, 0.0 }
 0x3b7   : > { %v3002_v48 = vpack.c.bf16 %v2949_v9, %v2948_v55  ;;  %v2637_v59 = vpop.f32.mrf.mxu0 }
 0x3b8   : > { %v2818_v2 = vadd.f32 %v2637_v59, %v5034_v54  ;;  %v2952_v54 = vmax.f32 %v2888_v14, 0.0  ;;  %v2891_v37 = vadd.f32 %v5380_v62, %v2820_v7 }
 0x3ba   : > { %v2889_v25 = vadd.f32 %v5380_v62, %v2818_v2  ;;  %v2955_v1 = vmax.f32 %v2891_v37, 0.0 }
 0x3bc   : > { %v2953_v50 = vmax.f32 %v2889_v25, 0.0  ;;  %v3005_v15 = vpack.c.bf16 %v2955_v1, %v2954_v5  ;;  %v5951_v5 = vld [vmem:[#allocation9_spill] sm:$0xff] }
 0x3bd   : > { %3225 = vmatmul.mubr.bf16.gmra.mxu1 %v2998_v16  ;;  %v3003_v16 = vpack.c.bf16 %v2951_v56, %v2950_v40 }
 0x3be   : > { %3234 = vmatprep.mubr.bf16.mxu1 %v5949_v10 }
 0x3c1   : > { %v4301_v17 = vpop.f32.mrf.mxu0 }
 0x3c2   : > { %v2823_v49 = vadd.f32 %v4301_v17, %v5060_v63 }
 0x3c3   : > { %v2650_v44 = vpop.f32.mrf.mxu0 }
 0x3c4   : > { %v2821_v4 = vadd.f32 %v2650_v44, %v5051_v21  ;;  %v2894_v27 = vadd.f32 %v5380_v62, %v2823_v49 }
 0x3c5   : > { %3235 = vmatmul.mubr.bf16.gmra.mxu1 %v2999_v53  ;;  %v4302_v58 = vpop.f32.mrf.mxu0  ;;  %v3004_v53 = vpack.c.bf16 %v2953_v50, %v2952_v54 }
 0x3c6   : > { %3244 = vmatprep.mubr.bf16.mxu1 %v5949_v10  ;;  %v2892_v8 = vadd.f32 %v5380_v62, %v2821_v4  ;;  %v2824_v32 = vadd.f32 %v4302_v58, %v5064_v51  ;;  %v2958_v41 = vmax.f32 %v2894_v27, 0.0 }
 0x3c7   : > { %v2653_v28 = vpop.f32.mrf.mxu0 }
 0x3c8   : > { %v2822_v46 = vadd.f32 %v2653_v28, %v5055_v29  ;;  %v2956_v29 = vmax.f32 %v2892_v8, 0.0  ;;  %v2895_v11 = vadd.f32 %v5380_v62, %v2824_v32 }
 0x3ca   : > { %v2893_v30 = vadd.f32 %v5380_v62, %v2822_v46  ;;  %v2959_v35 = vmax.f32 %v2895_v11, 0.0  ;;  %v5953_v11 = vld [vmem:[#allocation11_spill] sm:$0xff] }
 0x3cc   : > { %v3007_v24 = vpack.c.bf16 %v2959_v35, %v2958_v41  ;;  %v5954_v35 = vld [vmem:[#allocation10_spill] sm:$0xff] }
 0x3cd   : > { %3245 = vmatmul.mubr.bf16.gmra.mxu1 %v3000_v12  ;;  %v2957_v12 = vmax.f32 %v2893_v30, 0.0 }
 0x3ce   : > { %3254 = vmatprep.mubr.bf16.mxu1 %v5949_v10 }
 0x3cf   : > { %v3006_v3 = vpack.c.bf16 %v2957_v12, %v2956_v29 }
 0x3d1   : > { %v4305_v61 = vpop.f32.mrf.mxu0 }
 0x3d2   : > { %v2827_v55 = vadd.f32 %v4305_v61, %v5075_v13 }
 0x3d3   : > { %v2666_v19 = vpop.f32.mrf.mxu0 }
 0x3d4   : > { %v2825_v51 = vadd.f32 %v2666_v19, %v5066_v57  ;;  %v2898_v59 = vadd.f32 %v5380_v62, %v2827_v55  ;;  %v5952_v19 = vld [vmem:[#allocation8_spill] sm:$0xff] }
 0x3d5   : > { %3255 = vmatmul.mubr.bf16.gmra.mxu1 %v3001_v20  ;;  %v4306_v18 = vpop.f32.mrf.mxu0 }
 0x3d6   : > { %3264 = vmatprep.mubr.bf16.mxu1 %v5949_v10  ;;  %v2896_v33 = vadd.f32 %v5380_v62, %v2825_v51  ;;  %v2828_v9 = vadd.f32 %v4306_v18, %v5079_v26  ;;  %v2962_v17 = vmax.f32 %v2898_v59, 0.0 }
 0x3d7   : > { %v2669_v21 = vpop.f32.mrf.mxu0 }
 0x3d8   : > { %v2826_v52 = vadd.f32 %v2669_v21, %v5073_v0  ;;  %v2960_v0 = vmax.f32 %v2896_v33, 0.0  ;;  %v2899_v34 = vadd.f32 %v5380_v62, %v2828_v9 }
 0x3da   : > { %v2897_v63 = vadd.f32 %v5380_v62, %v2826_v52  ;;  %v2963_v45 = vmax.f32 %v2899_v34, 0.0 }
 0x3dc   : > { %v2961_v23 = vmax.f32 %v2897_v63, 0.0  ;;  %v3009_v40 = vpack.c.bf16 %v2963_v45, %v2962_v17  ;;  %v5955_v63 = vld [vmem:[#allocation13_spill] sm:$0xff]  ;;  %v5957_v45 = vld [vmem:[#allocation15_spill] sm:$0xff] }
 0x3dd   : > { %3265 = vmatmul.mubr.bf16.gmra.mxu1 %v3002_v48 }
 0x3de   : > { %3274 = vmatprep.mubr.bf16.mxu1 %v5949_v10  ;;  %v3008_v48 = vpack.c.bf16 %v2961_v23, %v2960_v0  ;;  %v5956_v23 = vld [vmem:[#allocation12_spill] sm:$0xff] }
 0x3e1   : > { %v4309_v20 = vpop.f32.mrf.mxu0 }
 0x3e2   : > { %v2831_v7 = vadd.f32 %v4309_v20, %v5087_v43 }
 0x3e3   : > { %v2682_v38 = vpop.f32.mrf.mxu0 }
 0x3e4   : > { %v2829_v26 = vadd.f32 %v2682_v38, %v5081_v42  ;;  %v2902_v22 = vadd.f32 %v5380_v62, %v2831_v7 }
 0x3e5   : > { %3275 = vmatmul.mubr.bf16.gmra.mxu1 %v3003_v16  ;;  %v4310_v31 = vpop.f32.mrf.mxu0 }
 0x3e6   : > { %3284 = vmatprep.mubr.bf16.mxu1 %v5949_v10  ;;  %v2900_v16 = vadd.f32 %v5380_v62, %v2829_v26  ;;  %v2832_v25 = vadd.f32 %v4310_v31, %v5091_v6  ;;  %v2966_v28 = vmax.f32 %v2902_v22, 0.0  ;;  %v5950_v6 = vld [vmem:[#allocation7_spill] sm:$0xff]  ;;  %v5958_v26 = vld [vmem:[#allocation14_spill] sm:$0xff] }
 0x3e7   : > { %v2685_v57 = vpop.f32.mrf.mxu0 }
 0x3e8   : > { %v2830_v56 = vadd.f32 %v2685_v57, %v5085_v47  ;;  %v2964_v47 = vmax.f32 %v2900_v16, 0.0  ;;  %v2903_v50 = vadd.f32 %v5380_v62, %v2832_v25 }
 0x3ea   : > { %v2901_v13 = vadd.f32 %v5380_v62, %v2830_v56  ;;  %v2967_v54 = vmax.f32 %v2903_v50, 0.0  ;;  %v5960_v50 = vld [vmem:[#allocation5_spill] sm:$0xff] }
 0x3ec   : > { %v2965_v44 = vmax.f32 %v2901_v13, 0.0  ;;  %v3011_v1 = vpack.c.bf16 %v2967_v54, %v2966_v28 }
 0x3ed   : > { %3285 = vmatmul.mubr.bf16.gmra.mxu1 %v3004_v53 }
 0x3ee   : > { %3294 = vmatprep.mubr.bf16.mxu1 %v5949_v10  ;;  %v3010_v58 = vpack.c.bf16 %v2965_v44, %v2964_v47  ;;  %v5959_v44 = vld [vmem:[#allocation17_spill] sm:$0xff] }
 0x3f1   : > { %v4313_v2 = vpop.f32.mrf.mxu0 }
 0x3f2   : > { %v2835_v8 = vadd.f32 %v4313_v2, %v5952_v19 }
 0x3f3   : > { %v2698_v36 = vpop.f32.mrf.mxu0 }
 0x3f4   : > { %v2833_v60 = vadd.f32 %v2698_v36, %v5950_v6  ;;  %v2906_v49 = vadd.f32 %v5380_v62, %v2835_v8 }
 0x3f5   : > { %3295 = vmatmul.mubr.bf16.gmra.mxu1 %v3005_v15  ;;  %v4314_v14 = vpop.f32.mrf.mxu0 }
 0x3f6   : > { %3304 = vmatprep.mubr.bf16.mxu1 %v5949_v10  ;;  %v2904_v61 = vadd.f32 %v5380_v62, %v2833_v60  ;;  %v2836_v4 = vadd.f32 %v4314_v14, %v5951_v5  ;;  %v2970_v27 = vmax.f32 %v2906_v49, 0.0 }
 0x3f7   : > { %v2701_v42 = vpop.f32.mrf.mxu0 }
 0x3f8   : > { %v2834_v37 = vadd.f32 %v2701_v42, %v5097_v39  ;;  %v2968_v39 = vmax.f32 %v2904_v61, 0.0  ;;  %v2907_v32 = vadd.f32 %v5380_v62, %v2836_v4  ;;  %v5961_v42 = vld [vmem:[#allocation16_spill] sm:$0xff]  ;;  %v5962_v4 = vld [vmem:[#allocation19_spill] sm:$0xff] }
 0x3fa   : > { %v2905_v43 = vadd.f32 %v5380_v62, %v2834_v37  ;;  %v2971_v29 = vmax.f32 %v2907_v32, 0.0  ;;  %v3040_v37 = vld [vmem:[%s5911_s10] sm:$0x3]  ;;  %v5963_v32 = vld [vmem:[#allocation18_spill] sm:$0xff] }
 0x3fc   : > { %v2969_v15 = vmax.f32 %v2905_v43, 0.0  ;;  %v3013_v20 = vpack.c.bf16 %v2971_v29, %v2970_v27 }
 0x3fd   : > { %3305 = vmatmul.mubr.bf16.gmra.mxu1 %v3006_v3 }
 0x3fe   : > { %3314 = vmatprep.mubr.bf16.mxu1 %v5949_v10  ;;  %v3012_v12 = vpack.c.bf16 %v2969_v15, %v2968_v39 }
 0x401   : > { %v4317_v53 = vpop.f32.mrf.mxu0 }
 0x402   : > { %v2839_v31 = vadd.f32 %v4317_v53, %v5956_v23  ;;  %v3048_v53 = vsub.s32 1, %v5960_v50 }
 0x403   : > { %v2714_v46 = vpop.f32.mrf.mxu0 }
 0x404   : > { %v2837_v52 = vadd.f32 %v2714_v46, %v5954_v35  ;;  %v2910_v57 = vadd.f32 %v5380_v62, %v2839_v31  ;;  %v5516_v61 = vrot.slane %v3040_v37, %v3048_v53 }
 0x405   : > { %3315 = vmatmul.mubr.bf16.gmra.mxu1 %v3007_v24  ;;  %v4318_v30 = vpop.f32.mrf.mxu0 }
 0x406   : > { %3324 = vmatprep.mubr.bf16.mxu1 %v5949_v10  ;;  %v2908_v24 = vadd.f32 %v5380_v62, %v2837_v52  ;;  %v2840_v38 = vadd.f32 %v4318_v30, %v5955_v63  ;;  %v2974_v17 = vmax.f32 %v2910_v57, 0.0 }
 0x407   : > { %v2717_v18 = vpop.f32.mrf.mxu0 }
 0x408   : > { %v2838_v3 = vadd.f32 %v2717_v18, %v5953_v11  ;;  %v2972_v55 = vmax.f32 %v2908_v24, 0.0  ;;  %v2911_v0 = vadd.f32 %v5380_v62, %v2840_v38 }
 0x40a   : > { %v2909_v41 = vadd.f32 %v5380_v62, %v2838_v3  ;;  %v2975_v59 = vmax.f32 %v2911_v0, 0.0 }
 0x40c   : > { %v2973_v33 = vmax.f32 %v2909_v41, 0.0  ;;  %v3015_v13 = vpack.c.bf16 %v2975_v59, %v2974_v17 }
 0x40d   : > { %3325 = vmatmul.mubr.bf16.gmra.mxu1 %v3008_v48 }
 0x40e   : > { %3334 = vmatprep.mubr.bf16.mxu1 %v5949_v10  ;;  %v3014_v34 = vpack.c.bf16 %v2973_v33, %v2972_v55  ;;  %v5964_v33 = vld [vmem:[#allocation21_spill] sm:$0xff] }
 0x411   : > { %v4321_v21 = vpop.f32.mrf.mxu0 }
 0x412   : > { %v2843_v22 = vadd.f32 %v4321_v21, %v5961_v42 }
 0x413   : > { %v2730_v51 = vpop.f32.mrf.mxu0 }
 0x414   : > { %v2914_v43 = vadd.f32 %v5380_v62, %v2843_v22  ;;  %v5966_v22 = vld [vmem:[#allocation23_spill] sm:$0xff] }
 0x415   : > { %3335 = vmatmul.mubr.bf16.gmra.mxu1 %v3009_v40  ;;  %v4322_v9 = vpop.f32.mrf.mxu0  ;;  %v2841_v40 = vadd.f32 %v2730_v51, %v5958_v26 }
 0x416   : > { %3344 = vmatprep.mubr.bf16.mxu1 %v5949_v10  ;;  %v2844_v14 = vadd.f32 %v4322_v9, %v5959_v44  ;;  %v2978_v39 = vmax.f32 %v2914_v43, 0.0 }
 0x417   : > { %v2733_v48 = vpop.f32.mrf.mxu0  ;;  %v2912_v25 = vadd.f32 %v5380_v62, %v2841_v40 }
 0x418   : > { %v2842_v56 = vadd.f32 %v2733_v48, %v5957_v45  ;;  %v2915_v28 = vadd.f32 %v5380_v62, %v2844_v14  ;;  %v5965_v48 = vld [vmem:[#allocation20_spill] sm:$0xff] }
 0x419   : > { %v2976_v54 = vmax.f32 %v2912_v25, 0.0 }
 0x41a   : > { %v2913_v36 = vadd.f32 %v5380_v62, %v2842_v56  ;;  %v2979_v5 = vmax.f32 %v2915_v28, 0.0 }
 0x41c   : > { %v2977_v7 = vmax.f32 %v2913_v36, 0.0  ;;  %v3017_v11 = vpack.c.bf16 %v2979_v5, %v2978_v39 }
 0x41d   : > { %3345 = vmatmul.mubr.bf16.gmra.mxu1 %v3010_v58  ;;  %v3044_v58 = vsub.s32 0, %v5960_v50 }
 0x41e   : > { %3354 = vmatprep.mubr.bf16.mxu1 %v5949_v10  ;;  %v3016_v6 = vpack.c.bf16 %v2977_v7, %v2976_v54 }
 0x421   : > { %v4325_v2 = vpop.f32.mrf.mxu0 }
 0x422   : > { %v2847_v57 = vadd.f32 %v4325_v2, %v5965_v48 }
 0x423   : > { %v2746_v16 = vpop.f32.mrf.mxu0 }
 0x424   : > { %v2918_v14 = vadd.f32 %v5380_v62, %v2847_v57 }
 0x425   : > { %3355 = vmatmul.mubr.bf16.gmra.mxu1 %v3011_v1  ;;  %v4326_v47 = vpop.f32.mrf.mxu0  ;;  %v5513_v1 = vrot.slane %v3040_v37, %v3044_v58 }
 0x426   : > { %3364 = vmatprep.mubr.bf16.mxu1 %v5949_v10  ;;  %v2848_v9 = vadd.f32 %v4326_v47, %v5964_v33  ;;  %v5970_v33 = vld [vmem:[#allocation27_spill] sm:$0xff] }
 0x427   : > { %v2749_v60 = vpop.f32.mrf.mxu0 }
 0x428   : > { %v2846_v15 = vadd.f32 %v2749_v60, %v5962_v4  ;;  %v2919_v26 = vadd.f32 %v5380_v62, %v2848_v9  ;;  %v5967_v60 = vld [vmem:[#allocation22_spill] sm:$0xff] }
 0x42a   : > { %v2917_v3 = vadd.f32 %v5380_v62, %v2846_v15  ;;  %v2983_v42 = vmax.f32 %v2919_v26, 0.0 }
 0x42c   : > { %v2981_v23 = vmax.f32 %v2917_v3, 0.0 }
 0x42d   : > { %3365 = vmatmul.mubr.bf16.gmra.mxu1 %v3012_v12  ;;  %v2845_v12 = vadd.f32 %v2746_v16, %v5963_v32  ;;  %v5968_v32 = vld [vmem:[#allocation25_spill] sm:$0xff] }
 0x42e   : > { %3374 = vmatprep.mubr.bf16.mxu1 %v5949_v10 }
 0x42f   : > { %v2916_v41 = vadd.f32 %v5380_v62, %v2845_v12 }
 0x431   : > { %v5520_v19 = vpop.f32.mrf.mxu0  ;;  %v2980_v59 = vmax.f32 %v2916_v41, 0.0 }
 0x433   : > { %v2762_v27 = vpop.f32.mrf.mxu0  ;;  %v3018_v40 = vpack.c.bf16 %v2981_v23, %v2980_v59 }
 0x434   : > { %v2849_v43 = vadd.f32 %v2762_v27, %v5967_v60 }
 0x435   : > { %3375 = vmatmul.mubr.bf16.gmra.mxu1 %v3013_v20  ;;  %v4330_v55 = vpop.f32.mrf.mxu0 }
 0x436   : > { %3384 = vmatprep.mubr.bf16.mxu1 %v5949_v10  ;;  %v2852_v12 = vadd.f32 %v4330_v55, %v5968_v32 }
 0x437   : > { %v2765_v36 = vpop.f32.mrf.mxu0 }
 0x438   : > { %v2850_v54 = vadd.f32 %v2765_v36, %v5966_v22  ;;  %v5973_v36 = vld [vmem:[#allocation28_spill] sm:$0xff] }
 0x43a   : > { %v2921_v4 = vadd.f32 %v5380_v62, %v2850_v54 }
 0x43d   : > { %3385 = vmatmul.mubr.bf16.gmra.mxu1 %v3014_v34 }
 0x43e   : > { %3394 = vmatprep.mubr.bf16.mxu1 %v5949_v10 }
 0x441   : > { %v4333_v53 = vpop.f32.mrf.mxu0 }
 0x445   : > { %3395 = vmatmul.mubr.bf16.gmra.mxu1 %v3015_v13 }
 0x446   : > { %3404 = vmatprep.mubr.bf16.mxu1 %v5949_v10 }
 0x44d   : > { %v3166_v46 = vpop.f32.mrf.mxu1  ;;  %3405 = vmatmul.mubr.bf16.gmra.mxu1 %v3016_v6  ;;  %v2982_v6 = vmax.f32 %v2918_v14, 0.0 }
 0x44e   : > { %3414 = vmatprep.mubr.bf16.mxu1 %v5949_v10  ;;  %v3167_v8 = vadd.f32 %v3166_v46, %v5513_v1 }
 0x44f   : > { %v3168_v30 = vpop.f32.mrf.mxu1  ;;  %v3019_v5 = vpack.c.bf16 %v2983_v42, %v2982_v6 }
 0x450   : > { %v3169_v49 = vadd.f32 %v3168_v30, %v5516_v61  ;;  %v3485_v35 = vmax.f32 %v3167_v8, 0.0  ;;  %v2778_v30 = vpop.f32.mrf.mxu0  ;;  %v2920_v8 = vadd.f32 %v5380_v62, %v2849_v43 }
 0x451   : > { %v3170_v18 = vpop.f32.mrf.mxu1 }
 0x452   : > { %v3171_v29 = vadd.f32 %v3170_v18, %v5513_v1  ;;  %v3486_v24 = vmax.f32 %v3169_v49, 0.0  ;;  %v2985_v18 = vmax.f32 %v2921_v4, 0.0 }
 0x453   : > { %v3172_v21 = vpop.f32.mrf.mxu1 }
 0x454   : > { %v3487_v52 = vmax.f32 %v3171_v29, 0.0  ;;  %v3173_v20 = vadd.f32 %v3172_v21, %v5516_v61  ;;  %v4334_v29 = vpop.f32.mrf.mxu0  ;;  %v2984_v21 = vmax.f32 %v2920_v8, 0.0  ;;  %v5974_v8 = vlaneseq }
 0x455   : > { %v3176_v51 = vpop.f32.mrf.mxu1  ;;  %3415 = vmatmul.mubr.bf16.gmra.mxu1 %v3017_v11  ;;  %v5969_v11 = vld [vmem:[#allocation24_spill] sm:$0xff] }
 0x456   : > { %v5529_v63 = vpack.c.bf16 %v3487_v52, %v3485_v35  ;;  %v3488_v38 = vmax.f32 %v3173_v20, 0.0  ;;  %3424 = vmatprep.mubr.bf16.mxu1 %v5949_v10  ;;  %v3177_v0 = vadd.f32 %v3176_v51, %v5513_v1  ;;  %v2851_v3 = vadd.f32 %v5520_v19, %v5969_v11  ;;  %v2781_v41 = vpop.f32.mrf.mxu0 }
 0x457   : > { %v3178_v31 = vpop.f32.mrf.mxu1  ;;  %v2923_v35 = vadd.f32 %v5380_v62, %v2852_v12  ;;  %v3020_v52 = vpack.c.bf16 %v2985_v18, %v2984_v21  ;;  %v2854_v9 = vadd.f32 %v2781_v41, %v5970_v33  ;;  %v5593_v32 = vand.u32 127, %v5974_v8  ;;  %v5975_v21 = vld [vmem:[#allocation6_spill] sm:$0xff] }
 0x458   : > { %v5534_v34 = vpack.c.bf16 %v3488_v38, %v3486_v24  ;;  %v3179_v56 = vadd.f32 %v3178_v31, %v5516_v61  ;;  %v3489_v16 = vmax.f32 %v3177_v0, 0.0  ;;  %v2922_v51 = vadd.f32 %v5380_v62, %v2851_v3  ;;  %v5971_v31 = vld [vmem:[#allocation26_spill] sm:$0xff] }
 0x459   : > { %v3180_v45 = vpop.f32.mrf.mxu1  ;;  %v2987_v38 = vmax.f32 %v2923_v35, 0.0  ;;  %v2853_v55 = vadd.f32 %v2778_v30, %v5971_v31  ;;  %v2925_v57 = vadd.f32 %v5380_v62, %v2854_v9  ;;  %v3679_v18 = vadd.s32 128, %v5593_v32 }
 0x45a   : > { %v3181_v17 = vadd.f32 %v3180_v45, %v5513_v1  ;;  %v3490_v2 = vmax.f32 %v3179_v56, 0.0  ;;  %v2986_v23 = vmax.f32 %v2922_v51, 0.0 }
 0x45b   : > { %v3182_v13 = vpop.f32.mrf.mxu1  ;;  %v2924_v45 = vadd.f32 %v5380_v62, %v2853_v55  ;;  %v3683_v35 = vadd.s32 %v3679_v18, %v5975_v21 }
 0x45c   : > { %v3491_v25 = vmax.f32 %v3181_v17, 0.0  ;;  %v3183_v44 = vadd.f32 %v3182_v13, %v5516_v61  ;;  %v3021_v48 = vpack.c.bf16 %v2987_v38, %v2986_v23  ;;  %v5972_v17 = vld [vmem:[#allocation29_spill] sm:$0xff] }
 0x45d   : > { %v5542_v7 = vpop.f32.mrf.mxu1  ;;  %3425 = vmatmul.mubr.bf16.gmra.mxu1 %v3018_v40  ;;  %v2856_v26 = vadd.f32 %v4334_v29, %v5972_v17  ;;  %v2989_v40 = vmax.f32 %v2925_v57, 0.0  ;;  %v3687_v23 = vand.u32 1, %v3683_v35  ;;  %vm3695_vm7 = vcmp.lt.s32.totalorder %v3683_v35, 1000 }
 0x45e   : > { %v5544_v47 = vpack.c.bf16 %v3491_v25, %v3489_v16  ;;  %v3492_v58 = vmax.f32 %v3183_v44, 0.0  ;;  %3434 = vmatprep.mubr.bf16.mxu1 %v5949_v10  ;;  %v2855_v16 = vadd.f32 %v4333_v53, %v5973_v36  ;;  %v2988_v25 = vmax.f32 %v2924_v45, 0.0 }
 0x45f   : > { %v5548_v37 = vpop.f32.mrf.mxu1  ;;  %v2927_v14 = vadd.f32 %v5380_v62, %v2856_v26  ;;  %vm3691_vm4 = vcmp.eq.s32.totalorder %v3687_v23, %v5960_v50 }
 0x460   : > { %v5550_v28 = vpack.c.bf16 %v3492_v58, %v3490_v2  ;;  %v3022_v2 = vpack.c.bf16 %v2989_v40, %v2988_v25  ;;  %v2926_v42 = vadd.f32 %v5380_v62, %v2855_v16  ;;  %vm3699_vm8 = vmand %vm3691_vm4, %vm3695_vm7 }
 0x461   : > { %v5553_v46 = vpop.f32.mrf.mxu1  ;;  %v2991_v54 = vmax.f32 %v2927_v14, 0.0  ;;  %vm3961_vm9 = vmpackc.low %vm3699_vm8, %vm3699_vm8 }
 0x462   : > { %v2990_v60 = vmax.f32 %v2926_v42, 0.0 }
 0x463   : > { %v5556_v15 = vpop.f32.mrf.mxu1 }
 0x465   : > { %v5559_v39 = vpop.f32.mrf.mxu1  ;;  %3435 = vmatmul.mubr.bf16.gmra.mxu1 %v3019_v5  ;;  %v3023_v5 = vpack.c.bf16 %v2991_v54, %v2990_v60  ;;  %v4505_v60 = vmov 1.0|1.0  }
 0x466   : > { %3444 = vmatprep.mubr.bf16.mxu1 %v5949_v10  ;;  %3962 = vmatprep.mubr.msk.bf16.mxu0 %vm3961_vm9, %v4505_v60 }
 0x467   : > { %v5563_v49 = vpop.f32.mrf.mxu1 }
 0x469   : > { %v5567_v27 = vpop.f32.mrf.mxu1 }
 0x46a   : > { %v3201_v23 = vadd.f32 %v5567_v27, %v5513_v1 }
 0x46b   : > { %v5570_v20 = vpop.f32.mrf.mxu1 }
 0x46d   : > { %v5573_v24 = vpop.f32.mrf.mxu1  ;;  %3445 = vmatmul.mubr.bf16.gmra.mxu1 %v3020_v52 }
 0x46e   : > { %3454 = vmatprep.mubr.bf16.mxu1 %v5949_v10  ;;  %v3207_v35 = vadd.f32 %v5573_v24, %v5513_v1 }
 0x46f   : > { %v5577_v19 = vpop.f32.mrf.mxu1 }
 0x471   : > { %v5580_v0 = vpop.f32.mrf.mxu1 }
 0x472   : > { %v3211_v18 = vadd.f32 %v5580_v0, %v5513_v1 }
 0x473   : > { %v3212_v59 = vpop.f32.mrf.mxu1 }
 0x474   : > { %v5604_v51 = vadd.f32 %v3212_v59, %v5516_v61 }
 0x475   : > { %v5584_v56 = vpop.f32.mrf.mxu1  ;;  %3455 = vmatmul.mubr.bf16.gmra.mxu1 %v3021_v48 }
 0x476   : > { %3464 = vmatprep.mubr.bf16.mxu1 %v5949_v10 }
 0x477   : > { %v3218_v13 = vpop.f32.mrf.mxu1 }
 0x478   : > { %v3219_v59 = vadd.f32 %v3218_v13, %v5516_v61  ;;  %v3203_v13 = vadd.f32 %v5570_v20, %v5516_v61  ;;  %v3504_v20 = vmax.f32 %v5604_v51, 0.0 }
 0x479   : > { %v3220_v44 = vpop.f32.mrf.mxu1 }
 0x47a   : > { %v3221_v25 = vadd.f32 %v3220_v44, %v5513_v1  ;;  %v3209_v44 = vadd.f32 %v5577_v19, %v5516_v61 }
 0x47b   : > { %v3222_v58 = vpop.f32.mrf.mxu1 }
 0x47c   : > { %v3223_v31 = vadd.f32 %v3222_v58, %v5516_v61  ;;  %v3502_v0 = vmax.f32 %v3209_v44, 0.0 }
 0x47d   : > { %v3226_v22 = vpop.f32.mrf.mxu1  ;;  %3465 = vmatmul.mubr.bf16.gmra.mxu1 %v3022_v2 }
 0x47e   : > { %3474 = vmatprep.mubr.bf16.mxu1 %v5949_v10  ;;  %v3227_v45 = vadd.f32 %v3226_v22, %v5513_v1  ;;  %v3508_v42 = vmax.f32 %v3223_v31, 0.0  ;;  %v3503_v31 = vmax.f32 %v3211_v18, 0.0 }
 0x47f   : > { %v3228_v6 = vpop.f32.mrf.mxu1 }
 0x480   : > { %v3229_v52 = vadd.f32 %v3228_v6, %v5516_v61 }
 0x481   : > { %v3230_v43 = vpop.f32.mrf.mxu1 }
 0x482   : > { %v3231_v38 = vadd.f32 %v3230_v43, %v5513_v1  ;;  %v3510_v40 = vmax.f32 %v3229_v52, 0.0  ;;  %v3217_v43 = vadd.f32 %v5584_v56, %v5513_v1 }
 0x483   : > { %v3232_v4 = vpop.f32.mrf.mxu1 }
 0x484   : > { %v3233_v62 = vadd.f32 %v3232_v4, %v5516_v61  ;;  %v3511_v14 = vmax.f32 %v3231_v38, 0.0  ;;  %v3505_v52 = vmax.f32 %v3217_v43, 0.0  ;;  %v3199_v38 = vadd.f32 %v5563_v49, %v5516_v61 }
 0x485   : > { %v3236_v30 = vpop.f32.mrf.mxu1  ;;  %3475 = vmatmul.mubr.bf16.gmra.mxu1 %v3023_v5  ;;  %v3509_v5 = vmax.f32 %v3227_v45, 0.0 }
 0x486   : > { %v3237_v11 = vadd.f32 %v3236_v30, %v5513_v1  ;;  %v3512_v55 = vmax.f32 %v3233_v62, 0.0  ;;  %v3506_v30 = vmax.f32 %v3219_v59, 0.0  ;;  %v3507_v62 = vmax.f32 %v3221_v25, 0.0 }
 0x487   : > { %v3238_v53 = vpop.f32.mrf.mxu1  ;;  %v3501_v59 = vmax.f32 %v3207_v35, 0.0  ;;  %v3191_v25 = vadd.f32 %v5553_v46, %v5513_v1 }
 0x488   : > { %v3239_v29 = vadd.f32 %v3238_v53, %v5516_v61  ;;  %v3513_v17 = vmax.f32 %v3237_v11, 0.0  ;;  %v3626_v22 = vpack.c.bf16 %v3512_v55, %v3510_v40  ;;  %v3623_v24 = vpack.c.bf16 %v3507_v62, %v3505_v52 }
 0x489   : > { %v3240_v12 = vpop.f32.mrf.mxu1  ;;  %v3498_v40 = vmax.f32 %v3199_v38, 0.0  ;;  %v3495_v46 = vmax.f32 %v3191_v25, 0.0 }
 0x48a   : > { %v3241_v10 = vadd.f32 %v3240_v12, %v5513_v1  ;;  %v3514_v48 = vmax.f32 %v3239_v29, 0.0  ;;  %v3625_v29 = vpack.c.bf16 %v3511_v14, %v3509_v5 }
 0x48b   : > { %v3242_v3 = vpop.f32.mrf.mxu1 }
 0x48c   : > { %v3243_v41 = vadd.f32 %v3242_v3, %v5516_v61  ;;  %v3515_v33 = vmax.f32 %v3241_v10, 0.0  ;;  %v3624_v10 = vpack.c.bf16 %v3508_v42, %v3506_v30 }
 0x48d   : > { %v3246_v9 = vpop.f32.mrf.mxu1 }
 0x48e   : > { %v3516_v57 = vmax.f32 %v3243_v41, 0.0  ;;  %v3247_v16 = vadd.f32 %v3246_v9, %v5513_v1  ;;  %v3627_v2 = vpack.c.bf16 %v3515_v33, %v3513_v17  ;;  %v3193_v9 = vadd.f32 %v5556_v15, %v5516_v61 }
 0x48f   : > { %v3248_v26 = vpop.f32.mrf.mxu1  ;;  %v3189_v17 = vadd.f32 %v5548_v37, %v5516_v61 }
 0x490   : > { %v3628_v36 = vpack.c.bf16 %v3516_v57, %v3514_v48  ;;  %v3249_v54 = vadd.f32 %v3248_v26, %v5516_v61  ;;  %v3517_v53 = vmax.f32 %v3247_v16, 0.0  ;;  %v3500_v48 = vmax.f32 %v3203_v13, 0.0 }
 0x491   : > { %v3250_v58 = vpop.f32.mrf.mxu1  ;;  %v3622_v57 = vpack.c.bf16 %v3504_v20, %v3502_v0  ;;  %v3197_v26 = vadd.f32 %v5559_v39, %v5513_v1  ;;  %v3496_v14 = vmax.f32 %v3193_v9, 0.0  ;;  %v3494_v43 = vmax.f32 %v3189_v17, 0.0 }
 0x492   : > { %v3251_v6 = vadd.f32 %v3250_v58, %v5513_v1  ;;  %3714 = vmatprep.subr.bf16.mxu0 %v3628_v36  ;;  %v3518_v11 = vmax.f32 %v3249_v54, 0.0  ;;  %v3621_v58 = vpack.c.bf16 %v3503_v31, %v3501_v59  ;;  %v3620_v54 = vpack.c.bf16 %v3500_v48, %v3498_v40 }
 0x493   : > { %v3252_v4 = vpop.f32.mrf.mxu1  ;;  %3715 = vmatpush1.bf16.msra.mxu0 %v3627_v2  ;;  %v3499_v2 = vmax.f32 %v3201_v23, 0.0  ;;  %v3497_v13 = vmax.f32 %v3197_v26, 0.0 }
 0x494   : > { %v3519_v8 = vmax.f32 %v3251_v6, 0.0  ;;  %v3253_v12 = vadd.f32 %v3252_v4, %v5516_v61  ;;  %3716 = vmatprep.subr.bf16.mxu0 %v3626_v22  ;;  %v3187_v6 = vadd.f32 %v5542_v7, %v5513_v1 }
 0x495   : > { %v3256_v19 = vpop.f32.mrf.mxu1  ;;  %v3619_v4 = vpack.c.bf16 %v3499_v2, %v3497_v13 }
 0x496   : > { %v5626_v56 = vpack.c.bf16 %v3519_v8, %v3517_v53  ;;  %v3520_v3 = vmax.f32 %v3253_v12, 0.0  ;;  %v3257_v51 = vadd.f32 %v3256_v19, %v5513_v1  ;;  %v3618_v53 = vpack.c.bf16 %v3496_v14, %v3494_v43 }
 0x497   : > { %v3258_v41 = vpop.f32.mrf.mxu1  ;;  %3717 = vmatpush1.bf16.msra.mxu0 %v3625_v29  ;;  %v3493_v8 = vmax.f32 %v3187_v6, 0.0 }
 0x498   : > { %v5632_v33 = vpack.c.bf16 %v3520_v3, %v3518_v11  ;;  %3718 = vmatprep.subr.bf16.mxu0 %v3624_v10  ;;  %v3259_v45 = vadd.f32 %v3258_v41, %v5516_v61  ;;  %v3521_v27 = vmax.f32 %v3257_v51, 0.0 }
 0x499   : > { %v3260_v55 = vpop.f32.mrf.mxu1  ;;  %v3617_v18 = vpack.c.bf16 %v3495_v46, %v3493_v8 }
 0x49a   : > { %v3261_v49 = vadd.f32 %v3260_v55, %v5513_v1  ;;  %v3522_v37 = vmax.f32 %v3259_v45, 0.0 }
 0x49b   : > { %v3262_v15 = vpop.f32.mrf.mxu1  ;;  %3719 = vmatpush1.bf16.msra.mxu0 %v3623_v24 }
 0x49c   : > { %v3523_v36 = vmax.f32 %v3261_v49, 0.0  ;;  %v3263_v16 = vadd.f32 %v3262_v15, %v5516_v61  ;;  %3720 = vmatprep.subr.bf16.mxu0 %v3622_v57 }
 0x49d   : > { %v5648_v42 = vpop.f32.mrf.mxu1 }
 0x49e   : > { %v5650_v22 = vpack.c.bf16 %v3523_v36, %v3521_v27  ;;  %v3524_v39 = vmax.f32 %v3263_v16, 0.0 }
 0x49f   : > { %v5654_v44 = vpop.f32.mrf.mxu1  ;;  %3721 = vmatpush1.bf16.msra.mxu0 %v3621_v58 }
 0x4a0   : > { %v5656_v5 = vpack.c.bf16 %v3524_v39, %v3522_v37  ;;  %3722 = vmatprep.subr.bf16.mxu0 %v3620_v54 }
 0x4a1   : > { %v5658_v30 = vpop.f32.mrf.mxu1 }
 0x4a3   : > { %v5660_v12 = vpop.f32.mrf.mxu1  ;;  %3723 = vmatpush1.bf16.msra.mxu0 %v3619_v4 }
 0x4a4   : > { %3724 = vmatprep.subr.bf16.mxu0 %v3618_v53 }
 0x4a5   : > { %v5662_v7 = vpop.f32.mrf.mxu1 }
 0x4a7   : > { %v5664_v20 = vpop.f32.mrf.mxu1  ;;  %3725 = vmatpush1.bf16.msra.mxu0 %v3617_v18 }
 0x4a8   : > { %3726 = vmatprep.subr.bf16.mxu0 %v5550_v28 }
 0x4a9   : > { %v5667_v62 = vpop.f32.mrf.mxu1 }
 0x4ab   : > { %v3282_v29 = vpop.f32.mrf.mxu1  ;;  %3727 = vmatpush1.bf16.msra.mxu0 %v5544_v47 }
 0x4ac   : > { %3728 = vmatprep.subr.bf16.mxu0 %v5534_v34  ;;  %v3283_v18 = vadd.f32 %v3282_v29, %v5516_v61 }
 0x4ad   : > { %v5671_v19 = vpop.f32.mrf.mxu1 }
 0x4af   : > { %v3288_v10 = vpop.f32.mrf.mxu1  ;;  %3729 = vmatpush1.bf16.msra.mxu0 %v5529_v63 }
 0x4b1   : > { %v3290_v11 = vpop.f32.mrf.mxu1 }
 0x4b3   : > { %v3292_v3 = vpop.f32.mrf.mxu1 }
 0x4b4   : > { %v3293_v39 = vadd.f32 %v3292_v3, %v5516_v61 }
 0x4b5   : > { %v3296_v35 = vpop.f32.mrf.mxu1 }
 0x4b7   : > { %v3298_v52 = vpop.f32.mrf.mxu1 }
 0x4b8   : > { %v3299_v14 = vadd.f32 %v3298_v52, %v5516_v61  ;;  %v3289_v52 = vadd.f32 %v3288_v10, %v5516_v61 }
 0x4b9   : > { %v3300_v41 = vpop.f32.mrf.mxu1 }
 0x4ba   : > { %v3301_v54 = vadd.f32 %v3300_v41, %v5513_v1  ;;  %v3538_v41 = vmax.f32 %v3299_v14, 0.0  ;;  %v3277_v14 = vadd.f32 %v5662_v7, %v5513_v1 }
 0x4bb   : > { %v3302_v38 = vpop.f32.mrf.mxu1 }
 0x4bc   : > { %v3303_v59 = vadd.f32 %v3302_v38, %v5516_v61  ;;  %v3297_v38 = vadd.f32 %v3296_v35, %v5513_v1 }
 0x4bd   : > { %v3306_v0 = vpop.f32.mrf.mxu1 }
 0x4be   : > { %v3307_v36 = vadd.f32 %v3306_v0, %v5513_v1  ;;  %v3540_v46 = vmax.f32 %v3303_v59, 0.0  ;;  %v3281_v59 = vadd.f32 %v5667_v62, %v5513_v1 }
 0x4bf   : > { %v3308_v28 = vpop.f32.mrf.mxu1 }
 0x4c0   : > { %v3309_v57 = vadd.f32 %v3308_v28, %v5516_v61  ;;  %v3541_v0 = vmax.f32 %v3307_v36, 0.0  ;;  %v3640_v29 = vpack.c.bf16 %v3540_v46, %v3538_v41 }
 0x4c1   : > { %v3310_v51 = vpop.f32.mrf.mxu1 }
 0x4c2   : > { %v3311_v49 = vadd.f32 %v3310_v51, %v5513_v1  ;;  %v3542_v2 = vmax.f32 %v3309_v57, 0.0 }
 0x4c3   : > { %v3312_v9 = vpop.f32.mrf.mxu1 }
 0x4c4   : > { %v3313_v34 = vadd.f32 %v3312_v9, %v5516_v61  ;;  %v3543_v6 = vmax.f32 %v3311_v49, 0.0  ;;  %v3534_v49 = vmax.f32 %v3289_v52, 0.0 }
 0x4c5   : > { %v3316_v23 = vpop.f32.mrf.mxu1 }
 0x4c6   : > { %v3317_v63 = vadd.f32 %v3316_v23, %v5513_v1  ;;  %v3544_v15 = vmax.f32 %v3313_v34, 0.0  ;;  %v3291_v23 = vadd.f32 %v3290_v11, %v5513_v1  ;;  %v3641_v34 = vpack.c.bf16 %v3543_v6, %v3541_v0 }
 0x4c7   : > { %v3318_v31 = vpop.f32.mrf.mxu1 }
 0x4c8   : > { %v3319_v24 = vadd.f32 %v3318_v31, %v5516_v61  ;;  %v3545_v16 = vmax.f32 %v3317_v63, 0.0  ;;  %v3642_v4 = vpack.c.bf16 %v3544_v15, %v3542_v2  ;;  %v3536_v31 = vmax.f32 %v3293_v39, 0.0 }
 0x4c9   : > { %v3320_v47 = vpop.f32.mrf.mxu1  ;;  %v3287_v63 = vadd.f32 %v5671_v19, %v5513_v1  ;;  %v3535_v15 = vmax.f32 %v3291_v23, 0.0 }
 0x4ca   : > { %v3321_v55 = vadd.f32 %v3320_v47, %v5513_v1  ;;  %v3546_v40 = vmax.f32 %v3319_v24, 0.0  ;;  %v3539_v47 = vmax.f32 %v3301_v54, 0.0  ;;  %v3638_v36 = vpack.c.bf16 %v3536_v31, %v3534_v49 }
 0x4cb   : > { %v3322_v48 = vpop.f32.mrf.mxu1  ;;  %v3533_v2 = vmax.f32 %v3287_v63, 0.0  ;;  %v3271_v54 = vadd.f32 %v5658_v30, %v5513_v1 }
 0x4cc   : > { %v3323_v45 = vadd.f32 %v3322_v48, %v5516_v61  ;;  %v3547_v17 = vmax.f32 %v3321_v55, 0.0  ;;  %v3537_v48 = vmax.f32 %v3297_v38, 0.0 }
 0x4cd   : > { %v3326_v26 = vpop.f32.mrf.mxu1  ;;  %v3527_v30 = vmax.f32 %v3271_v54, 0.0 }
 0x4ce   : > { %v3548_v27 = vmax.f32 %v3323_v45, 0.0  ;;  %v3327_v37 = vadd.f32 %v3326_v26, %v5513_v1  ;;  %v3643_v13 = vpack.c.bf16 %v3547_v17, %v3545_v16  ;;  %v3279_v45 = vadd.f32 %v5664_v20, %v5516_v61 }
 0x4cf   : > { %v3328_v25 = vpop.f32.mrf.mxu1  ;;  %v3273_v26 = vadd.f32 %v5660_v12, %v5516_v61  ;;  %v3639_v19 = vpack.c.bf16 %v3539_v47, %v3537_v48 }
 0x4d0   : > { %v3644_v58 = vpack.c.bf16 %v3548_v27, %v3546_v40  ;;  %v3329_v53 = vadd.f32 %v3328_v25, %v5516_v61  ;;  %v3549_v28 = vmax.f32 %v3327_v37, 0.0  ;;  %v3532_v27 = vmax.f32 %v3283_v18, 0.0 }
 0x4d1   : > { %v3330_v43 = vpop.f32.mrf.mxu1  ;;  %v3269_v25 = vadd.f32 %v5654_v44, %v5516_v61  ;;  %v3528_v6 = vmax.f32 %v3273_v26, 0.0  ;;  %v3529_v18 = vmax.f32 %v3277_v14, 0.0 }
 0x4d2   : > { %v3331_v8 = vadd.f32 %v3330_v43, %v5513_v1  ;;  %3730 = vmatprep.subr.bf16.mxu0 %v3644_v58  ;;  %v3550_v55 = vmax.f32 %v3329_v53, 0.0  ;;  %v3530_v58 = vmax.f32 %v3279_v45, 0.0  ;;  %v3637_v43 = vpack.c.bf16 %v3535_v15, %v3533_v2 }
 0x4d3   : > { %v3332_v3 = vpop.f32.mrf.mxu1  ;;  %3731 = vmatpush2.bf16.msra.mxu0 %v3643_v13  ;;  %v3531_v13 = vmax.f32 %v3281_v59, 0.0  ;;  %v3526_v38 = vmax.f32 %v3269_v25, 0.0 }
 0x4d4   : > { %v3551_v51 = vmax.f32 %v3331_v8, 0.0  ;;  %v3333_v9 = vadd.f32 %v3332_v3, %v5516_v61  ;;  %3732 = vmatprep.subr.bf16.mxu0 %v3642_v4  ;;  %v3636_v44 = vpack.c.bf16 %v3532_v27, %v3530_v58  ;;  %v3267_v8 = vadd.f32 %v5648_v42, %v5513_v1 }
 0x4d5   : > { %v3336_v24 = vpop.f32.mrf.mxu1  ;;  %v3635_v3 = vpack.c.bf16 %v3531_v13, %v3529_v18 }
 0x4d6   : > { %v5694_v10 = vpack.c.bf16 %v3551_v51, %v3549_v28  ;;  %v3552_v35 = vmax.f32 %v3333_v9, 0.0  ;;  %v3337_v17 = vadd.f32 %v3336_v24, %v5513_v1  ;;  %v3682_v28 = vadd.s32 %v5593_v32, %v5975_v21 }
 0x4d7   : > { %v3338_v57 = vpop.f32.mrf.mxu1  ;;  %3733 = vmatpush2.bf16.msra.mxu0 %v3641_v34  ;;  %v3634_v51 = vpack.c.bf16 %v3528_v6, %v3526_v38  ;;  %v3525_v9 = vmax.f32 %v3267_v8, 0.0  ;;  %v3681_v24 = vadd.s32 384, %v5593_v32 }
 0x4d8   : > { %v5700_v11 = vpack.c.bf16 %v3552_v35, %v3550_v55  ;;  %3734 = vmatprep.subr.bf16.mxu0 %v3640_v29  ;;  %v3339_v16 = vadd.f32 %v3338_v57, %v5516_v61  ;;  %v3553_v62 = vmax.f32 %v3337_v17, 0.0  ;;  %v3686_v47 = vand.u32 1, %v3682_v28 }
 0x4d9   : > { %v3340_v40 = vpop.f32.mrf.mxu1  ;;  %v3633_v42 = vpack.c.bf16 %v3527_v30, %v3525_v9  ;;  %vm3694_vm11 = vcmp.lt.s32.totalorder %v3682_v28, 1000  ;;  %v3685_v55 = vadd.s32 %v3681_v24, %v5975_v21 }
 0x4da   : > { %v3341_v20 = vadd.f32 %v3340_v40, %v5513_v1  ;;  %v3554_v4 = vmax.f32 %v3339_v16, 0.0  ;;  %vm3690_vm10 = vcmp.eq.s32.totalorder %v3686_v47, %v5960_v50 }
 0x4db   : > { %v3342_v12 = vpop.f32.mrf.mxu1  ;;  %3735 = vmatpush2.bf16.msra.mxu0 %v3639_v19  ;;  %vm3698_vm12 = vmand %vm3690_vm10, %vm3694_vm11  ;;  %v3689_v63 = vand.u32 1, %v3685_v55  ;;  %vm3697_vm15 = vcmp.lt.s32.totalorder %v3685_v55, 1000 }
 0x4dc   : > { %v3555_v37 = vmax.f32 %v3341_v20, 0.0  ;;  %v3343_v39 = vadd.f32 %v3342_v12, %v5516_v61  ;;  %3736 = vmatprep.subr.bf16.mxu0 %v3638_v36  ;;  %vm3963_vm14 = vmpackc.low %vm3698_vm12, %vm3698_vm12 }
 0x4dd   : > { %v5716_v46 = vpop.f32.mrf.mxu1  ;;  %vm3693_vm13 = vcmp.eq.s32.totalorder %v3689_v63, %v5960_v50 }
 0x4de   : > { %v5718_v7 = vpack.c.bf16 %v3555_v37, %v3553_v62  ;;  %v3556_v53 = vmax.f32 %v3343_v39, 0.0  ;;  %vm3701_vm0 = vmand %vm3693_vm13, %vm3697_vm15 }
 0x4df   : > { %v5722_v52 = vpop.f32.mrf.mxu1  ;;  %3737 = vmatpush2.bf16.msra.mxu0 %v3637_v43  ;;  %vm3965_vm1 = vmpackc.low %vm3701_vm0, %vm3701_vm0 }
 0x4e0   : > { %v5724_v0 = vpack.c.bf16 %v3556_v53, %v3554_v4  ;;  %3738 = vmatprep.subr.bf16.mxu0 %v3636_v44 }
 0x4e1   : > { %v5726_v41 = vpop.f32.mrf.mxu1 }
 0x4e3   : > { %v5730_v23 = vpop.f32.mrf.mxu1  ;;  %3739 = vmatpush2.bf16.msra.mxu0 %v3635_v3 }
 0x4e4   : > { %3740 = vmatprep.subr.bf16.mxu0 %v3634_v51 }
 0x4e5   : > { %v5732_v31 = vpop.f32.mrf.mxu1 }
 0x4e7   : > { %v5734_v34 = vpop.f32.mrf.mxu1  ;;  %3741 = vmatpush2.bf16.msra.mxu0 %v3633_v42 }
 0x4e8   : > { %3742 = vmatprep.subr.bf16.mxu0 %v5656_v5 }
 0x4e9   : > { %v5738_v29 = vpop.f32.mrf.mxu1 }
 0x4eb   : > { %v3362_v35 = vpop.f32.mrf.mxu1  ;;  %3743 = vmatpush2.bf16.msra.mxu0 %v5650_v22 }
 0x4ec   : > { %3744 = vmatprep.subr.bf16.mxu0 %v5632_v33  ;;  %v3363_v63 = vadd.f32 %v3362_v35, %v5516_v61 }
 0x4ed   : > { %v5744_v48 = vpop.f32.mrf.mxu1 }
 0x4ef   : > { %v3368_v5 = vpop.f32.mrf.mxu1  ;;  %3745 = vmatpush2.bf16.msra.mxu0 %v5626_v56 }
 0x4f1   : > { %v3370_v57 = vpop.f32.mrf.mxu1 }
 0x4f2   : > { %3964 = vmatmul.mubr.msk.bf16.vlgmr.msra.gmra.mxu0 %vm3963_vm14, %v4505_v60 }
 0x4f3   : > { %v3372_v45 = vpop.f32.mrf.mxu1  ;;  %3966 = vmatprep.mubr.msk.bf16.mxu0 %vm3965_vm1, %v4505_v60 }
 0x4f4   : > { %v3373_v30 = vadd.f32 %v3372_v45, %v5516_v61 }
 0x4f5   : > { %v3376_v33 = vpop.f32.mrf.mxu1 }
 0x4f7   : > { %v3378_v22 = vpop.f32.mrf.mxu1 }
 0x4f8   : > { %v3379_v53 = vadd.f32 %v3378_v22, %v5516_v61  ;;  %v3369_v22 = vadd.f32 %v3368_v5, %v5516_v61 }
 0x4f9   : > { %v3380_v49 = vpop.f32.mrf.mxu1 }
 0x4fa   : > { %v3381_v3 = vadd.f32 %v3380_v49, %v5513_v1  ;;  %v3570_v49 = vmax.f32 %v3379_v53, 0.0  ;;  %v3357_v53 = vadd.f32 %v5732_v31, %v5513_v1 }
 0x4fb   : > { %v3382_v17 = vpop.f32.mrf.mxu1 }
 0x4fc   : > { %v3383_v39 = vadd.f32 %v3382_v17, %v5516_v61  ;;  %v3377_v17 = vadd.f32 %v3376_v33, %v5513_v1 }
 0x4fd   : > { %v3386_v26 = vpop.f32.mrf.mxu1 }
 0x4fe   : > { %v3387_v43 = vadd.f32 %v3386_v26, %v5513_v1  ;;  %v3572_v42 = vmax.f32 %v3383_v39, 0.0  ;;  %v3361_v39 = vadd.f32 %v5738_v29, %v5513_v1 }
 0x4ff   : > { %v3388_v59 = vpop.f32.mrf.mxu1 }
 0x500   : > { %v3389_v2 = vadd.f32 %v3388_v59, %v5516_v61  ;;  %v3573_v26 = vmax.f32 %v3387_v43, 0.0  ;;  %v3656_v35 = vpack.c.bf16 %v3572_v42, %v3570_v49 }
 0x501   : > { %v3390_v15 = vpop.f32.mrf.mxu1 }
 0x502   : > { %v3391_v58 = vadd.f32 %v3390_v15, %v5513_v1  ;;  %v3574_v8 = vmax.f32 %v3389_v2, 0.0 }
 0x503   : > { %v3392_v19 = vpop.f32.mrf.mxu1 }
 0x504   : > { %v3393_v36 = vadd.f32 %v3392_v19, %v5516_v61  ;;  %v3575_v28 = vmax.f32 %v3391_v58, 0.0  ;;  %v3566_v58 = vmax.f32 %v3369_v22, 0.0 }
 0x505   : > { %v3396_v40 = vpop.f32.mrf.mxu1 }
 0x506   : > { %v3397_v25 = vadd.f32 %v3396_v40, %v5513_v1  ;;  %v3576_v54 = vmax.f32 %v3393_v36, 0.0  ;;  %v3371_v40 = vadd.f32 %v3370_v57, %v5513_v1  ;;  %v3657_v36 = vpack.c.bf16 %v3575_v28, %v3573_v26 }
 0x507   : > { %v3398_v56 = vpop.f32.mrf.mxu1 }
 0x508   : > { %v3399_v16 = vadd.f32 %v3398_v56, %v5516_v61  ;;  %v3577_v44 = vmax.f32 %v3397_v25, 0.0  ;;  %v3658_v47 = vpack.c.bf16 %v3576_v54, %v3574_v8  ;;  %v3568_v56 = vmax.f32 %v3373_v30, 0.0 }
 0x509   : > { %v3400_v27 = vpop.f32.mrf.mxu1  ;;  %v3367_v25 = vadd.f32 %v5744_v48, %v5513_v1  ;;  %v3567_v54 = vmax.f32 %v3371_v40, 0.0 }
 0x50a   : > { %v3401_v20 = vadd.f32 %v3400_v27, %v5513_v1  ;;  %v3578_v6 = vmax.f32 %v3399_v16, 0.0  ;;  %v3571_v27 = vmax.f32 %v3381_v3, 0.0  ;;  %v3654_v43 = vpack.c.bf16 %v3568_v56, %v3566_v58 }
 0x50b   : > { %v3402_v14 = vpop.f32.mrf.mxu1  ;;  %v3565_v8 = vmax.f32 %v3367_v25, 0.0  ;;  %v3351_v3 = vadd.f32 %v5726_v41, %v5513_v1 }
 0x50c   : > { %v3403_v12 = vadd.f32 %v3402_v14, %v5516_v61  ;;  %v3579_v62 = vmax.f32 %v3401_v20, 0.0  ;;  %v3569_v14 = vmax.f32 %v3377_v17, 0.0 }
 0x50d   : > { %v3406_v37 = vpop.f32.mrf.mxu1  ;;  %v3559_v41 = vmax.f32 %v3351_v3, 0.0 }
 0x50e   : > { %v3580_v13 = vmax.f32 %v3403_v12, 0.0  ;;  %v3407_v38 = vadd.f32 %v3406_v37, %v5513_v1  ;;  %v3659_v51 = vpack.c.bf16 %v3579_v62, %v3577_v44  ;;  %v3359_v12 = vadd.f32 %v5734_v34, %v5516_v61 }
 0x50f   : > { %v3408_v4 = vpop.f32.mrf.mxu1  ;;  %v3353_v37 = vadd.f32 %v5730_v23, %v5516_v61  ;;  %v3655_v48 = vpack.c.bf16 %v3571_v27, %v3569_v14 }
 0x510   : > { %v3660_v18 = vpack.c.bf16 %v3580_v13, %v3578_v6  ;;  %v3409_v24 = vadd.f32 %v3408_v4, %v5516_v61  ;;  %v3581_v59 = vmax.f32 %v3407_v38, 0.0  ;;  %v3564_v13 = vmax.f32 %v3363_v63, 0.0 }
 0x511   : > { %v3410_v9 = vpop.f32.mrf.mxu1  ;;  %v3349_v4 = vadd.f32 %v5722_v52, %v5516_v61  ;;  %v3560_v28 = vmax.f32 %v3353_v37, 0.0  ;;  %v3561_v63 = vmax.f32 %v3357_v53, 0.0 }
 0x512   : > { %v3411_v55 = vadd.f32 %v3410_v9, %v5513_v1  ;;  %3755 = vmatprep.subr.bf16.mxu0 %v3660_v18  ;;  %v3582_v20 = vmax.f32 %v3409_v24, 0.0  ;;  %v3562_v18 = vmax.f32 %v3359_v12, 0.0  ;;  %v3653_v9 = vpack.c.bf16 %v3567_v54, %v3565_v8 }
 0x513   : > { %v3412_v45 = vpop.f32.mrf.mxu1  ;;  %3756 = vmatpush1.bf16.msra.mxu0 %v3659_v51  ;;  %v3563_v51 = vmax.f32 %v3361_v39, 0.0  ;;  %v3558_v17 = vmax.f32 %v3349_v4, 0.0 }
 0x514   : > { %v3583_v15 = vmax.f32 %v3411_v55, 0.0  ;;  %v3413_v19 = vadd.f32 %v3412_v45, %v5516_v61  ;;  %3757 = vmatprep.subr.bf16.mxu0 %v3658_v47  ;;  %v3652_v52 = vpack.c.bf16 %v3564_v13, %v3562_v18  ;;  %v3347_v55 = vadd.f32 %v5716_v46, %v5513_v1 }
 0x515   : > { %v3416_v16 = vpop.f32.mrf.mxu1  ;;  %v3651_v45 = vpack.c.bf16 %v3563_v51, %v3561_v63 }
 0x516   : > { %v5770_v5 = vpack.c.bf16 %v3583_v15, %v3581_v59  ;;  %v3584_v33 = vmax.f32 %v3413_v19, 0.0  ;;  %v3417_v62 = vadd.f32 %v3416_v16, %v5513_v1  ;;  %v3650_v59 = vpack.c.bf16 %v3560_v28, %v3558_v17 }
 0x517   : > { %v3418_v2 = vpop.f32.mrf.mxu1  ;;  %3758 = vmatpush1.bf16.msra.mxu0 %v3657_v36  ;;  %v3557_v15 = vmax.f32 %v3347_v55, 0.0 }
 0x518   : > { %v5776_v57 = vpack.c.bf16 %v3584_v33, %v3582_v20  ;;  %3759 = vmatprep.subr.bf16.mxu0 %v3656_v35  ;;  %v3419_v44 = vadd.f32 %v3418_v2, %v5516_v61  ;;  %v3585_v29 = vmax.f32 %v3417_v62, 0.0 }
 0x519   : > { %v3420_v6 = vpop.f32.mrf.mxu1  ;;  %v3649_v40 = vpack.c.bf16 %v3559_v41, %v3557_v15 }
 0x51a   : > { %v3421_v34 = vadd.f32 %v3420_v6, %v5513_v1  ;;  %v3586_v47 = vmax.f32 %v3419_v44, 0.0 }
 0x51b   : > { %v3422_v23 = vpop.f32.mrf.mxu1  ;;  %3760 = vmatpush1.bf16.msra.mxu0 %v3655_v48 }
 0x51c   : > { %v3587_v38 = vmax.f32 %v3421_v34, 0.0  ;;  %v3423_v30 = vadd.f32 %v3422_v23, %v5516_v61  ;;  %3761 = vmatprep.subr.bf16.mxu0 %v3654_v43 }
 0x51d   : > { %v5792_v42 = vpop.f32.mrf.mxu1 }
 0x51e   : > { %v5794_v31 = vpack.c.bf16 %v3587_v38, %v3585_v29  ;;  %v3588_v24 = vmax.f32 %v3423_v30, 0.0 }
 0x51f   : > { %v5798_v22 = vpop.f32.mrf.mxu1  ;;  %3762 = vmatpush1.bf16.msra.mxu0 %v3653_v9 }
 0x520   : > { %v5800_v26 = vpack.c.bf16 %v3588_v24, %v3586_v47  ;;  %3763 = vmatprep.subr.bf16.mxu0 %v3652_v52 }
 0x521   : > { %v5802_v49 = vpop.f32.mrf.mxu1 }
 0x523   : > { %v5804_v19 = vpop.f32.mrf.mxu1  ;;  %3764 = vmatpush1.bf16.msra.mxu0 %v3651_v45 }
 0x524   : > { %3765 = vmatprep.subr.bf16.mxu0 %v3650_v59 }
 0x525   : > { %v5806_v46 = vpop.f32.mrf.mxu1 }
 0x527   : > { %v5808_v56 = vpop.f32.mrf.mxu1  ;;  %3766 = vmatpush1.bf16.msra.mxu0 %v3649_v40 }
 0x528   : > { %3767 = vmatprep.subr.bf16.mxu0 %v5724_v0 }
 0x529   : > { %v5811_v27 = vpop.f32.mrf.mxu1 }
 0x52b   : > { %v3442_v36 = vpop.f32.mrf.mxu1  ;;  %3768 = vmatpush1.bf16.msra.mxu0 %v5718_v7 }
 0x52c   : > { %3769 = vmatprep.subr.bf16.mxu0 %v5700_v11 }
 0x52d   : > { %v3446_v16 = vpop.f32.mrf.mxu1 }
 0x52f   : > { %v3448_v35 = vpop.f32.mrf.mxu1  ;;  %3770 = vmatpush1.bf16.msra.mxu0 %v5694_v10 }
 0x530   : > { %v3449_v41 = vadd.f32 %v3448_v35, %v5516_v61  ;;  %v3441_v35 = vadd.f32 %v5811_v27, %v5513_v1  ;;  %v3431_v27 = vadd.f32 %v5802_v49, %v5513_v1 }
 0x531   : > { %v3450_v20 = vpop.f32.mrf.mxu1 }
 0x532   : > { %v3451_v59 = vadd.f32 %v3450_v20, %v5513_v1 }
 0x533   : > { %v3452_v33 = vpop.f32.mrf.mxu1 }
 0x534   : > { %v3453_v47 = vadd.f32 %v3452_v33, %v5516_v61  ;;  %v3447_v33 = vadd.f32 %v3446_v16, %v5513_v1  ;;  %v3437_v16 = vadd.f32 %v5806_v46, %v5513_v1 }
 0x535   : > { %v3456_v25 = vpop.f32.mrf.mxu1 }
 0x536   : > { %v3457_v63 = vadd.f32 %v3456_v25, %v5513_v1  ;;  %v3439_v25 = vadd.f32 %v5808_v56, %v5516_v61  ;;  %v3429_v56 = vadd.f32 %v5798_v22, %v5516_v61  ;;  %v3593_v46 = vmax.f32 %v3437_v16, 0.0 }
 0x537   : > { %v3458_v14 = vpop.f32.mrf.mxu1 }
 0x538   : > { %v3459_v30 = vadd.f32 %v3458_v14, %v5516_v61  ;;  %v3443_v14 = vadd.f32 %v3442_v36, %v5516_v61 }
 0x539   : > { %v3460_v2 = vpop.f32.mrf.mxu1 }
 0x53a   : > { %v3461_v51 = vadd.f32 %v3460_v2, %v5513_v1  ;;  %v3602_v45 = vmax.f32 %v3459_v30, 0.0  ;;  %v3600_v2 = vmax.f32 %v3453_v47, 0.0  ;;  %v3596_v36 = vmax.f32 %v3443_v14, 0.0 }
 0x53b   : > { %v3462_v12 = vpop.f32.mrf.mxu1 }
 0x53c   : > { %v3463_v53 = vadd.f32 %v3462_v12, %v5516_v61  ;;  %v3603_v15 = vmax.f32 %v3461_v51, 0.0 }
 0x53d   : > { %v3466_v58 = vpop.f32.mrf.mxu1 }
 0x53e   : > { %v3467_v29 = vadd.f32 %v3466_v58, %v5513_v1  ;;  %v3604_v24 = vmax.f32 %v3463_v53, 0.0  ;;  %v3601_v58 = vmax.f32 %v3457_v63, 0.0 }
 0x53f   : > { %v3468_v62 = vpop.f32.mrf.mxu1 }
 0x540   : > { %v3469_v43 = vadd.f32 %v3468_v62, %v5516_v61  ;;  %v3605_v17 = vmax.f32 %v3467_v29, 0.0  ;;  %v3672_v12 = vpack.c.bf16 %v3604_v24, %v3602_v45  ;;  %v3598_v62 = vmax.f32 %v3449_v41, 0.0 }
 0x541   : > { %v3470_v0 = vpop.f32.mrf.mxu1  ;;  %v3671_v20 = vpack.c.bf16 %v3603_v15, %v3601_v58 }
 0x542   : > { %v3471_v34 = vadd.f32 %v3470_v0, %v5513_v1  ;;  %v3606_v3 = vmax.f32 %v3469_v43, 0.0  ;;  %v3599_v0 = vmax.f32 %v3451_v59, 0.0  ;;  %v3590_v43 = vmax.f32 %v3429_v56, 0.0 }
 0x543   : > { %v3472_v37 = vpop.f32.mrf.mxu1 }
 0x544   : > { %v3473_v7 = vadd.f32 %v3472_v37, %v5516_v61  ;;  %v3607_v9 = vmax.f32 %v3471_v34, 0.0  ;;  %v3433_v37 = vadd.f32 %v5804_v19, %v5516_v61 }
 0x545   : > { %v3476_v39 = vpop.f32.mrf.mxu1 }
 0x546   : > { %v3477_v10 = vadd.f32 %v3476_v39, %v5513_v1  ;;  %v3608_v8 = vmax.f32 %v3473_v7, 0.0  ;;  %v3673_v40 = vpack.c.bf16 %v3607_v9, %v3605_v17  ;;  %v3670_v39 = vpack.c.bf16 %v3600_v2, %v3598_v62 }
 0x547   : > { %v3478_v54 = vpop.f32.mrf.mxu1  ;;  %v3595_v7 = vmax.f32 %v3441_v35, 0.0  ;;  %v3592_v19 = vmax.f32 %v3433_v37, 0.0 }
 0x548   : > { %v3479_v11 = vadd.f32 %v3478_v54, %v5516_v61  ;;  %v3609_v38 = vmax.f32 %v3477_v10, 0.0  ;;  %v3674_v55 = vpack.c.bf16 %v3608_v8, %v3606_v3  ;;  %v3597_v54 = vmax.f32 %v3447_v33, 0.0 }
 0x549   : > { %v3480_v48 = vpop.f32.mrf.mxu1  ;;  %v3666_v34 = vpack.c.bf16 %v3592_v19, %v3590_v43 }
 0x54a   : > { %v3481_v6 = vadd.f32 %v3480_v48, %v5513_v1  ;;  %v3610_v23 = vmax.f32 %v3479_v11, 0.0  ;;  %v3594_v48 = vmax.f32 %v3439_v25, 0.0  ;;  %v3669_v11 = vpack.c.bf16 %v3599_v0, %v3597_v54 }
 0x54b   : > { %v3482_v13 = vpop.f32.mrf.mxu1 }
 0x54c   : > { %v3483_v44 = vadd.f32 %v3482_v13, %v5516_v61  ;;  %v3611_v4 = vmax.f32 %v3481_v6, 0.0  ;;  %v3680_v6 = vadd.s32 256, %v5593_v32  ;;  %v3668_v10 = vpack.c.bf16 %v3596_v36, %v3594_v48 }
 0x54d   : > { %v3427_v13 = vadd.f32 %v5792_v42, %v5513_v1  ;;  %v3667_v61 = vpack.c.bf16 %v3595_v7, %v3593_v46 }
 0x54e   : > { %v3612_v18 = vmax.f32 %v3483_v44, 0.0  ;;  %v3675_v52 = vpack.c.bf16 %v3611_v4, %v3609_v38  ;;  %v3591_v44 = vmax.f32 %v3431_v27, 0.0  ;;  %v3684_v22 = vadd.s32 %v3680_v6, %v5975_v21 }
 0x54f   : > { %v3589_v4 = vmax.f32 %v3427_v13, 0.0 }
 0x550   : > { %v3676_v28 = vpack.c.bf16 %v3612_v18, %v3610_v23  ;;  %v3688_v32 = vand.u32 1, %v3684_v22  ;;  %vm3696_vm3 = vcmp.lt.s32.totalorder %v3684_v22, 1000 }
 0x551   : > { %v3665_v49 = vpack.c.bf16 %v3591_v44, %v3589_v4 }
 0x552   : > { %3771 = vmatprep.subr.bf16.mxu0 %v3676_v28  ;;  %vm3692_vm2 = vcmp.eq.s32.totalorder %v3688_v32, %v5960_v50 }
 0x553   : > { %3772 = vmatpush2.bf16.msra.mxu0 %v3675_v52  ;;  %vm3700_vm5 = vmand %vm3692_vm2, %vm3696_vm3 }
 0x554   : > { %3773 = vmatprep.subr.bf16.mxu0 %v3674_v55  ;;  %vm3967_vm6 = vmpackc.low %vm3700_vm5, %vm3700_vm5 }
 0x557   : > { %3774 = vmatpush2.bf16.msra.mxu0 %v3673_v40 }
 0x558   : > { %3775 = vmatprep.subr.bf16.mxu0 %v3672_v12 }
 0x55b   : > { %3776 = vmatpush2.bf16.msra.mxu0 %v3671_v20 }
 0x55c   : > { %3777 = vmatprep.subr.bf16.mxu0 %v3670_v39 }
 0x55f   : > { %3778 = vmatpush2.bf16.msra.mxu0 %v3669_v11 }
 0x560   : > { %3779 = vmatprep.subr.bf16.mxu0 %v3668_v10 }
 0x563   : > { %3780 = vmatpush2.bf16.msra.mxu0 %v3667_v61 }
 0x564   : > { %3781 = vmatprep.subr.bf16.mxu0 %v3666_v34 }
 0x567   : > { %3782 = vmatpush2.bf16.msra.mxu0 %v3665_v49 }
 0x568   : > { %3783 = vmatprep.subr.bf16.mxu0 %v5800_v26 }
 0x56b   : > { %3784 = vmatpush2.bf16.msra.mxu0 %v5794_v31 }
 0x56c   : > { %3785 = vmatprep.subr.bf16.mxu0 %v5776_v57 }
 0x56f   : > { %3786 = vmatpush2.bf16.msra.mxu0 %v5770_v5 }
 0x572   : > { %3968 = vmatmul.mubr.msk.bf16.vlgmr.msra.gmra.mxu0 %vm3967_vm6, %v4505_v60 }
 0x5b2   : > { %v3748_v1 = vpop.f32.mrf.mxu0 }
 0x5b4   : > { %v3750_v21 = vpop.f32.mrf.mxu0 }
 0x5b6   : > { %v3752_v42 = vpop.f32.mrf.mxu0 }
 0x5b8   : > { %v3753_v53 = vpop.f32.mrf.mxu0 }
 0x632   : > { %v3789_v26 = vpop.f32.mrf.mxu0 }
 0x633   : > { %v3790_v50 = vadd.f32 %v3789_v26, %v3748_v1 }
 0x634   : > { %v3791_v31 = vpop.f32.mrf.mxu0 }
 0x635   : > { %3796 = vst [vmem:[%s392_s12] sm:$0xff] %v3790_v50  ;;  %v3792_v57 = vadd.f32 %v3791_v31, %v3750_v21 }
 0x636   : > { %v3793_v60 = vpop.f32.mrf.mxu0 }
 0x637   : > { %3797 = vst [vmem:[%s392_s12 + $0x8] sm:$0xff] %v3792_v57 }
 0x638   : > { %v3794_v5 = vpop.f32.mrf.mxu0 }
 0x639   : > { %4454 = shalt.err (!%p4451_p3)
}
 0x63a   : > { %s4455_s29 = scalar_lea.hbm %s5860_s16, 256  ;;  %s4459_s15 = scalar_lea.hbm %s5912_s11, 512 }
 0x63b   : > { %p4456_p4 = scmp.ne.s32.totalorder %s5860_s16, %s4455_s29  ;;  %p4460_p9 = scmp.lt.s32.totalorder %s5860_s16, %s5912_s11 }
 0x63c   : > { %p4461_p10 = scmp.lt.s32.totalorder %s4459_s15, %s4455_s29 }
 0x63d   : > { %p4457_p7 = pnand %p4456_p4, %p4605_p5 }
 0x63e   : > { %p4462_p11 = por %p4461_p10, %p4460_p9 }
 0x63f   : > { %p4458_p8 = pneg %p4457_p7 }
 0x641   : > { %p4463_p12 = pnand %p4462_p11, %p4458_p8 }
 0x643   : > { %4466 = shalt.err (!%p4463_p12)
}
 0x644   : > { %4351 = dma.vmem_to_hbm [thread:$0]  (%p4605_p5), %s5862_s13, 256, %s5860_s16, %s3799_s21  }
 0x645 PF: > { %p4357_p13 = scmp.ge.s32.totalorder %s4501_s20, 2  ;;  %s3825_s30 = sand.u32 1, %s4489_s17  }
 0x646   : > { %s3826_s0 = scalar_lea.sflag [#allocation3], %s3825_s30 }
 0x647   : > { %p4354_p0 = pnand %p4357_p13, %p4609_p6 }
 0x649   : > { %p4355_p1 = pneg %p4354_p0 }
 0x64b   : > { %4484 = dma.done.wait (%p4355_p1), %s3826_s0, 256  }
 0x64c   : > { %4486 = vsyncadd (%p4355_p1), %s3826_s0, 4294967040  ;;  %p21_p2 = scmp.ge.s32.totalorder %s4592_s23, 4   ;;  %s5976_s17 = smov %s4493_s18 }
 0x64d   : > { %s5977_s18 = smov %s4497_s19  ;;  %s5978_s19 = smov %s4603_s26 }
 0x64e   : > { %s5979_s20 = smov %s4592_s23  ;;  %23 = sbr.rel (!%p21_p2) target bundleno = 5 (0x5), region = 99 }
 0x653   :  { %3831 = vsyncpa [#allocation3], 1 }
 0x654   :  { %3833 = vsyncpa [#allocation3 + $0x1], 1 }

</bundles_post_ra>
